<compile_context>
chip_gen: v7x
topology: tpu7x:2x2x1
jax: 0.10.0
libtpu: 0.0.40
codegen_flags: <defaults>
</compile_context>

<pallas_src>
import jax
import jax.numpy as jnp
from jax.experimental import pallas as pl
from jax.experimental.pallas import tpu as pltpu

CPAD = 128   # lane-padded channel count (full vreg lane width)
WOFF = 8     # sublane-aligned offset of the conv interior inside the padded scratch


# ----------------------------------------------------------------------------
# Fused kernel factory
# ----------------------------------------------------------------------------
def _make_fused_kernel(num_blocks, spatial, target_size):
    """Fused forward kernel for `num_blocks` conv blocks.

    Ref order: x, mean, inv_std, (w_i, b_i)*num_blocks, lin_w, lin_b,
               out, pad_buf_i*num_blocks, pool_buf_i*(num_blocks-1)
    """

    def kernel(*refs):
        x_ref, mean_ref, inv_ref = refs[0], refs[1], refs[2]
        blk_refs = refs[3:3 + 2 * num_blocks]
        lw_ref = refs[3 + 2 * num_blocks]
        lb_ref = refs[4 + 2 * num_blocks]
        o_ref = refs[5 + 2 * num_blocks]
        scratch = refs[6 + 2 * num_blocks:]
        pad_bufs = scratch[:num_blocks]
        pool_bufs = scratch[num_blocks:]

        # normalize(x): per-channel standardization, fused (padded channels stay 0).
        x = (x_ref[...] - mean_ref[...]) * inv_ref[...]          # (1, H0, W0, CPAD) f32

        for i in range(num_blocks):
            H, W = spatial[i]
            w_ref, b_ref = blk_refs[2 * i], blk_refs[2 * i + 1]
            pad_buf = pad_bufs[i]

            # Zero-pad H,W by 1 inside a VMEM scratch; the interior lives at a
            # sublane-aligned offset so the store is a full, unmasked store.
            pad_buf[...] = jnp.zeros(pad_buf.shape, pad_buf.dtype)
            pad_buf[:, 1:H + 1, WOFF:WOFF + W, :] = x

            # im2col: 9 shifted views concatenated on the lane axis -> one matmul.
            taps = [pad_buf[:, dy:dy + H, WOFF - 1 + dx:WOFF - 1 + dx + W, :]
                    for dy in range(3) for dx in range(3)]
            patch = jnp.concatenate(taps, axis=-1)               # (1, H, W, 9*CPAD) f32
            patch = patch.reshape(H * W, 9 * CPAD).astype(jnp.bfloat16)
            acc = jnp.dot(patch, w_ref[...],                     # bf16 x bf16 -> f32 acc
                          preferred_element_type=jnp.float32)    # (H*W, CPAD)

            # folded-BN bias + ReLU (f32 epilogue on the f32 accumulator).
            y = jnp.maximum(acc + b_ref[...], 0.0)
            x = y.reshape(1, H, W, CPAD)

            # MaxPool2d(2) after every block except the last.
            # TODO(synk): assumes even H/W (PyTorch MaxPool2d would floor odd sizes).
            if i < num_blocks - 1:
                Hh, Wh = H // 2, W // 2
                # H direction: free major-dim split + max.
                yh = jnp.max(x.reshape(1, Hh, 2, W, CPAD), axis=2)   # (1, Hh, W, CPAD)
                pbuf = pool_bufs[i]
                pbuf[...] = yh
                # W direction: sublane-strided reads (stride 2) from VMEM scratch.
                x = jnp.maximum(pbuf[:, :, pl.ds(0, Wh, 2), :],
                                pbuf[:, :, pl.ds(1, Wh, 2), :])      # (1, Hh, Wh, CPAD)

        # AdaptiveAvgPool2d(1) + Flatten + Linear (padded channels contribute 0).
        _, Hf, Wf, _ = x.shape
        feat = jnp.sum(x.reshape(Hf * Wf, CPAD), axis=0, keepdims=True) * (1.0 / (Hf * Wf))
        out = jnp.dot(feat, lw_ref[...], preferred_element_type=jnp.float32) + lb_ref[...]
        o_ref[...] = out.reshape(1, 1, target_size)

    return kernel


# ----------------------------------------------------------------------------
# Wrapper: one pallas_call for the whole forward pass
# ----------------------------------------------------------------------------
@jax.jit
def conv_forward(x_nchw, params):
    """Forward pass of the PyTorch `Conv` module (target head only)."""
    # NCHW (PyTorch) -> NHWC, channels zero-padded to 128 lanes (one-time boundary op).
    x = jnp.transpose(x_nchw, (0, 2, 3, 1)).astype(jnp.float32)
    B, H0, W0, cin0 = x.shape
    x = jnp.pad(x, ((0, 0), (0, 0), (0, 0), (0, CPAD - cin0)))

    blocks = params['blocks']
    n = len(blocks)
    target_size = params['lin_w'].shape[1]

    # block i sees the input downsampled by 2**i (pool after blocks 0..n-2).
    spatial = []
    h, w = H0, W0
    for i in range(n):
        spatial.append((h, w))
        if i < n - 1:
            assert h % 2 == 0 and w % 2 == 0, "MaxPool2d(2) path requires even spatial dims"
            h, w = h // 2, w // 2

    inputs = [x, params['norm_mean'], params['norm_inv_std']]
    in_specs = [
        pl.BlockSpec((1, H0, W0, CPAD), lambda b: (b, 0, 0, 0)),
        pl.BlockSpec((1, 1, 1, CPAD), lambda b: (0, 0, 0, 0)),
        pl.BlockSpec((1, 1, 1, CPAD), lambda b: (0, 0, 0, 0)),
    ]
    for blk in blocks:
        inputs += [blk['w'], blk['b']]
        in_specs += [pl.BlockSpec((9 * CPAD, CPAD), lambda b: (0, 0)),
                     pl.BlockSpec((1, CPAD), lambda b: (0, 0))]
    inputs += [params['lin_w'], params['lin_b']]
    in_specs += [pl.BlockSpec((CPAD, target_size), lambda b: (0, 0)),
                 pl.BlockSpec((1, target_size), lambda b: (0, 0))]

    scratch_shapes = []
    for (hh, ww) in spatial:                               # zero-padded conv inputs
        scratch_shapes.append(pltpu.VMEM((1, hh + 2, ww + 2 * WOFF, CPAD), jnp.float32))
    for (hh, ww) in spatial[:-1]:                          # H-pooled maxpool staging
        scratch_shapes.append(pltpu.VMEM((1, hh // 2, ww, CPAD), jnp.float32))

    out = pl.pallas_call(
        _make_fused_kernel(n, tuple(spatial), target_size),
        out_shape=jax.ShapeDtypeStruct((B, 1, target_size), jnp.float32),
        grid=(B,),
        in_specs=in_specs,
        out_specs=pl.BlockSpec((1, 1, target_size), lambda b: (b, 0, 0)),
        scratch_shapes=scratch_shapes,
        compiler_params=pltpu.CompilerParams(dimension_semantics=("parallel",)),
    )(*inputs)

    # TODO(synk): `feature_split` branch skipped (no 'feature_split' in input).
    # TODO(synk): loss_fn / cfg['data_name'] branches skipped (no 'target' in input).
    return out[:, 0, :]


# ----------------------------------------------------------------------------
# Deterministic parameter init (synthetic, mirrors the PyTorch module's shapes)
# ----------------------------------------------------------------------------
def init_params(key, data_shape, hidden_size, target_size):
    cin0 = data_shape[0]
    chans = [cin0] + list(hidden_size)
    n = len(hidden_size)
    keys = jax.random.split(key, 5 * n + 2)
    k_idx = 0
    eps = 1e-5

    params = {'blocks': []}
    # TODO(synk): the original `normalize` uses cfg-driven dataset statistics; fixed
    # constants are used here since cfg is external to the module.
    params['norm_mean'] = jnp.zeros((1, 1, 1, CPAD), jnp.float32).at[..., :cin0].set(0.5)
    params['norm_inv_std'] = jnp.zeros((1, 1, 1, CPAD), jnp.float32).at[..., :cin0].set(1.0 / 0.25)

    for i in range(n):
        cin, cout = chans[i], chans[i + 1]
        # PyTorch Conv2d weight layout (Cout, Cin, 3, 3).
        w = 0.1 * jax.random.normal(keys[k_idx], (cout, cin, 3, 3), jnp.float32); k_idx += 1
        # BatchNorm2d (eval mode): fold scale into the conv weights, shift into a bias.
        gamma = 1.0 + 0.1 * jax.random.normal(keys[k_idx], (cout,), jnp.float32); k_idx += 1
        beta = 0.1 * jax.random.normal(keys[k_idx], (cout,), jnp.float32); k_idx += 1
        rmean = 0.1 * jax.random.normal(keys[k_idx], (cout,), jnp.float32); k_idx += 1
        rvar = 1.0 + 0.1 * jax.random.uniform(keys[k_idx], (cout,), jnp.float32); k_idx += 1
        scale = gamma * jax.lax.rsqrt(rvar + eps)
        bias = beta - rmean * scale

        w_folded = w * scale[:, None, None, None]                 # scale per out-channel
        w9 = jnp.transpose(w_folded, (2, 3, 1, 0))                # (3, 3, Cin, Cout)
        w_pad = jnp.zeros((3, 3, CPAD, CPAD), jnp.float32).at[:, :, :cin, :cout].set(w9)
        # im2col weight, row index = (3*dy + dx)*CPAD + cin; bf16 MXU operand.
        w_mat = w_pad.reshape(9 * CPAD, CPAD).astype(jnp.bfloat16)
        b_pad = jnp.zeros((1, CPAD), jnp.float32).at[0, :cout].set(bias)
        params['blocks'].append({'w': w_mat, 'b': b_pad})

    clast = chans[-1]
    lin_w = 0.1 * jax.random.normal(keys[k_idx], (clast, target_size), jnp.float32); k_idx += 1
    lin_b = 0.1 * jax.random.normal(keys[k_idx], (1, target_size), jnp.float32); k_idx += 1
    params['lin_w'] = jnp.zeros((CPAD, target_size), jnp.float32).at[:clast, :].set(lin_w)
    params['lin_b'] = lin_b
    return params


# ----------------------------------------------------------------------------
if __name__ == "__main__":
    key = jax.random.PRNGKey(0)
    data_shape = (4, 16, 16)       # (C, H, W) as in the PyTorch module
    hidden_size = [8, 16]
    target_size = 10
    batch = 2

    k_params, k_x = jax.random.split(key)
    params = init_params(k_params, data_shape, hidden_size, target_size)
    x = jax.random.normal(k_x, (batch,) + data_shape, dtype=jnp.float32)  # NCHW

    out = conv_forward(x, params)
    out = jax.block_until_ready(out)
    assert out.shape == (batch, target_size), out.shape
    assert bool(jnp.all(jnp.isfinite(out)))
    print("KERNEL_OK")
</pallas_src>

<mosaic_0001>
module attributes {stable_mosaic.version = 11 : i64} {
  func.func @kernel(%arg0: i32, %arg1: memref<1x16x16x128xf32, #tpu.memory_space<vmem>>, %arg2: memref<1x1x1x128xf32, #tpu.memory_space<vmem>>, %arg3: memref<1x1x1x128xf32, #tpu.memory_space<vmem>>, %arg4: memref<1152x128xbf16, #tpu.memory_space<vmem>>, %arg5: memref<1x128xf32, #tpu.memory_space<vmem>>, %arg6: memref<1152x128xbf16, #tpu.memory_space<vmem>>, %arg7: memref<1x128xf32, #tpu.memory_space<vmem>>, %arg8: memref<128x10xf32, #tpu.memory_space<vmem>>, %arg9: memref<1x10xf32, #tpu.memory_space<vmem>>, %arg10: memref<1x1x10xf32, #tpu.memory_space<vmem>>, %arg11: memref<1x18x32x128xf32, #tpu.memory_space<vmem>>, %arg12: memref<1x10x24x128xf32, #tpu.memory_space<vmem>>, %arg13: memref<1x8x16x128xf32, #tpu.memory_space<vmem>>) attributes {dimension_semantics = [#tpu.dimension_semantics<parallel>], iteration_bounds = array<i64: 2>, scalar_prefetch = 0 : i64, scratch_operands = 3 : i64, tpu.core_type = #tpu.core_type<tc>, window_params = [{transform_indices = @transform_0, window_bounds = array<i64: 1, 16, 16, 128>}, {pipeline_mode = #tpu.pipeline_mode<synchronous>, transform_indices = @transform_1, window_bounds = array<i64: 1, 1, 1, 128>}, {pipeline_mode = #tpu.pipeline_mode<synchronous>, transform_indices = @transform_2, window_bounds = array<i64: 1, 1, 1, 128>}, {pipeline_mode = #tpu.pipeline_mode<synchronous>, transform_indices = @transform_3, window_bounds = array<i64: 1152, 128>}, {pipeline_mode = #tpu.pipeline_mode<synchronous>, transform_indices = @transform_4, window_bounds = array<i64: 1, 128>}, {pipeline_mode = #tpu.pipeline_mode<synchronous>, transform_indices = @transform_5, window_bounds = array<i64: 1152, 128>}, {pipeline_mode = #tpu.pipeline_mode<synchronous>, transform_indices = @transform_6, window_bounds = array<i64: 1, 128>}, {pipeline_mode = #tpu.pipeline_mode<synchronous>, transform_indices = @transform_7, window_bounds = array<i64: 128, 10>}, {pipeline_mode = #tpu.pipeline_mode<synchronous>, transform_indices = @transform_8, window_bounds = array<i64: 1, 10>}, {transform_indices = @transform_9, window_bounds = array<i64: 1, 1, 10>}]} {
    %c0 = arith.constant 0 : index
    %c0_0 = arith.constant 0 : index
    %c0_1 = arith.constant 0 : index
    %c0_2 = arith.constant 0 : index
    %0 = vector.load %arg1[%c0, %c0_0, %c0_1, %c0_2] : memref<1x16x16x128xf32, #tpu.memory_space<vmem>>, vector<1x16x16x128xf32>
    %c0_3 = arith.constant 0 : index
    %c0_4 = arith.constant 0 : index
    %c0_5 = arith.constant 0 : index
    %c0_6 = arith.constant 0 : index
    %1 = vector.load %arg2[%c0_3, %c0_4, %c0_5, %c0_6] : memref<1x1x1x128xf32, #tpu.memory_space<vmem>>, vector<1x1x1x128xf32>
    %2 = vector.broadcast %1 : vector<1x1x1x128xf32> to vector<1x16x16x128xf32>
    %3 = arith.subf %0, %2 : vector<1x16x16x128xf32>
    %c0_7 = arith.constant 0 : index
    %c0_8 = arith.constant 0 : index
    %c0_9 = arith.constant 0 : index
    %c0_10 = arith.constant 0 : index
    %4 = vector.load %arg3[%c0_7, %c0_8, %c0_9, %c0_10] : memref<1x1x1x128xf32, #tpu.memory_space<vmem>>, vector<1x1x1x128xf32>
    %5 = vector.broadcast %4 : vector<1x1x1x128xf32> to vector<1x16x16x128xf32>
    %6 = arith.mulf %3, %5 : vector<1x16x16x128xf32>
    %cst = arith.constant 0.000000e+00 : f32
    %7 = vector.broadcast %cst : f32 to vector<1x18x32x128xf32>
    %c0_11 = arith.constant 0 : index
    %c0_12 = arith.constant 0 : index
    %c0_13 = arith.constant 0 : index
    %c0_14 = arith.constant 0 : index
    %8 = vector.load %arg11[%c0_11, %c0_12, %c0_13, %c0_14] : memref<1x18x32x128xf32, #tpu.memory_space<vmem>>, vector<1x18x32x128xf32>
    tpu.vector_store %arg11[%c0_11, %c0_12, %c0_13, %c0_14], %7 {strides = array<i32>} : memref<1x18x32x128xf32, #tpu.memory_space<vmem>>, vector<1x18x32x128xf32>,
    %c0_15 = arith.constant 0 : index
    %c1 = arith.constant 1 : index
    %c8 = arith.constant 8 : index
    %c0_16 = arith.constant 0 : index
    %9 = vector.load %arg11[%c0_15, %c1, %c8, %c0_16] : memref<1x18x32x128xf32, #tpu.memory_space<vmem>>, vector<1x16x16x128xf32>
    tpu.vector_store %arg11[%c0_15, %c1, %c8, %c0_16], %6 {strides = array<i32>} : memref<1x18x32x128xf32, #tpu.memory_space<vmem>>, vector<1x16x16x128xf32>,
    %c0_17 = arith.constant 0 : index
    %c0_18 = arith.constant 0 : index
    %c7 = arith.constant 7 : index
    %c0_19 = arith.constant 0 : index
    %10 = vector.load %arg11[%c0_17, %c0_18, %c7, %c0_19] : memref<1x18x32x128xf32, #tpu.memory_space<vmem>>, vector<1x16x16x128xf32>
    %c0_20 = arith.constant 0 : index
    %c0_21 = arith.constant 0 : index
    %c8_22 = arith.constant 8 : index
    %c0_23 = arith.constant 0 : index
    %11 = vector.load %arg11[%c0_20, %c0_21, %c8_22, %c0_23] : memref<1x18x32x128xf32, #tpu.memory_space<vmem>>, vector<1x16x16x128xf32>
    %c0_24 = arith.constant 0 : index
    %c0_25 = arith.constant 0 : index
    %c9 = arith.constant 9 : index
    %c0_26 = arith.constant 0 : index
    %12 = vector.load %arg11[%c0_24, %c0_25, %c9, %c0_26] : memref<1x18x32x128xf32, #tpu.memory_space<vmem>>, vector<1x16x16x128xf32>
    %c0_27 = arith.constant 0 : index
    %c1_28 = arith.constant 1 : index
    %c7_29 = arith.constant 7 : index
    %c0_30 = arith.constant 0 : index
    %13 = vector.load %arg11[%c0_27, %c1_28, %c7_29, %c0_30] : memref<1x18x32x128xf32, #tpu.memory_space<vmem>>, vector<1x16x16x128xf32>
    %c0_31 = arith.constant 0 : index
    %c1_32 = arith.constant 1 : index
    %c8_33 = arith.constant 8 : index
    %c0_34 = arith.constant 0 : index
    %14 = vector.load %arg11[%c0_31, %c1_32, %c8_33, %c0_34] : memref<1x18x32x128xf32, #tpu.memory_space<vmem>>, vector<1x16x16x128xf32>
    %c0_35 = arith.constant 0 : index
    %c1_36 = arith.constant 1 : index
    %c9_37 = arith.constant 9 : index
    %c0_38 = arith.constant 0 : index
    %15 = vector.load %arg11[%c0_35, %c1_36, %c9_37, %c0_38] : memref<1x18x32x128xf32, #tpu.memory_space<vmem>>, vector<1x16x16x128xf32>
    %c0_39 = arith.constant 0 : index
    %c2 = arith.constant 2 : index
    %c7_40 = arith.constant 7 : index
    %c0_41 = arith.constant 0 : index
    %16 = vector.load %arg11[%c0_39, %c2, %c7_40, %c0_41] : memref<1x18x32x128xf32, #tpu.memory_space<vmem>>, vector<1x16x16x128xf32>
    %c0_42 = arith.constant 0 : index
    %c2_43 = arith.constant 2 : index
    %c8_44 = arith.constant 8 : index
    %c0_45 = arith.constant 0 : index
    %17 = vector.load %arg11[%c0_42, %c2_43, %c8_44, %c0_45] : memref<1x18x32x128xf32, #tpu.memory_space<vmem>>, vector<1x16x16x128xf32>
    %c0_46 = arith.constant 0 : index
    %c2_47 = arith.constant 2 : index
    %c9_48 = arith.constant 9 : index
    %c0_49 = arith.constant 0 : index
    %18 = vector.load %arg11[%c0_46, %c2_47, %c9_48, %c0_49] : memref<1x18x32x128xf32, #tpu.memory_space<vmem>>, vector<1x16x16x128xf32>
    %19 = tpu.concatenate %10, %11, %12, %13, %14, %15, %16, %17, %18 in 3 : vector<1x16x16x128xf32>, vector<1x16x16x128xf32>, vector<1x16x16x128xf32>, vector<1x16x16x128xf32>, vector<1x16x16x128xf32>, vector<1x16x16x128xf32>, vector<1x16x16x128xf32>, vector<1x16x16x128xf32>, vector<1x16x16x128xf32> -> vector<1x16x16x1152xf32>
    %20 = vector.shape_cast %19 : vector<1x16x16x1152xf32> to vector<256x1152xf32>
    %21 = arith.truncf %20 : vector<256x1152xf32> to vector<256x1152xbf16>
    %c0_50 = arith.constant 0 : index
    %c0_51 = arith.constant 0 : index
    %22 = vector.load %arg4[%c0_50, %c0_51] : memref<1152x128xbf16, #tpu.memory_space<vmem>>, vector<1152x128xbf16>
    %cst_52 = arith.constant dense<0.000000e+00> : vector<256x128xf32>
    %23 = tpu.matmul %21, %22, %cst_52 {dimension_numbers = #tpu.dot_dimension_numbers<[1], [0], [0], [1], [0, 0, 1, 1], [], []>} : vector<256x1152xbf16>, vector<1152x128xbf16>, vector<256x128xf32> -> vector<256x128xf32>
    %c0_53 = arith.constant 0 : index
    %c0_54 = arith.constant 0 : index
    %24 = vector.load %arg5[%c0_53, %c0_54] : memref<1x128xf32, #tpu.memory_space<vmem>>, vector<1x128xf32>
    %25 = vector.broadcast %24 : vector<1x128xf32> to vector<256x128xf32>
    %26 = arith.addf %23, %25 : vector<256x128xf32>
    %cst_55 = arith.constant 0.000000e+00 : f32
    %27 = vector.broadcast %cst_55 : f32 to vector<256x128xf32>
    %28 = arith.maximumf %26, %27 : vector<256x128xf32>
    %29 = vector.shape_cast %28 : vector<256x128xf32> to vector<1x16x16x128xf32>
    %30 = vector.shape_cast %29 : vector<1x16x16x128xf32> to vector<1x8x2x16x128xf32>
    %cst_56 = arith.constant dense<0xFF800000> : vector<1x8x16x128xf32>
    %31 = vector.multi_reduction <maximumf>, %30, %cst_56 [2] : vector<1x8x2x16x128xf32> to vector<1x8x16x128xf32>
    %c0_57 = arith.constant 0 : index
    %c0_58 = arith.constant 0 : index
    %c0_59 = arith.constant 0 : index
    %c0_60 = arith.constant 0 : index
    %32 = vector.load %arg13[%c0_57, %c0_58, %c0_59, %c0_60] : memref<1x8x16x128xf32, #tpu.memory_space<vmem>>, vector<1x8x16x128xf32>
    tpu.vector_store %arg13[%c0_57, %c0_58, %c0_59, %c0_60], %31 {strides = array<i32>} : memref<1x8x16x128xf32, #tpu.memory_space<vmem>>, vector<1x8x16x128xf32>,
    %c0_61 = arith.constant 0 : index
    %c0_62 = arith.constant 0 : index
    %c0_63 = arith.constant 0 : index
    %c0_64 = arith.constant 0 : index
    %33 = tpu.strided_load %arg13[%c0_61, %c0_62, %c0_63, %c0_64] {strides = array<i32: 1, 1, 2, 1>} : memref<1x8x16x128xf32, #tpu.memory_space<vmem>>, vector<1x8x8x128xf32>
    %c0_65 = arith.constant 0 : index
    %c0_66 = arith.constant 0 : index
    %c1_67 = arith.constant 1 : index
    %c0_68 = arith.constant 0 : index
    %34 = tpu.strided_load %arg13[%c0_65, %c0_66, %c1_67, %c0_68] {strides = array<i32: 1, 1, 2, 1>} : memref<1x8x16x128xf32, #tpu.memory_space<vmem>>, vector<1x8x8x128xf32>
    %35 = arith.maximumf %33, %34 : vector<1x8x8x128xf32>
    %cst_69 = arith.constant 0.000000e+00 : f32
    %36 = vector.broadcast %cst_69 : f32 to vector<1x10x24x128xf32>
    %c0_70 = arith.constant 0 : index
    %c0_71 = arith.constant 0 : index
    %c0_72 = arith.constant 0 : index
    %c0_73 = arith.constant 0 : index
    %37 = vector.load %arg12[%c0_70, %c0_71, %c0_72, %c0_73] : memref<1x10x24x128xf32, #tpu.memory_space<vmem>>, vector<1x10x24x128xf32>
    tpu.vector_store %arg12[%c0_70, %c0_71, %c0_72, %c0_73], %36 {strides = array<i32>} : memref<1x10x24x128xf32, #tpu.memory_space<vmem>>, vector<1x10x24x128xf32>,
    %c0_74 = arith.constant 0 : index
    %c1_75 = arith.constant 1 : index
    %c8_76 = arith.constant 8 : index
    %c0_77 = arith.constant 0 : index
    %38 = vector.load %arg12[%c0_74, %c1_75, %c8_76, %c0_77] : memref<1x10x24x128xf32, #tpu.memory_space<vmem>>, vector<1x8x8x128xf32>
    tpu.vector_store %arg12[%c0_74, %c1_75, %c8_76, %c0_77], %35 {strides = array<i32>} : memref<1x10x24x128xf32, #tpu.memory_space<vmem>>, vector<1x8x8x128xf32>,
    %c0_78 = arith.constant 0 : index
    %c0_79 = arith.constant 0 : index
    %c7_80 = arith.constant 7 : index
    %c0_81 = arith.constant 0 : index
    %39 = vector.load %arg12[%c0_78, %c0_79, %c7_80, %c0_81] : memref<1x10x24x128xf32, #tpu.memory_space<vmem>>, vector<1x8x8x128xf32>
    %c0_82 = arith.constant 0 : index
    %c0_83 = arith.constant 0 : index
    %c8_84 = arith.constant 8 : index
    %c0_85 = arith.constant 0 : index
    %40 = vector.load %arg12[%c0_82, %c0_83, %c8_84, %c0_85] : memref<1x10x24x128xf32, #tpu.memory_space<vmem>>, vector<1x8x8x128xf32>
    %c0_86 = arith.constant 0 : index
    %c0_87 = arith.constant 0 : index
    %c9_88 = arith.constant 9 : index
    %c0_89 = arith.constant 0 : index
    %41 = vector.load %arg12[%c0_86, %c0_87, %c9_88, %c0_89] : memref<1x10x24x128xf32, #tpu.memory_space<vmem>>, vector<1x8x8x128xf32>
    %c0_90 = arith.constant 0 : index
    %c1_91 = arith.constant 1 : index
    %c7_92 = arith.constant 7 : index
    %c0_93 = arith.constant 0 : index
    %42 = vector.load %arg12[%c0_90, %c1_91, %c7_92, %c0_93] : memref<1x10x24x128xf32, #tpu.memory_space<vmem>>, vector<1x8x8x128xf32>
    %c0_94 = arith.constant 0 : index
    %c1_95 = arith.constant 1 : index
    %c8_96 = arith.constant 8 : index
    %c0_97 = arith.constant 0 : index
    %43 = vector.load %arg12[%c0_94, %c1_95, %c8_96, %c0_97] : memref<1x10x24x128xf32, #tpu.memory_space<vmem>>, vector<1x8x8x128xf32>
    %c0_98 = arith.constant 0 : index
    %c1_99 = arith.constant 1 : index
    %c9_100 = arith.constant 9 : index
    %c0_101 = arith.constant 0 : index
    %44 = vector.load %arg12[%c0_98, %c1_99, %c9_100, %c0_101] : memref<1x10x24x128xf32, #tpu.memory_space<vmem>>, vector<1x8x8x128xf32>
    %c0_102 = arith.constant 0 : index
    %c2_103 = arith.constant 2 : index
    %c7_104 = arith.constant 7 : index
    %c0_105 = arith.constant 0 : index
    %45 = vector.load %arg12[%c0_102, %c2_103, %c7_104, %c0_105] : memref<1x10x24x128xf32, #tpu.memory_space<vmem>>, vector<1x8x8x128xf32>
    %c0_106 = arith.constant 0 : index
    %c2_107 = arith.constant 2 : index
    %c8_108 = arith.constant 8 : index
    %c0_109 = arith.constant 0 : index
    %46 = vector.load %arg12[%c0_106, %c2_107, %c8_108, %c0_109] : memref<1x10x24x128xf32, #tpu.memory_space<vmem>>, vector<1x8x8x128xf32>
    %c0_110 = arith.constant 0 : index
    %c2_111 = arith.constant 2 : index
    %c9_112 = arith.constant 9 : index
    %c0_113 = arith.constant 0 : index
    %47 = vector.load %arg12[%c0_110, %c2_111, %c9_112, %c0_113] : memref<1x10x24x128xf32, #tpu.memory_space<vmem>>, vector<1x8x8x128xf32>
    %48 = tpu.concatenate %39, %40, %41, %42, %43, %44, %45, %46, %47 in 3 : vector<1x8x8x128xf32>, vector<1x8x8x128xf32>, vector<1x8x8x128xf32>, vector<1x8x8x128xf32>, vector<1x8x8x128xf32>, vector<1x8x8x128xf32>, vector<1x8x8x128xf32>, vector<1x8x8x128xf32>, vector<1x8x8x128xf32> -> vector<1x8x8x1152xf32>
    %49 = vector.shape_cast %48 : vector<1x8x8x1152xf32> to vector<64x1152xf32>
    %50 = arith.truncf %49 : vector<64x1152xf32> to vector<64x1152xbf16>
    %c0_114 = arith.constant 0 : index
    %c0_115 = arith.constant 0 : index
    %51 = vector.load %arg6[%c0_114, %c0_115] : memref<1152x128xbf16, #tpu.memory_space<vmem>>, vector<1152x128xbf16>
    %cst_116 = arith.constant dense<0.000000e+00> : vector<64x128xf32>
    %52 = tpu.matmul %50, %51, %cst_116 {dimension_numbers = #tpu.dot_dimension_numbers<[1], [0], [0], [1], [0, 0, 1, 1], [], []>} : vector<64x1152xbf16>, vector<1152x128xbf16>, vector<64x128xf32> -> vector<64x128xf32>
    %c0_117 = arith.constant 0 : index
    %c0_118 = arith.constant 0 : index
    %53 = vector.load %arg7[%c0_117, %c0_118] : memref<1x128xf32, #tpu.memory_space<vmem>>, vector<1x128xf32>
    %54 = vector.broadcast %53 : vector<1x128xf32> to vector<64x128xf32>
    %55 = arith.addf %52, %54 : vector<64x128xf32>
    %cst_119 = arith.constant 0.000000e+00 : f32
    %56 = vector.broadcast %cst_119 : f32 to vector<64x128xf32>
    %57 = arith.maximumf %55, %56 : vector<64x128xf32>
    %58 = vector.shape_cast %57 : vector<64x128xf32> to vector<1x8x8x128xf32>
    %59 = vector.shape_cast %58 : vector<1x8x8x128xf32> to vector<64x128xf32>
    %cst_120 = arith.constant dense<0.000000e+00> : vector<128xf32>
    %60 = vector.multi_reduction <add>, %59, %cst_120 [0] : vector<64x128xf32> to vector<128xf32>
    %61 = vector.shape_cast %60 : vector<128xf32> to vector<1x128xf32>
    %cst_121 = arith.constant 1.562500e-02 : f32
    %62 = vector.broadcast %cst_121 : f32 to vector<1x128xf32>
    %63 = arith.mulf %61, %62 : vector<1x128xf32>
    %c0_122 = arith.constant 0 : index
    %c0_123 = arith.constant 0 : index
    %64 = vector.load %arg8[%c0_122, %c0_123] : memref<128x10xf32, #tpu.memory_space<vmem>>, vector<128x10xf32>
    %cst_124 = arith.constant dense<0.000000e+00> : vector<1x10xf32>
    %65 = tpu.matmul %63, %64, %cst_124 {dimension_numbers = #tpu.dot_dimension_numbers<[1], [0], [0], [1], [0, 0, 1, 1], [], []>} : vector<1x128xf32>, vector<128x10xf32>, vector<1x10xf32> -> vector<1x10xf32>
    %c0_125 = arith.constant 0 : index
    %c0_126 = arith.constant 0 : index
    %66 = vector.load %arg9[%c0_125, %c0_126] : memref<1x10xf32, #tpu.memory_space<vmem>>, vector<1x10xf32>
    %67 = arith.addf %65, %66 : vector<1x10xf32>
    %68 = vector.shape_cast %67 : vector<1x10xf32> to vector<1x1x10xf32>
    %c0_127 = arith.constant 0 : index
    %c0_128 = arith.constant 0 : index
    %c0_129 = arith.constant 0 : index
    %69 = vector.load %arg10[%c0_127, %c0_128, %c0_129] : memref<1x1x10xf32, #tpu.memory_space<vmem>>, vector<1x1x10xf32>
    tpu.vector_store %arg10[%c0_127, %c0_128, %c0_129], %68 {strides = array<i32>} : memref<1x1x10xf32, #tpu.memory_space<vmem>>, vector<1x1x10xf32>,
    return
  }
  func.func @transform_0(%arg0: i32) -> (i32, i32, i32, i32) {
    %c0_i32 = arith.constant 0 : i32
    %c0_i32_0 = arith.constant 0 : i32
    %c0_i32_1 = arith.constant 0 : i32
    %c0_i32_2 = arith.constant 0 : i32
    return %arg0, %c0_i32, %c0_i32_0, %c0_i32_1 : i32, i32, i32, i32
  }
  func.func @transform_1(%arg0: i32) -> (i32, i32, i32, i32) {
    %c0_i32 = arith.constant 0 : i32
    %c0_i32_0 = arith.constant 0 : i32
    %c0_i32_1 = arith.constant 0 : i32
    %c0_i32_2 = arith.constant 0 : i32
    %c0_i32_3 = arith.constant 0 : i32
    return %c0_i32, %c0_i32_0, %c0_i32_1, %c0_i32_2 : i32, i32, i32, i32
  }
  func.func @transform_2(%arg0: i32) -> (i32, i32, i32, i32) {
    %c0_i32 = arith.constant 0 : i32
    %c0_i32_0 = arith.constant 0 : i32
    %c0_i32_1 = arith.constant 0 : i32
    %c0_i32_2 = arith.constant 0 : i32
    %c0_i32_3 = arith.constant 0 : i32
    return %c0_i32, %c0_i32_0, %c0_i32_1, %c0_i32_2 : i32, i32, i32, i32
  }
  func.func @transform_3(%arg0: i32) -> (i32, i32) {
    %c0_i32 = arith.constant 0 : i32
    %c0_i32_0 = arith.constant 0 : i32
    %c0_i32_1 = arith.constant 0 : i32
    return %c0_i32, %c0_i32_0 : i32, i32
  }
  func.func @transform_4(%arg0: i32) -> (i32, i32) {
    %c0_i32 = arith.constant 0 : i32
    %c0_i32_0 = arith.constant 0 : i32
    %c0_i32_1 = arith.constant 0 : i32
    return %c0_i32, %c0_i32_0 : i32, i32
  }
  func.func @transform_5(%arg0: i32) -> (i32, i32) {
    %c0_i32 = arith.constant 0 : i32
    %c0_i32_0 = arith.constant 0 : i32
    %c0_i32_1 = arith.constant 0 : i32
    return %c0_i32, %c0_i32_0 : i32, i32
  }
  func.func @transform_6(%arg0: i32) -> (i32, i32) {
    %c0_i32 = arith.constant 0 : i32
    %c0_i32_0 = arith.constant 0 : i32
    %c0_i32_1 = arith.constant 0 : i32
    return %c0_i32, %c0_i32_0 : i32, i32
  }
  func.func @transform_7(%arg0: i32) -> (i32, i32) {
    %c0_i32 = arith.constant 0 : i32
    %c0_i32_0 = arith.constant 0 : i32
    %c0_i32_1 = arith.constant 0 : i32
    return %c0_i32, %c0_i32_0 : i32, i32
  }
  func.func @transform_8(%arg0: i32) -> (i32, i32) {
    %c0_i32 = arith.constant 0 : i32
    %c0_i32_0 = arith.constant 0 : i32
    %c0_i32_1 = arith.constant 0 : i32
    return %c0_i32, %c0_i32_0 : i32, i32
  }
  func.func @transform_9(%arg0: i32) -> (i32, i32, i32) {
    %c0_i32 = arith.constant 0 : i32
    %c0_i32_0 = arith.constant 0 : i32
    %c0_i32_1 = arith.constant 0 : i32
    return %arg0, %c0_i32, %c0_i32_0 : i32, i32, i32
  }
}

</mosaic_0001>

<bundles_post_ra>
// kernel: conv_forward.1
= control target key start
LH: loop header
LB: loop body
LE: loop exit
PB: predicated region body
PF: predicated region fallthrough
CT: control target
= control target key end

     0   :  { %14 = vsyncpa [#allocation6], 0  ;;  %s6320_s0 = inlined_call_operand.vmem [shape: f32[2,16,16,128], index: 0, kind: input, shape index: {}]   ;;  %s6321_s1 = inlined_call_operand.vmem [shape: f32[1,1,1,128], index: 1, kind: input, shape index: {}]   ;;  %s6322_s2 = inlined_call_operand.vmem [shape: f32[1,1,1,128], index: 2, kind: input, shape index: {}]   ;;  %s6323_s3 = inlined_call_operand.vmem [shape: bf16[1152,128], index: 3, kind: input, shape index: {}]   ;;  %s6324_s4 = inlined_call_operand.vmem [shape: f32[1,128], index: 4, kind: input, shape index: {}]   ;;  %s6325_s5 = inlined_call_operand.vmem [shape: bf16[1152,128], index: 5, kind: input, shape index: {}]   ;;  %s6326_s6 = inlined_call_operand.vmem [shape: f32[1,128], index: 6, kind: input, shape index: {}]   ;;  %s6327_s7 = inlined_call_operand.vmem [shape: f32[128,10], index: 7, kind: input, shape index: {}]   ;;  %s6328_s8 = inlined_call_operand.vmem [shape: f32[1,10], index: 8, kind: input, shape index: {}]   ;;  %s6329_s9 = inlined_call_operand.hbm [shape: f32[2,1,10], index: 9, kind: output, shape index: {}]  }
   0x1   :  { %16 = vsyncpa [#allocation6 + $0x1], 0  ;;  %s4961_s30 = smov 0   ;;  %s4963_s10 = smov 0  }
   0x2   :  { %s4965_s11 = smov 0   ;;  %s4967_s12 = smov 0  }
   0x3 LB: > { %s4982_s13 = sadd.s32 4294967295, %s4905_s12   ;;  %s3705_s14 = sadd.s32 4294967294, %s4905_s12   ;;  %s4905_s12 = sphi %s4967_s12, %s6335_s12   ;;  %s4901_s11 = sphi %s4965_s11, %s6334_s11   ;;  %s4897_s10 = sphi %s4963_s10, %s6333_s10   ;;  %s4893_s30 = sphi %s4961_s30, %s6332_s30  }
   0x4   : > { %s4986_s15 = sadd.s32 1, %s4905_s12   ;;  %s223_s16 = sadd.s32 1, %s4901_s11 }
   0x5   : > { %s220_s17 = ssub.s32 %s4905_s12, %s4986_s15  ;;  %p233_p0 = scmp.ne.s32.totalorder %s4901_s11, %s4897_s10 }
   0x6   : > { %p221_p1 = scmp.eq.s32.totalorder %s220_s17, 0  ;;  %p234_p2 = scmp.eq.s32.totalorder %s4982_s13, 1 }
   0x7   : > { %p239_p3 = scmp.ne.s32.totalorder %s4897_s10, %s4893_s30  ;;  %p240_p4 = scmp.eq.s32.totalorder %s3705_s14, 1 }
   0x8   : > { %s4997_s18 = scalar_select %p221_p1, %s4901_s11, %s223_s16  }
   0x9   : > { %p4999_p5 = por %p234_p2, %p233_p0  ;;  %p5003_p6 = por %p240_p4, %p239_p3 }
   0xa   : > { %p3708_p7 = scmp.ge.s32.totalorder %s4905_s12, 1  ;;  %p290_p8 = scmp.lt.s32.totalorder %s4905_s12, 3 }
   0xc   : > { %p291_p9 = pnand %p3708_p7, %p290_p8 }
   0xd   : > { %v5012_v0 = vld [vmem:[%s6323_s3 + $0x40] sm:$0xff] (!%p291_p9)   ;;  %v4907_v2 = vmov (!%p291_p9), 0.0   ;;  %v4908_v5 = vmov (!%p291_p9), 0.0|0.0   ;;  %v4701_v6 = vld [vmem:[%s6323_s3 + $0x48] sm:$0xff] (!%p291_p9)   ;;  %v4705_v10 = vld [vmem:[%s6323_s3 + $0x50] sm:$0xff] (!%p291_p9)   ;;  %p325_p10 = scmp.lt.s32.totalorder (!%p291_p9), %s4982_s13, 1 }
   0xe   : > { %294 = sbr.rel (%p291_p9) target bundleno = 1125 (0x465), region = 56  ;;  %v5017_v1 = vld [vmem:[%s6323_s3] sm:$0xff] (!%p291_p9)   ;;  %442 = vst [vmem:[#allocation2 + $0x8] sm:$0xff] (!%p291_p9), %v4907_v2  ;;  %443 = vst [vmem:[#allocation2 + $0x10] sm:$0xff] (!%p291_p9), %v4907_v2  ;;  %3863 = vmatprep.subr.bf16.mxu0 (!%p291_p9), %v5012_v0  ;;  %1594 = vmatprep.mubr.bf16.mxu0 (!%p291_p9), %v4908_v5  ;;  %v4702_v7 = vld [vmem:[%s6323_s3 + $0x8] sm:$0xff] (!%p291_p9)   ;;  %vm4909_vm0 = vmmov (!%p291_p9), 0  }
   0xf   : > { %441 = vst [vmem:[#allocation2] sm:$0xff] (!%p291_p9), %v4907_v2  ;;  %444 = vst [vmem:[#allocation2 + $0x18] sm:$0xff] (!%p291_p9), %v4907_v2  ;;  %v4699_v3 = vld [vmem:[%s6323_s3 + $0xc0] sm:$0xff] (!%p291_p9)   ;;  %3864 = vmatpush3.bf16.msra.mxu0 (!%p291_p9), %v5017_v1  ;;  %v4703_v8 = vld [vmem:[%s6323_s3 + $0xc8] sm:$0xff] (!%p291_p9)   ;;  %s323_s24 = sand.u32 (!%p291_p9), 1, %s4897_s10   ;;  %s3859_s27 = sshll.u32 (!%p291_p9), %s4982_s13, 4 }
  0x10   : > { %445 = vst [vmem:[#allocation2 + $0x20] sm:$0xff] (!%p291_p9), %v4907_v2  ;;  %448 = vst [vmem:[#allocation2 + $0x38] sm:$0xff] (!%p291_p9), %v4907_v2  ;;  %v4700_v4 = vld [vmem:[%s6323_s3 + $0x80] sm:$0xff] (!%p291_p9)   ;;  %3975 = vmatprep.subr.bf16.mxu1 (!%p291_p9), %v4699_v3  ;;  %3865 = vmatprep.subr.bf16.mxu0 (!%p291_p9), %v4701_v6  ;;  %v4704_v9 = vld [vmem:[%s6323_s3 + $0x88] sm:$0xff] (!%p291_p9)   ;;  %vm3635_vm1 = vcmask (!%p291_p9), 73728   ;;  %s6278_s17 = scalar_lea.hbm (!%p291_p9), %s6329_s9, %s3859_s27 }
  0x11   : > { %449 = vst [vmem:[#allocation2 + $0x40] sm:$0xff] (!%p291_p9), %v4907_v2  ;;  %452 = vst [vmem:[#allocation2 + $0x58] sm:$0xff] (!%p291_p9), %v4907_v2  ;;  %3976 = vmatpush3.bf16.msra.mxu1 (!%p291_p9), %v4700_v4  ;;  %v4706_v11 = vld [vmem:[%s6323_s3 + $0x10] sm:$0xff] (!%p291_p9)   ;;  %v4709_v14 = vld [vmem:[%s6323_s3 + $0x58] sm:$0xff] (!%p291_p9)  }
  0x12   : > { %453 = vst [vmem:[#allocation2 + $0x60] sm:$0xff] (!%p291_p9), %v4907_v2  ;;  %456 = vst [vmem:[#allocation2 + $0x78] sm:$0xff] (!%p291_p9), %v4907_v2  ;;  %3977 = vmatprep.subr.bf16.mxu1 (!%p291_p9), %v4703_v8  ;;  %v4707_v12 = vld [vmem:[%s6323_s3 + $0xd0] sm:$0xff] (!%p291_p9)   ;;  %v4710_v15 = vld [vmem:[%s6323_s3 + $0x18] sm:$0xff] (!%p291_p9)  }
  0x13   : > { %457 = vst [vmem:[#allocation2 + $0x80] sm:$0xff] (!%p291_p9), %v4907_v2  ;;  %460 = vst [vmem:[#allocation2 + $0x98] sm:$0xff] (!%p291_p9), %v4907_v2  ;;  %3866 = vmatpush3.bf16.msra.mxu0 (!%p291_p9), %v4702_v7  ;;  %v4708_v13 = vld [vmem:[%s6323_s3 + $0x90] sm:$0xff] (!%p291_p9)   ;;  %v4711_v16 = vld [vmem:[%s6323_s3 + $0xd8] sm:$0xff] (!%p291_p9)  }
  0x14   : > { %461 = vst [vmem:[#allocation2 + $0xa0] sm:$0xff] (!%p291_p9), %v4907_v2  ;;  %464 = vst [vmem:[#allocation2 + $0xb8] sm:$0xff] (!%p291_p9), %v4907_v2  ;;  %3867 = vmatprep.subr.bf16.mxu0 (!%p291_p9), %v4705_v10  ;;  %v4712_v17 = vld [vmem:[%s6323_s3 + $0x98] sm:$0xff] (!%p291_p9)   ;;  %v4713_v18 = vld [vmem:[%s6323_s3 + $0x60] sm:$0xff] (!%p291_p9)  }
  0x15   : > { %465 = vst [vmem:[#allocation2 + $0xc0] sm:$0xff] %v4907_v2  ;;  %468 = vst [vmem:[#allocation2 + $0xd8] sm:$0xff] %v4907_v2  ;;  %3978 = vmatpush3.bf16.msra.mxu1 %v4704_v9  ;;  %v4714_v19 = vld [vmem:[%s6323_s3 + $0x20] sm:$0xff]   ;;  %v4717_v22 = vld [vmem:[%s6323_s3 + $0x68] sm:$0xff]   ;;  %s326_s21 = scalar_select %p325_p10, %s4982_s13, 1 }
  0x16   : > { %469 = vst [vmem:[#allocation2 + $0xe0] sm:$0xff] %v4907_v2  ;;  %472 = vst [vmem:[#allocation2 + $0xf8] sm:$0xff] %v4907_v2  ;;  %3979 = vmatprep.subr.bf16.mxu1 %v4707_v12  ;;  %v4715_v20 = vld [vmem:[%s6323_s3 + $0xe0] sm:$0xff]   ;;  %v4718_v23 = vld [vmem:[%s6323_s3 + $0x28] sm:$0xff]   ;;  %s4910_s13 = smov [#allocation5]  }
  0x17   : > { %473 = vst [vmem:[#allocation2 + $0x100] sm:$0xff] %v4907_v2  ;;  %476 = vst [vmem:[#allocation2 + $0x118] sm:$0xff] %v4907_v2  ;;  %3868 = vmatpush3.bf16.msra.mxu0 %v4706_v11  ;;  %v4716_v21 = vld [vmem:[%s6323_s3 + $0xa0] sm:$0xff]   ;;  %v4719_v24 = vld [vmem:[%s6323_s3 + $0xe8] sm:$0xff]   ;;  %s3862_s14 = sshll.u32 %s326_s21, 8  ;;  %s4847_s23 = sshll.u32 %s4910_s13, 4  ;;  %s4848_s23 = int_to_ptr.vmem [resolvable:$false] %s4847_s23 }
  0x18   : > { %477 = vst [vmem:[#allocation2 + $0x120] sm:$0xff] %v4907_v2  ;;  %480 = vst [vmem:[#allocation2 + $0x138] sm:$0xff] %v4907_v2  ;;  %3869 = vmatprep.subr.bf16.mxu0 %v4709_v14  ;;  %v4720_v25 = vld [vmem:[%s6323_s3 + $0xa8] sm:$0xff]   ;;  %v4721_v26 = vld [vmem:[%s6323_s3 + $0x70] sm:$0xff]   ;;  %s5114_s28 = scalar_lea.vmem %s6320_s0, %s3862_s14  ;;  %s3638_s14 = scalar_lea.sflag [#allocation6], %s323_s24 }
  0x19   : > { %481 = vst [vmem:[#allocation2 + $0x140] sm:$0xff] %v4907_v2  ;;  %484 = vst [vmem:[#allocation2 + $0x158] sm:$0xff] %v4907_v2  ;;  %3980 = vmatpush3.bf16.msra.mxu1 %v4708_v13  ;;  %v4722_v27 = vld [vmem:[%s6323_s3 + $0x30] sm:$0xff]   ;;  %v4725_v30 = vld [vmem:[%s6323_s3 + $0x78] sm:$0xff]   ;;  %s4849_s25 = scalar_lea.vmem %s4848_s23, 32 }
  0x1a   : > { %485 = vst [vmem:[#allocation2 + $0x160] sm:$0xff] %v4907_v2  ;;  %488 = vst [vmem:[#allocation2 + $0x178] sm:$0xff] %v4907_v2  ;;  %3981 = vmatprep.subr.bf16.mxu1 %v4711_v16  ;;  %v4723_v28 = vld [vmem:[%s6323_s3 + $0xf0] sm:$0xff]   ;;  %v4726_v31 = vld [vmem:[%s6323_s3 + $0x38] sm:$0xff]  }
  0x1b   : > { %489 = vst [vmem:[#allocation2 + $0x180] sm:$0xff] %v4907_v2  ;;  %492 = vst [vmem:[#allocation2 + $0x198] sm:$0xff] %v4907_v2  ;;  %3870 = vmatpush3.bf16.msra.mxu0 %v4710_v15  ;;  %v4724_v29 = vld [vmem:[%s6323_s3 + $0xb0] sm:$0xff]   ;;  %v4727_v32 = vld [vmem:[%s6323_s3 + $0xf8] sm:$0xff]  }
  0x1c   : > { %493 = vst [vmem:[#allocation2 + $0x1a0] sm:$0xff] %v4907_v2  ;;  %496 = vst [vmem:[#allocation2 + $0x1b8] sm:$0xff] %v4907_v2  ;;  %3871 = vmatprep.subr.bf16.mxu0 %v4713_v18  ;;  %v4728_v33 = vld [vmem:[%s6323_s3 + $0xb8] sm:$0xff]   ;;  %v546_v34 = vld [vmem:[#allocation2 + $0x7] sm:$0xff] }
  0x1d   : > { %497 = vst [vmem:[#allocation2 + $0x1c0] sm:$0xff] %v4907_v2  ;;  %500 = vst [vmem:[#allocation2 + $0x1d8] sm:$0xff] %v4907_v2  ;;  %3982 = vmatpush3.bf16.msra.mxu1 %v4712_v17  ;;  %v547_v35 = vld [vmem:[#allocation2 + $0xf] sm:$0xff]  ;;  %v4729_v37 = vld [vmem:[%s6323_s3 + $0x140] sm:$0xff]  }
  0x1e   : > { %501 = vst [vmem:[#allocation2 + $0x1e0] sm:$0xff] %v4907_v2  ;;  %504 = vst [vmem:[#allocation2 + $0x1f8] sm:$0xff] %v4907_v2  ;;  %3983 = vmatprep.subr.bf16.mxu1 %v4715_v20  ;;  %v835_v36 = vpack.c.bf16 %v547_v35, %v546_v34  ;;  %v331_v38 = vld [vmem:[%s5114_s28] sm:$0xff]  ;;  %v332_v39 = vld [vmem:[%s5114_s28 + $0x8] sm:$0xff] }
  0x1f   : > { %505 = vst [vmem:[#allocation2 + $0x200] sm:$0xff] %v4907_v2  ;;  %508 = vst [vmem:[#allocation2 + $0x218] sm:$0xff] %v4907_v2  ;;  %3872 = vmatpush3.bf16.msra.mxu0 %v4714_v19  ;;  %v5127_v40 = vld [vmem:[%s6321_s1] ss:$0 sm:$0xff]  ;;  %v333_v45 = vld [vmem:[%s5114_s28 + $0x10] sm:$0xff] }
  0x20   : > { %509 = vst [vmem:[#allocation2 + $0x220] sm:$0xff] %v4907_v2  ;;  %510 = vst [vmem:[#allocation2 + $0x228] sm:$0xff] %v4907_v2  ;;  %3873 = vmatprep.subr.bf16.mxu0 %v4717_v22  ;;  %v5132_v41 = vld [vmem:[%s6322_s2] ss:$0 sm:$0xff]  ;;  %v370_v42 = vsub.f32 %v331_v38, %v5127_v40  ;;  %v371_v43 = vsub.f32 %v332_v39, %v5127_v40  ;;  %v334_v48 = vld [vmem:[%s5114_s28 + $0x18] sm:$0xff]  ;;  %v372_v49 = vsub.f32 %v333_v45, %v5127_v40 }
  0x21   : > { %511 = vst [vmem:[#allocation2 + $0x230] sm:$0xff] %v4907_v2  ;;  %512 = vst [vmem:[#allocation2 + $0x238] sm:$0xff] %v4907_v2  ;;  %3984 = vmatpush3.bf16.msra.mxu1 %v4716_v21  ;;  %v4730_v44 = vld [vmem:[%s6323_s3 + $0x100] sm:$0xff]   ;;  %v373_v50 = vsub.f32 %v334_v48, %v5127_v40  ;;  %v4731_v51 = vld [vmem:[%s6323_s3 + $0x148] sm:$0xff]  }
  0x22   : > { %2470 = vst [vmem:[#allocation3] sm:$0xff] %v4907_v2  ;;  %2471 = vst [vmem:[#allocation3 + $0x8] sm:$0xff] %v4907_v2  ;;  %3985 = vmatprep.subr.bf16.mxu1 %v4719_v24  ;;  %v409_v46 = vmul.f32 %v5132_v41, %v370_v42  ;;  %v410_v47 = vmul.f32 %v5132_v41, %v371_v43  ;;  %v335_v52 = vld [vmem:[%s5114_s28 + $0x20] sm:$0xff]  ;;  %v336_v53 = vld [vmem:[%s5114_s28 + $0x28] sm:$0xff]  ;;  %v411_v55 = vmul.f32 %v5132_v41, %v372_v49 }
  0x23   : > { %2472 = vst [vmem:[#allocation3 + $0x10] sm:$0xff] %v4907_v2  ;;  %2473 = vst [vmem:[#allocation3 + $0x18] sm:$0xff] %v4907_v2  ;;  %3874 = vmatpush3.bf16.msra.mxu0 %v4718_v23  ;;  %v374_v56 = vsub.f32 %v335_v52, %v5127_v40  ;;  %v375_v57 = vsub.f32 %v336_v53, %v5127_v40  ;;  %v4732_v58 = vld [vmem:[%s6323_s3 + $0x108] sm:$0xff]   ;;  %v611_v60 = vld [vmem:[#allocation2 + $0x11] sm:$0xff]  ;;  %v412_v61 = vmul.f32 %v5132_v41, %v373_v50 }
  0x24   : > { %2475 = vst [vmem:[#allocation3 + $0x28] sm:$0xff] %v4907_v2  ;;  %2476 = vst [vmem:[#allocation3 + $0x30] sm:$0xff] %v4907_v2  ;;  %3875 = vmatprep.subr.bf16.mxu0 %v4721_v26  ;;  %v5150_v54 = vpack.c.bf16 %v410_v47, %v409_v46  ;;  %v610_v59 = vld [vmem:[#allocation2 + $0x9] sm:$0xff]  ;;  %v338_v63 = vld [vmem:[%s5114_s28 + $0x38] sm:$0xff] }
  0x25   : > { %2478 = vst [vmem:[#allocation3 + $0x40] sm:$0xff] %v4907_v2  ;;  %2479 = vst [vmem:[#allocation3 + $0x48] sm:$0xff] %v4907_v2  ;;  %3986 = vmatpush3.bf16.msra.mxu1 %v4720_v25  ;;  %v337_v62 = vld [vmem:[%s5114_s28 + $0x30] sm:$0xff]  ;;  %v5163_v0 = vmul.f32 %v5132_v41, %v374_v56  ;;  %v5166_v1 = vmul.f32 %v5132_v41, %v375_v57  ;;  %v339_v4 = vld [vmem:[%s5114_s28 + $0x40] sm:$0xff]  ;;  %v377_v6 = vsub.f32 %v338_v63, %v5127_v40 }
  0x26   : > { %2481 = vst [vmem:[#allocation3 + $0x58] sm:$0xff] %v4907_v2  ;;  %2482 = vst [vmem:[#allocation3 + $0x60] sm:$0xff] %v4907_v2  ;;  %3987 = vmatprep.subr.bf16.mxu1 %v4723_v28  ;;  %v4733_v3 = vld [vmem:[%s6323_s3 + $0x150] sm:$0xff]   ;;  %v340_v7 = vld [vmem:[%s5114_s28 + $0x48] sm:$0xff]  ;;  %v378_v8 = vsub.f32 %v339_v4, %v5127_v40  ;;  %v837_v19 = vpack.c.bf16 %v611_v60, %v610_v59  ;;  %v5204_v25 = vpack.c.bf16 %v412_v61, %v411_v55 }
  0x27   : > { %2484 = vst [vmem:[#allocation3 + $0x70] sm:$0xff] %v4907_v2  ;;  %2485 = vst [vmem:[#allocation3 + $0x78] sm:$0xff] %v4907_v2  ;;  %3876 = vmatpush3.bf16.msra.mxu0 %v4722_v27  ;;  %v379_v10 = vsub.f32 %v340_v7, %v5127_v40  ;;  %v4734_v11 = vld [vmem:[%s6323_s3 + $0x110] sm:$0xff]   ;;  %v342_v13 = vld [vmem:[%s5114_s28 + $0x58] sm:$0xff]  ;;  %v5188_v14 = vmul.f32 %v5132_v41, %v377_v6  ;;  %v5255_v53 = vpack.c.bf16 %v5166_v1, %v5163_v0 }
  0x28   : > { %2487 = vst [vmem:[#allocation3 + $0x88] sm:$0xff] %v4907_v2  ;;  %2488 = vst [vmem:[#allocation3 + $0x90] sm:$0xff] %v4907_v2  ;;  %3877 = vmatprep.subr.bf16.mxu0 %v4725_v30  ;;  %v341_v12 = vld [vmem:[%s5114_s28 + $0x50] sm:$0xff]  ;;  %v5191_v15 = vmul.f32 %v5132_v41, %v378_v8  ;;  %v381_v17 = vsub.f32 %v342_v13, %v5127_v40  ;;  %v4735_v18 = vld [vmem:[%s6323_s3 + $0x158] sm:$0xff]  }
  0x29   : > { %2490 = vst [vmem:[#allocation3 + $0xa0] sm:$0xff] %v4907_v2  ;;  %2491 = vst [vmem:[#allocation3 + $0xa8] sm:$0xff] %v4907_v2  ;;  %3988 = vmatpush3.bf16.msra.mxu1 %v4724_v29  ;;  %v380_v16 = vsub.f32 %v341_v12, %v5127_v40  ;;  %v5200_v20 = vmul.f32 %v5132_v41, %v379_v10  ;;  %v343_v21 = vld [vmem:[%s5114_s28 + $0x60] sm:$0xff]  ;;  %v344_v22 = vld [vmem:[%s5114_s28 + $0x68] sm:$0xff] }
  0x2a   : > { %2493 = vst [vmem:[#allocation3 + $0xb8] sm:$0xff] %v4907_v2  ;;  %2494 = vst [vmem:[#allocation3 + $0xc0] sm:$0xff] %v4907_v2  ;;  %3989 = vmatprep.subr.bf16.mxu1 %v4727_v32  ;;  %v5212_v27 = vmul.f32 %v5132_v41, %v381_v17  ;;  %v382_v28 = vsub.f32 %v343_v21, %v5127_v40  ;;  %v383_v30 = vsub.f32 %v344_v22, %v5127_v40  ;;  %v345_v34 = vld [vmem:[%s5114_s28 + $0x70] sm:$0xff]  ;;  %v346_v35 = vld [vmem:[%s5114_s28 + $0x78] sm:$0xff] }
  0x2b   : > { %2496 = vst [vmem:[#allocation3 + $0xd0] sm:$0xff] %v4907_v2  ;;  %2497 = vst [vmem:[#allocation3 + $0xd8] sm:$0xff] %v4907_v2  ;;  %3878 = vmatpush3.bf16.msra.mxu0 %v4726_v31  ;;  %v5209_v26 = vmul.f32 %v5132_v41, %v380_v16  ;;  %v4736_v31 = vld [vmem:[%s6323_s3 + $0x118] sm:$0xff]   ;;  %v384_v38 = vsub.f32 %v345_v34, %v5127_v40  ;;  %v385_v39 = vsub.f32 %v346_v35, %v5127_v40  ;;  %v4737_v49 = vld [vmem:[%s6323_s3 + $0x160] sm:$0xff]  }
  0x2c   : > { %2498 = vst [vmem:[#allocation3 + $0xe0] sm:$0xff] %v4907_v2  ;;  %2499 = vst [vmem:[#allocation3 + $0xe8] sm:$0xff] %v4907_v2  ;;  %4087 = vmatprep.subr.bf16.mxu0 %v4729_v37  ;;  %v376_v2 = vsub.f32 %v337_v62, %v5127_v40  ;;  %v5228_v37 = vmul.f32 %v5132_v41, %v383_v30  ;;  %v347_v50 = vld [vmem:[%s5114_s28 + $0x80] sm:$0xff]  ;;  %v348_v57 = vld [vmem:[%s5114_s28 + $0x88] sm:$0xff] }
  0x2d   : > { %3990 = vmatpush3.bf16.msra.mxu1 %v4728_v33  ;;  %514 = vst [vmem:[#allocation2 + $0x28] sm:$0xff] %v409_v46  ;;  %515 = vst [vmem:[#allocation2 + $0x30] sm:$0xff] %v410_v47  ;;  %v5223_v33 = vmul.f32 %v5132_v41, %v382_v28  ;;  %v5238_v46 = vmul.f32 %v5132_v41, %v384_v38  ;;  %v5241_v47 = vmul.f32 %v5132_v41, %v385_v39  ;;  %v4738_v62 = vld [vmem:[%s6323_s3 + $0x120] sm:$0xff]   ;;  %v349_v6 = vld [vmem:[%s5114_s28 + $0x90] sm:$0xff] }
  0x2e   : > { %1595 = vmatmul.mubr.bf16.vlgmr.msra.gmra.mrb[0].mxu0 %v835_v36  ;;  %516 = vst [vmem:[#allocation2 + $0x48] sm:$0xff] %v411_v55  ;;  %517 = vst [vmem:[#allocation2 + $0x50] sm:$0xff] %v412_v61  ;;  %v5179_v9 = vmul.f32 %v5132_v41, %v376_v2  ;;  %v4740_v4 = vld [vmem:[%s6323_s3 + $0x180] sm:$0xff]   ;;  %v350_v8 = vld [vmem:[%s5114_s28 + $0x98] sm:$0xff]  ;;  %v388_v10 = vsub.f32 %v349_v6, %v5127_v40 }
  0x2f   : > { %4088 = vmatpush3.bf16.msra.mxu0 %v4730_v44  ;;  %1602 = vmatprep.mubr.bf16.mxu0 %v5150_v54  ;;  %518 = vst [vmem:[#allocation2 + $0x68] sm:$0xff] %v5163_v0  ;;  %519 = vst [vmem:[#allocation2 + $0x70] sm:$0xff] %v5166_v1  ;;  %v4739_v1 = vld [vmem:[%s6323_s3 + $0x1c0] sm:$0xff]   ;;  %v4741_v12 = vld [vmem:[%s6323_s3 + $0x168] sm:$0xff]  }
  0x30   : > { %4089 = vmatprep.subr.bf16.mxu0 %v4731_v51  ;;  %520 = vst [vmem:[#allocation2 + $0x88] sm:$0xff] %v5179_v9  ;;  %521 = vst [vmem:[#allocation2 + $0x90] sm:$0xff] %v5188_v14  ;;  %v386_v51 = vsub.f32 %v347_v50, %v5127_v40  ;;  %4199 = vmatprep.subr.bf16.mxu1 %v4739_v1  ;;  %v5300_v16 = vmul.f32 %v5132_v41, %v388_v10  ;;  %v352_v17 = vld [vmem:[%s5114_s28 + $0xa8] sm:$0xff]  ;;  %v354_v34 = vld [vmem:[%s5114_s28 + $0xb8] sm:$0xff] }
  0x31   : > { %522 = vst [vmem:[#allocation2 + $0xa8] sm:$0xff] %v5191_v15  ;;  %523 = vst [vmem:[#allocation2 + $0xb0] sm:$0xff] %v5200_v20  ;;  %v391_v21 = vsub.f32 %v352_v17, %v5127_v40  ;;  %v4742_v22 = vld [vmem:[%s6323_s3 + $0x128] sm:$0xff]   ;;  %v393_v39 = vsub.f32 %v354_v34, %v5127_v40  ;;  %v358_v6 = vld [vmem:[%s5114_s28 + $0xd8] sm:$0xff] }
  0x32   : > { %524 = vst [vmem:[#allocation2 + $0xc8] sm:$0xff] %v5209_v26  ;;  %525 = vst [vmem:[#allocation2 + $0xd0] sm:$0xff] %v5212_v27  ;;  %v5260_v56 = vmul.f32 %v5132_v41, %v386_v51  ;;  %v4746_v51 = vld [vmem:[%s6323_s3 + $0x130] sm:$0xff]   ;;  %v397_v10 = vsub.f32 %v358_v6, %v5127_v40 }
  0x33   : > { %4090 = vmatpush3.bf16.msra.mxu0 %v4732_v58  ;;  %526 = vst [vmem:[#allocation2 + $0xe8] sm:$0xff] %v5223_v33  ;;  %527 = vst [vmem:[#allocation2 + $0xf0] sm:$0xff] %v5228_v37  ;;  %v387_v58 = vsub.f32 %v348_v57, %v5127_v40  ;;  %v5323_v30 = vmul.f32 %v5132_v41, %v391_v21  ;;  %v4747_v57 = vld [vmem:[%s6323_s3 + $0x1d0] sm:$0xff]   ;;  %v359_v21 = vld [vmem:[%s5114_s28 + $0xe0] sm:$0xff] }
  0x34   : > { %4091 = vmatprep.subr.bf16.mxu0 %v4733_v3  ;;  %v642_v23 = vld [vmem:[#allocation2 + $0x27] sm:$0xff]  ;;  %v643_v24 = vld [vmem:[#allocation2 + $0x2f] sm:$0xff]  ;;  %528 = vst [vmem:[#allocation2 + $0x108] sm:$0xff] %v5238_v46  ;;  %529 = vst [vmem:[#allocation2 + $0x110] sm:$0xff] %v5241_v47  ;;  %v5283_v3 = vpack.c.bf16 %v5188_v14, %v5179_v9  ;;  %v436_v17 = vmul.f32 %v5132_v41, %v397_v10 }
  0x35   : > { %v838_v29 = vpack.c.bf16 %v643_v24, %v642_v23  ;;  %v644_v32 = vld [vmem:[#allocation2 + $0x47] sm:$0xff]  ;;  %v645_v36 = vld [vmem:[#allocation2 + $0x4f] sm:$0xff]  ;;  %530 = vst [vmem:[#allocation2 + $0x128] sm:$0xff] %v5260_v56  ;;  %v5270_v61 = vmul.f32 %v5132_v41, %v387_v58  ;;  %532 = vst [vmem:[#allocation2 + $0x148] sm:$0xff] %v5300_v16 }
  0x36   : > { %v5232_v42 = vpack.c.bf16 %v645_v36, %v644_v32  ;;  %v612_v43 = vld [vmem:[#allocation2 + $0x29] sm:$0xff]  ;;  %v613_v44 = vld [vmem:[#allocation2 + $0x31] sm:$0xff]  ;;  %v351_v9 = vld [vmem:[%s5114_s28 + $0xa0] sm:$0xff]  ;;  %v5335_v36 = vpack.c.bf16 %v5200_v20, %v5191_v15  ;;  %535 = vst [vmem:[#allocation2 + $0x170] sm:$0xff] %v5323_v30  ;;  %v5351_v15 = vmul.f32 %v5132_v41, %v393_v39 }
  0x37   : > { %4092 = vmatpush3.bf16.msra.mxu0 %v4734_v11  ;;  %1755 = vmatprep.mubr.bf16.mxu1 %v838_v29  ;;  %v646_v45 = vld [vmem:[#allocation2 + $0x67] sm:$0xff]  ;;  %v647_v48 = vld [vmem:[#allocation2 + $0x6f] sm:$0xff]  ;;  %v5251_v52 = vpack.c.bf16 %v613_v44, %v612_v43  ;;  %531 = vst [vmem:[#allocation2 + $0x130] sm:$0xff] %v5270_v61  ;;  %v389_v11 = vsub.f32 %v350_v8, %v5127_v40  ;;  %541 = vst [vmem:[#allocation2 + $0x1d0] sm:$0xff] %v436_v17 }
  0x38   : > { %4093 = vmatprep.subr.bf16.mxu0 %v4735_v18  ;;  %1603 = vmatmul.mubr.bf16.gmra.mrb[4].mxu0 %v838_v29  ;;  %v5257_v55 = vpack.c.bf16 %v647_v48, %v646_v45  ;;  %v614_v59 = vld [vmem:[#allocation2 + $0x49] sm:$0xff]  ;;  %v615_v60 = vld [vmem:[#allocation2 + $0x51] sm:$0xff]  ;;  %v390_v18 = vsub.f32 %v351_v9, %v5127_v40  ;;  %v355_v45 = vld [vmem:[%s5114_s28 + $0xc0] sm:$0xff]  ;;  %537 = vst [vmem:[#allocation2 + $0x190] sm:$0xff] %v5351_v15 }
  0x39   : > { %1756 = vmatmul.mubr.bf16.vlgmr.msra.gmra.mrb[0].mxu1 %v837_v19  ;;  %1610 = vmatprep.mubr.bf16.mxu0 %v5204_v25  ;;  %v648_v63 = vld [vmem:[#allocation2 + $0x87] sm:$0xff]  ;;  %v649_v0 = vld [vmem:[#allocation2 + $0x8f] sm:$0xff]  ;;  %v5279_v2 = vpack.c.bf16 %v615_v60, %v614_v59  ;;  %v5307_v19 = vmul.f32 %v5132_v41, %v389_v11  ;;  %v394_v20 = vsub.f32 %v355_v45, %v5127_v40  ;;  %v4749_v9 = vld [vmem:[%s6323_s3 + $0x1d8] sm:$0xff]  }
  0x3a   : > { %1763 = vmatprep.mubr.bf16.mxu1 %v5232_v42  ;;  %v5289_v7 = vpack.c.bf16 %v649_v0, %v648_v63  ;;  %4200 = vmatpush3.bf16.msra.mxu1 %v4740_v4  ;;  %v616_v13 = vld [vmem:[#allocation2 + $0x69] sm:$0xff]  ;;  %v617_v14 = vld [vmem:[#allocation2 + $0x71] sm:$0xff]  ;;  %v5316_v23 = vmul.f32 %v5132_v41, %v390_v18 }
  0x3b   : > { %4094 = vmatpush3.bf16.msra.mxu0 %v4736_v31  ;;  %v4743_v24 = vld [vmem:[%s6323_s3 + $0x1c8] sm:$0xff]   ;;  %533 = vst [vmem:[#allocation2 + $0x150] sm:$0xff] %v5307_v19  ;;  %v353_v32 = vld [vmem:[%s5114_s28 + $0xb0] sm:$0xff]  ;;  %v5331_v35 = vpack.c.bf16 %v617_v14, %v616_v13  ;;  %v5367_v58 = vmul.f32 %v5132_v41, %v394_v20  ;;  %v4750_v18 = vld [vmem:[%s6323_s3 + $0x198] sm:$0xff]  }
  0x3c   : > { %4095 = vmatprep.subr.bf16.mxu0 %v4737_v49  ;;  %v650_v28 = vld [vmem:[#allocation2 + $0xa7] sm:$0xff]  ;;  %v651_v29 = vld [vmem:[#allocation2 + $0xaf] sm:$0xff]  ;;  %534 = vst [vmem:[#allocation2 + $0x168] sm:$0xff] %v5316_v23  ;;  %4201 = vmatprep.subr.bf16.mxu1 %v4743_v24  ;;  %v392_v38 = vsub.f32 %v353_v32, %v5127_v40 }
  0x3d   : > { %v4744_v31 = vld [vmem:[%s6323_s3 + $0x188] sm:$0xff]   ;;  %v4745_v43 = vld [vmem:[%s6323_s3 + $0x170] sm:$0xff]   ;;  %v5343_v44 = vpack.c.bf16 %v651_v29, %v650_v28  ;;  %538 = vst [vmem:[#allocation2 + $0x1a8] sm:$0xff] %v5367_v58  ;;  %v4753_v20 = vld [vmem:[%s6323_s3 + $0x1e0] sm:$0xff]  }
  0x3e   : > { %4202 = vmatpush3.bf16.msra.mxu1 %v4744_v31  ;;  %v356_v48 = vld [vmem:[%s5114_s28 + $0xc8] sm:$0xff]  ;;  %v5348_v49 = vmul.f32 %v5132_v41, %v392_v38  ;;  %v4748_v60 = vld [vmem:[%s6323_s3 + $0x190] sm:$0xff]   ;;  %v398_v31 = vsub.f32 %v359_v21, %v5127_v40  ;;  %v4759_v21 = vld [vmem:[%s6323_s3 + $0x1f8] sm:$0xff]  }
  0x3f   : > { %4096 = vmatpush3.bf16.msra.mxu0 %v4738_v62  ;;  %v395_v50 = vsub.f32 %v356_v48, %v5127_v40  ;;  %v618_v62 = vld [vmem:[#allocation2 + $0x89] sm:$0xff]  ;;  %v619_v63 = vld [vmem:[#allocation2 + $0x91] sm:$0xff]  ;;  %4203 = vmatprep.subr.bf16.mxu1 %v4747_v57  ;;  %v5420_v48 = vpack.c.bf16 %v5228_v37, %v5223_v33 }
  0x40   : > { %1611 = vmatmul.mubr.bf16.gmra.mrb[8].mxu0 %v5232_v42  ;;  %4097 = vmatprep.subr.bf16.mxu0 %v4741_v12  ;;  %536 = vst [vmem:[#allocation2 + $0x188] sm:$0xff] %v5348_v49  ;;  %v652_v0 = vld [vmem:[#allocation2 + $0xc7] sm:$0xff]  ;;  %v653_v1 = vld [vmem:[#allocation2 + $0xcf] sm:$0xff]  ;;  %v5382_v11 = vpack.c.bf16 %v619_v63, %v618_v62  ;;  %v5386_v12 = vpack.c.bf16 %v5212_v27, %v5209_v26  ;;  %v4751_v26 = vld [vmem:[%s6323_s3 + $0x178] sm:$0xff]  }
  0x41   : > { %1764 = vmatmul.mubr.bf16.gmra.mrb[4].mxu1 %v5251_v52  ;;  %1618 = vmatprep.mubr.bf16.mxu0 %v5255_v53  ;;  %v5370_v59 = vmul.f32 %v5132_v41, %v395_v50  ;;  %v357_v4 = vld [vmem:[%s5114_s28 + $0xd0] sm:$0xff]  ;;  %v5391_v13 = vpack.c.bf16 %v653_v1, %v652_v0  ;;  %v654_v29 = vld [vmem:[#allocation2 + $0xe7] sm:$0xff]  ;;  %v437_v38 = vmul.f32 %v5132_v41, %v398_v31 }
  0x42   : > { %1771 = vmatprep.mubr.bf16.mxu1 %v5257_v55  ;;  %4204 = vmatpush3.bf16.msra.mxu1 %v4748_v60  ;;  %v396_v8 = vsub.f32 %v357_v4, %v5127_v40  ;;  %v620_v24 = vld [vmem:[#allocation2 + $0xa9] sm:$0xff]  ;;  %v621_v28 = vld [vmem:[#allocation2 + $0xb1] sm:$0xff]  ;;  %v5488_v31 = vpack.c.bf16 %v5270_v61, %v5260_v56  ;;  %v5500_v56 = vpack.c.bf16 %v5307_v19, %v5300_v16 }
  0x43   : > { %4098 = vmatpush3.bf16.msra.mxu0 %v4742_v22  ;;  %539 = vst [vmem:[#allocation2 + $0x1b0] sm:$0xff] %v5370_v59  ;;  %4205 = vmatprep.subr.bf16.mxu1 %v4749_v9  ;;  %v360_v22 = vld [vmem:[%s5114_s28 + $0xe8] sm:$0xff]  ;;  %v5416_v45 = vpack.c.bf16 %v621_v28, %v620_v24  ;;  %542 = vst [vmem:[#allocation2 + $0x1e8] sm:$0xff] %v437_v38  ;;  %v623_v37 = vld [vmem:[#allocation2 + $0xd1] sm:$0xff]  ;;  %v5512_v16 = vpack.c.bf16 %v5323_v30, %v5316_v23 }
  0x44   : > { %4099 = vmatprep.subr.bf16.mxu0 %v4745_v43  ;;  %v435_v14 = vmul.f32 %v5132_v41, %v396_v8  ;;  %v399_v32 = vsub.f32 %v360_v22, %v5127_v40  ;;  %v655_v34 = vld [vmem:[#allocation2 + $0xef] sm:$0xff]  ;;  %v4752_v43 = vld [vmem:[%s6323_s3 + $0x138] sm:$0xff]   ;;  %v656_v62 = vld [vmem:[#allocation2 + $0x107] sm:$0xff]  ;;  %v5524_v23 = vpack.c.bf16 %v5351_v15, %v5348_v49  ;;  %v5536_v49 = vpack.c.bf16 %v5370_v59, %v5367_v58 }
  0x45   : > { %v5425_v50 = vpack.c.bf16 %v655_v34, %v654_v29  ;;  %v622_v33 = vld [vmem:[#allocation2 + $0xc9] sm:$0xff]  ;;  %v362_v4 = vld [vmem:[%s5114_s28 + $0xf8] sm:$0xff] }
  0x46   : > { %540 = vst [vmem:[#allocation2 + $0x1c8] sm:$0xff] %v435_v14  ;;  %v5402_v27 = vpack.c.bf16 %v436_v17, %v435_v14  ;;  %4206 = vmatpush3.bf16.msra.mxu1 %v4750_v18  ;;  %v438_v39 = vmul.f32 %v5132_v41, %v399_v32  ;;  %v4755_v60 = vld [vmem:[%s6323_s3 + $0x1e8] sm:$0xff]   ;;  %v361_v1 = vld [vmem:[%s5114_s28 + $0xf0] sm:$0xff]  ;;  %v401_v8 = vsub.f32 %v362_v4, %v5127_v40  ;;  %v4760_v22 = vld [vmem:[%s6323_s3 + $0x1b8] sm:$0xff]   ;;  %s324_s28 = scalar_lea.vmem [#allocation5], %s323_s24 }
  0x47   : > { %4100 = vmatpush3.bf16.msra.mxu0 %v4746_v51  ;;  %v4754_v51 = vld [vmem:[%s6323_s3 + $0x1a0] sm:$0xff]   ;;  %4207 = vmatprep.subr.bf16.mxu1 %v4753_v20  ;;  %v657_v63 = vld [vmem:[#allocation2 + $0x10f] sm:$0xff]  ;;  %v400_v6 = vsub.f32 %v361_v1, %v5127_v40  ;;  %v5455_v17 = vpack.c.bf16 %v623_v37, %v622_v33  ;;  %v5459_v18 = vpack.c.bf16 %v5241_v47, %v5238_v46  ;;  %s3650_s21 = sshll.u32 %s324_s28, 4  ;;  %s6280_s21 = int_to_ptr.vmem [resolvable:$true] %s3650_s21 }
  0x48   : > { %1619 = vmatmul.mubr.bf16.gmra.mrb[12].mxu0 %v5257_v55  ;;  %4101 = vmatprep.subr.bf16.mxu0 %v4751_v26  ;;  %543 = vst [vmem:[#allocation2 + $0x1f0] sm:$0xff] %v438_v39  ;;  %v5430_v57 = vpack.c.bf16 %v438_v39, %v437_v38  ;;  %v4756_v0 = vld [vmem:[%s6323_s3 + $0x1a8] sm:$0xff]   ;;  %v4757_v10 = vld [vmem:[%s6323_s3 + $0x1f0] sm:$0xff]   ;;  %v5462_v40 = vmul.f32 %v5132_v41, %v401_v8  ;;  %s4843_s22 = scalar_lea.vmem %s6280_s21, 16  ;;  %p4850_p0 = scmp.lt.s32.totalorder %s6280_s21, %s4848_s23 }
  0x49   : > { %1772 = vmatmul.mubr.bf16.gmra.mrb[8].mxu1 %v5279_v2  ;;  %1626 = vmatprep.mubr.bf16.mxu0 %v5283_v3  ;;  %v5450_v9 = vmul.f32 %v5132_v41, %v400_v6  ;;  %v4758_v14 = vld [vmem:[%s6323_s3 + $0x1b0] sm:$0xff]   ;;  %v5464_v26 = vpack.c.bf16 %v657_v63, %v656_v62  ;;  %v5478_v41 = vld [vmem:[%s6323_s3 + $0x200] sm:$0xff]   ;;  %p4844_p11 = scmp.ne.s32.totalorder %s6280_s21, %s4843_s22  ;;  %p4851_p1 = scmp.lt.s32.totalorder %s4849_s25, %s4843_s22 }
  0x4a   : > { %1779 = vmatprep.mubr.bf16.mxu1 %v5289_v7  ;;  %4208 = vmatpush3.bf16.msra.mxu1 %v4754_v51  ;;  %545 = vst [vmem:[#allocation2 + $0x210] sm:$0xff] %v5462_v40  ;;  %v624_v46 = vld [vmem:[#allocation2 + $0xe9] sm:$0xff]  ;;  %v625_v47 = vld [vmem:[#allocation2 + $0xf1] sm:$0xff] }
  0x4b   : > { %4102 = vmatpush3.bf16.msra.mxu0 %v4752_v43  ;;  %4209 = vmatprep.subr.bf16.mxu1 %v4755_v60  ;;  %544 = vst [vmem:[#allocation2 + $0x208] sm:$0xff] %v5450_v9  ;;  %v658_v24 = vld [vmem:[#allocation2 + $0x127] sm:$0xff]  ;;  %v659_v28 = vld [vmem:[#allocation2 + $0x12f] sm:$0xff]  ;;  %v5484_v29 = vpack.c.bf16 %v625_v47, %v624_v46  ;;  %p4845_p12 = pnand %p4844_p11, %p4999_p5  ;;  %p4852_p2 = por %p4851_p1, %p4850_p0 }
  0x4c   : > { %4524 = vmatprep.subr.bf16.mxu0 %v5478_v41  ;;  %v5490_v32 = vpack.c.bf16 %v659_v28, %v658_v24  ;;  %v626_v34 = vld [vmem:[#allocation2 + $0x109] sm:$0xff]  ;;  %v627_v38 = vld [vmem:[#allocation2 + $0x111] sm:$0xff] }
  0x4d   : > { %v660_v39 = vld [vmem:[#allocation2 + $0x147] sm:$0xff]  ;;  %v661_v43 = vld [vmem:[#allocation2 + $0x14f] sm:$0xff]  ;;  %v5496_v20 = vpack.c.bf16 %v627_v38, %v626_v34  ;;  %p4846_p13 = pneg %p4845_p12 }
  0x4e   : > { %4210 = vmatpush3.bf16.msra.mxu1 %v4756_v0  ;;  %v5502_v61 = vpack.c.bf16 %v661_v43, %v660_v39  ;;  %v628_v51 = vld [vmem:[#allocation2 + $0x129] sm:$0xff]  ;;  %v629_v33 = vld [vmem:[#allocation2 + $0x131] sm:$0xff] }
  0x4f   : > { %4211 = vmatprep.subr.bf16.mxu1 %v4757_v10  ;;  %v662_v37 = vld [vmem:[#allocation2 + $0x167] sm:$0xff]  ;;  %v663_v60 = vld [vmem:[#allocation2 + $0x16f] sm:$0xff]  ;;  %v5508_v62 = vpack.c.bf16 %v629_v33, %v628_v51  ;;  %p4853_p3 = pnand %p4852_p2, %p4846_p13 }
  0x50   : > { %1627 = vmatmul.mubr.bf16.gmra.mrb[16].mxu0 %v5289_v7  ;;  %v5514_v19 = vpack.c.bf16 %v663_v60, %v662_v37  ;;  %v630_v63 = vld [vmem:[#allocation2 + $0x149] sm:$0xff]  ;;  %v631_v0 = vld [vmem:[#allocation2 + $0x151] sm:$0xff] }
  0x51   : > { %1780 = vmatmul.mubr.bf16.gmra.mrb[12].mxu1 %v5331_v35  ;;  %1634 = vmatprep.mubr.bf16.mxu0 %v5335_v36  ;;  %v664_v1 = vld [vmem:[#allocation2 + $0x187] sm:$0xff]  ;;  %v665_v4 = vld [vmem:[#allocation2 + $0x18f] sm:$0xff]  ;;  %v5520_v6 = vpack.c.bf16 %v631_v0, %v630_v63 }
  0x52   : > { %1787 = vmatprep.mubr.bf16.mxu1 %v5343_v44  ;;  %4212 = vmatpush3.bf16.msra.mxu1 %v4758_v14  ;;  %v5526_v30 = vpack.c.bf16 %v665_v4, %v664_v1  ;;  %v632_v8 = vld [vmem:[#allocation2 + $0x169] sm:$0xff]  ;;  %v633_v10 = vld [vmem:[#allocation2 + $0x171] sm:$0xff] }
  0x53   : > { %4213 = vmatprep.subr.bf16.mxu1 %v4759_v21  ;;  %v666_v14 = vld [vmem:[#allocation2 + $0x1a7] sm:$0xff]  ;;  %v667_v21 = vld [vmem:[#allocation2 + $0x1af] sm:$0xff] }
  0x54   : > { %v5538_v15 = vpack.c.bf16 %v667_v21, %v666_v14  ;;  %v634_v46 = vld [vmem:[#allocation2 + $0x189] sm:$0xff]  ;;  %v635_v47 = vld [vmem:[#allocation2 + $0x191] sm:$0xff] }
  0x55   : > { %v668_v24 = vld [vmem:[#allocation2 + $0x1c7] sm:$0xff]  ;;  %v669_v28 = vld [vmem:[#allocation2 + $0x1cf] sm:$0xff]  ;;  %v5544_v34 = vpack.c.bf16 %v635_v47, %v634_v46 }
  0x56   : > { %4214 = vmatpush3.bf16.msra.mxu1 %v4760_v22  ;;  %v5532_v22 = vpack.c.bf16 %v633_v10, %v632_v8  ;;  %v5546_v38 = vpack.c.bf16 %v669_v28, %v668_v24  ;;  %v636_v58 = vld [vmem:[#allocation2 + $0x1a9] sm:$0xff]  ;;  %v637_v59 = vld [vmem:[#allocation2 + $0x1b1] sm:$0xff]  ;;  %v5566_v8 = vpack.c.bf16 %v5462_v40, %v5450_v9 }
  0x57   : > { %v670_v39 = vld [vmem:[#allocation2 + $0x1e7] sm:$0xff]  ;;  %v671_v43 = vld [vmem:[#allocation2 + $0x1ef] sm:$0xff]  ;;  %v5552_v51 = vpack.c.bf16 %v637_v59, %v636_v58  ;;  %v4764_v9 = vld [vmem:[%s6323_s3 + $0x218] sm:$0xff]  }
  0x58   : > { %1635 = vmatmul.mubr.bf16.gmra.mrb[20].mxu0 %v5343_v44  ;;  %v5554_v33 = vpack.c.bf16 %v671_v43, %v670_v39  ;;  %v638_v37 = vld [vmem:[#allocation2 + $0x1c9] sm:$0xff]  ;;  %v639_v60 = vld [vmem:[#allocation2 + $0x1d1] sm:$0xff] }
  0x59   : > { %1788 = vmatmul.mubr.bf16.gmra.mrb[16].mxu1 %v5382_v11  ;;  %1642 = vmatprep.mubr.bf16.mxu0 %v5386_v12  ;;  %v672_v63 = vld [vmem:[#allocation2 + $0x207] sm:$0xff]  ;;  %v673_v0 = vld [vmem:[#allocation2 + $0x20f] sm:$0xff]  ;;  %v5560_v1 = vpack.c.bf16 %v639_v60, %v638_v37 }
  0x5a   : > { %1795 = vmatprep.mubr.bf16.mxu1 %v5391_v13  ;;  %v5562_v4 = vpack.c.bf16 %v673_v0, %v672_v63  ;;  %v640_v10 = vld [vmem:[#allocation2 + $0x1e9] sm:$0xff]  ;;  %v641_v14 = vld [vmem:[#allocation2 + $0x1f1] sm:$0xff] }
  0x5b   : > { %v5572_v21 = vpack.c.bf16 %v641_v14, %v640_v10  ;;  %v4762_v46 = vld [vmem:[%s6323_s3 + $0x208] sm:$0xff]   ;;  %v737_v43 = vld [vmem:[#allocation2 + $0x211] sm:$0xff] }
  0x5c   : > { %v736_v39 = vld [vmem:[#allocation2 + $0x209] sm:$0xff] }
  0x5d   : > { %v5670_v14 = vpack.c.bf16 %v737_v43, %v736_v39 }
  0x60   : > { %1643 = vmatmul.mubr.bf16.gmra.mrb[24].mxu0 %v5391_v13 }
  0x61   : > { %1796 = vmatmul.mubr.bf16.gmra.mrb[20].mxu1 %v5416_v45  ;;  %1650 = vmatprep.mubr.bf16.mxu0 %v5420_v48 }
  0x62   : > { %1803 = vmatprep.mubr.bf16.mxu1 %v5425_v50 }
  0x68   : > { %1651 = vmatmul.mubr.bf16.gmra.mrb[28].mxu0 %v5425_v50 }
  0x69   : > { %1804 = vmatmul.mubr.bf16.gmra.mrb[24].mxu1 %v5455_v17  ;;  %1658 = vmatprep.mubr.bf16.mxu0 %v5459_v18 }
  0x6a   : > { %1811 = vmatprep.mubr.bf16.mxu1 %v5464_v26 }
  0x70   : > { %1659 = vmatmul.mubr.bf16.gmra.mrb[32].mxu0 %v5464_v26 }
  0x71   : > { %1812 = vmatmul.mubr.bf16.gmra.mrb[28].mxu1 %v5484_v29  ;;  %1666 = vmatprep.mubr.bf16.mxu0 %v5488_v31 }
  0x72   : > { %1819 = vmatprep.mubr.bf16.mxu1 %v5490_v32 }
  0x78   : > { %1667 = vmatmul.mubr.bf16.gmra.mrb[36].mxu0 %v5490_v32 }
  0x79   : > { %1820 = vmatmul.mubr.bf16.gmra.mrb[32].mxu1 %v5496_v20  ;;  %1674 = vmatprep.mubr.bf16.mxu0 %v5500_v56 }
  0x7a   : > { %1827 = vmatprep.mubr.bf16.mxu1 %v5502_v61 }
  0x80   : > { %1675 = vmatmul.mubr.bf16.gmra.mrb[40].mxu0 %v5502_v61 }
  0x81   : > { %1828 = vmatmul.mubr.bf16.gmra.mrb[36].mxu1 %v5508_v62  ;;  %1682 = vmatprep.mubr.bf16.mxu0 %v5512_v16 }
  0x82   : > { %1835 = vmatprep.mubr.bf16.mxu1 %v5514_v19 }
  0x88   : > { %1683 = vmatmul.mubr.bf16.gmra.mrb[44].mxu0 %v5514_v19 }
  0x89   : > { %1836 = vmatmul.mubr.bf16.gmra.mrb[40].mxu1 %v5520_v6  ;;  %1690 = vmatprep.mubr.bf16.mxu0 %v5524_v23 }
  0x8a   : > { %1843 = vmatprep.mubr.bf16.mxu1 %v5526_v30 }
  0x90   : > { %1691 = vmatmul.mubr.bf16.gmra.mrb[48].mxu0 %v5526_v30 }
  0x91   : > { %1844 = vmatmul.mubr.bf16.gmra.mrb[44].mxu1 %v5532_v22  ;;  %1698 = vmatprep.mubr.bf16.mxu0 %v5536_v49 }
  0x92   : > { %1851 = vmatprep.mubr.bf16.mxu1 %v5538_v15 }
  0x98   : > { %1699 = vmatmul.mubr.bf16.gmra.mrb[52].mxu0 %v5538_v15 }
  0x99   : > { %1852 = vmatmul.mubr.bf16.gmra.mrb[48].mxu1 %v5544_v34  ;;  %1706 = vmatprep.mubr.bf16.mxu0 %v5402_v27 }
  0x9a   : > { %1859 = vmatprep.mubr.bf16.mxu1 %v5546_v38 }
  0xa0   : > { %1707 = vmatmul.mubr.bf16.gmra.mrb[56].mxu0 %v5546_v38 }
  0xa1   : > { %1860 = vmatmul.mubr.bf16.gmra.mrb[52].mxu1 %v5552_v51  ;;  %1714 = vmatprep.mubr.bf16.mxu0 %v5430_v57 }
  0xa2   : > { %1867 = vmatprep.mubr.bf16.mxu1 %v5554_v33 }
  0xa8   : > { %1715 = vmatmul.mubr.bf16.gmra.mrb[60].mxu0 %v5554_v33 }
  0xa9   : > { %1868 = vmatmul.mubr.bf16.gmra.mrb[56].mxu1 %v5560_v1  ;;  %1916 = vmatprep.mubr.bf16.mxu0 %v5251_v52  ;;  %v4763_v52 = vld [vmem:[%s6323_s3 + $0x210] sm:$0xff]  }
  0xaa   : > { %1875 = vmatprep.mubr.bf16.mxu1 %v5562_v4 }
  0xb0   : > { %1917 = vmatmul.mubr.bf16.vlgmr.msra.gmra.mrb[64].mxu0 %v5150_v54  ;;  %v4765_v54 = vld [vmem:[%s6323_s3 + $0x220] sm:$0xff]  }
  0xb1   : > { %1876 = vmatmul.mubr.bf16.gmra.mrb[60].mxu1 %v5572_v21  ;;  %4525 = vmatpush3.bf16.msra.mxu0 %v5478_v41 }
  0xb2   : > { %2077 = vmatprep.mubr.bf16.mxu1 %v5204_v25  ;;  %1924 = vmatprep.mubr.bf16.mxu0 %v5279_v2  ;;  %v4766_v2 = vld [vmem:[%s6323_s3 + $0x228] sm:$0xff]  }
  0xb3   : > { %4526 = vmatprep.subr.bf16.mxu0 %v4762_v46 }
  0xb5   : > { %4527 = vmatpush3.bf16.msra.mxu0 %v4762_v46 }
  0xb6   : > { %4528 = vmatprep.subr.bf16.mxu0 %v4763_v52 }
  0xb8   : > { %1925 = vmatmul.mubr.bf16.gmra.mrb[68].mxu0 %v5204_v25  ;;  %v4767_v25 = vld [vmem:[%s6323_s3 + $0x230] sm:$0xff]  }
  0xb9   : > { %2078 = vmatmul.mubr.bf16.vlgmr.msra.gmra.mrb[64].mxu1 %v5232_v42  ;;  %1932 = vmatprep.mubr.bf16.mxu0 %v5331_v35  ;;  %v4768_v42 = vld [vmem:[%s6323_s3 + $0x238] sm:$0xff]  }
  0xba   : > { %2085 = vmatprep.mubr.bf16.mxu1 %v5255_v53  ;;  %4529 = vmatpush3.bf16.msra.mxu0 %v4763_v52 }
  0xbb   : > { %4530 = vmatprep.subr.bf16.mxu0 %v4764_v9 }
  0xbe   : > { %4531 = vmatpush3.bf16.msra.mxu0 %v4764_v9 }
  0xbf   : > { %4532 = vmatprep.subr.bf16.mxu0 %v4765_v54 }
  0xc0   : > { %1933 = vmatmul.mubr.bf16.gmra.mrb[72].mxu0 %v5255_v53 }
  0xc1   : > { %2086 = vmatmul.mubr.bf16.gmra.mrb[68].mxu1 %v5257_v55  ;;  %1940 = vmatprep.mubr.bf16.mxu0 %v5382_v11 }
  0xc2   : > { %2093 = vmatprep.mubr.bf16.mxu1 %v5283_v3  ;;  %4533 = vmatpush3.bf16.msra.mxu0 %v4765_v54 }
  0xc3   : > { %4534 = vmatprep.subr.bf16.mxu0 %v4766_v2 }
  0xc6   : > { %4535 = vmatpush3.bf16.msra.mxu0 %v4766_v2 }
  0xc7   : > { %4536 = vmatprep.subr.bf16.mxu0 %v4767_v25 }
  0xc8   : > { %1941 = vmatmul.mubr.bf16.gmra.mrb[76].mxu0 %v5283_v3 }
  0xc9   : > { %2094 = vmatmul.mubr.bf16.gmra.mrb[72].mxu1 %v5289_v7  ;;  %1948 = vmatprep.mubr.bf16.mxu0 %v5416_v45 }
  0xca   : > { %2101 = vmatprep.mubr.bf16.mxu1 %v5335_v36  ;;  %4537 = vmatpush3.bf16.msra.mxu0 %v4767_v25 }
  0xcb   : > { %4538 = vmatprep.subr.bf16.mxu0 %v4768_v42 }
  0xce   : > { %4539 = vmatpush3.bf16.msra.mxu0 %v4768_v42  ;;  %v803_v42 = vld [vmem:[#allocation2 + $0x49] sm:$0xff] }
  0xd0   : > { %1949 = vmatmul.mubr.bf16.gmra.mrb[80].mxu0 %v5335_v36 }
  0xd1   : > { %2102 = vmatmul.mubr.bf16.gmra.mrb[76].mxu1 %v5343_v44  ;;  %1956 = vmatprep.mubr.bf16.mxu0 %v5455_v17  ;;  %v5645_v44 = vld [vmem:[%s6324_s4] ss:$0 sm:$0xff] }
  0xd2   : > { %2109 = vmatprep.mubr.bf16.mxu1 %v5386_v12 }
  0xd8   : > { %1957 = vmatmul.mubr.bf16.gmra.mrb[84].mxu0 %v5386_v12 }
  0xd9   : > { %2110 = vmatmul.mubr.bf16.gmra.mrb[80].mxu1 %v5391_v13  ;;  %1964 = vmatprep.mubr.bf16.mxu0 %v5484_v29 }
  0xda   : > { %2117 = vmatprep.mubr.bf16.mxu1 %v5420_v48 }
  0xe0   : > { %1965 = vmatmul.mubr.bf16.gmra.mrb[88].mxu0 %v5420_v48 }
  0xe1   : > { %2118 = vmatmul.mubr.bf16.gmra.mrb[84].mxu1 %v5425_v50  ;;  %1972 = vmatprep.mubr.bf16.mxu0 %v5496_v20 }
  0xe2   : > { %2125 = vmatprep.mubr.bf16.mxu1 %v5459_v18 }
  0xe8   : > { %1973 = vmatmul.mubr.bf16.gmra.mrb[92].mxu0 %v5459_v18 }
  0xe9   : > { %2126 = vmatmul.mubr.bf16.gmra.mrb[88].mxu1 %v5464_v26  ;;  %1980 = vmatprep.mubr.bf16.mxu0 %v5508_v62 }
  0xea   : > { %2133 = vmatprep.mubr.bf16.mxu1 %v5488_v31 }
  0xf0   : > { %1981 = vmatmul.mubr.bf16.gmra.mrb[96].mxu0 %v5488_v31 }
  0xf1   : > { %2134 = vmatmul.mubr.bf16.gmra.mrb[92].mxu1 %v5490_v32  ;;  %1988 = vmatprep.mubr.bf16.mxu0 %v5520_v6 }
  0xf2   : > { %2141 = vmatprep.mubr.bf16.mxu1 %v5500_v56 }
  0xf8   : > { %1989 = vmatmul.mubr.bf16.gmra.mrb[100].mxu0 %v5500_v56 }
  0xf9   : > { %2142 = vmatmul.mubr.bf16.gmra.mrb[96].mxu1 %v5502_v61  ;;  %1996 = vmatprep.mubr.bf16.mxu0 %v5532_v22 }
  0xfa   : > { %2149 = vmatprep.mubr.bf16.mxu1 %v5512_v16 }
 0x100   : > { %1997 = vmatmul.mubr.bf16.gmra.mrb[104].mxu0 %v5512_v16 }
 0x101   : > { %v3879_v53 = vpop.f32.mrb[0].mxu0  ;;  %2150 = vmatmul.mubr.bf16.gmra.mrb[100].mxu1 %v5514_v19  ;;  %2004 = vmatprep.mubr.bf16.mxu0 %v5544_v34 }
 0x102   : > { %v3880_v55 = vpop.f32.mrb[1].mxu0  ;;  %2157 = vmatprep.mubr.bf16.mxu1 %v5524_v23 }
 0x103   : > { %v3881_v3 = vadd.f32 %v3880_v55, %v3879_v53  ;;  %v3882_v7 = vpop.f32.mrb[2].mxu0  ;;  %v804_v53 = vld [vmem:[#allocation2 + $0x51] sm:$0xff] }
 0x104   : > { %v3883_v35 = vpop.f32.mrb[3].mxu0 }
 0x105   : > { %v3884_v36 = vadd.f32 %v3883_v35, %v3882_v7  ;;  %v1597_v12 = vadd.f32 %v3881_v3, %v5645_v44 }
 0x107   : > { %v1600_v18 = vadd.f32 %v3884_v36, %v5645_v44 }
 0x108   : > { %2005 = vmatmul.mubr.bf16.gmra.mrb[108].mxu0 %v5524_v23 }
 0x109   : > { %2158 = vmatmul.mubr.bf16.gmra.mrb[104].mxu1 %v5526_v30  ;;  %2012 = vmatprep.mubr.bf16.mxu0 %v5552_v51 }
 0x10a   : > { %2165 = vmatprep.mubr.bf16.mxu1 %v5536_v49 }
 0x10b   : > { %v3885_v11 = vpop.f32.mrb[4].mxu0 }
 0x10c   : > { %v3991_v13 = vpop.f32.mrb[0].mxu1  ;;  %v3886_v45 = vpop.f32.mrb[5].mxu0 }
 0x10d   : > { %v3992_v48 = vpop.f32.mrb[1].mxu1  ;;  %v3887_v50 = vadd.f32 %v3886_v45, %v3885_v11  ;;  %v3888_v17 = vpop.f32.mrb[6].mxu0 }
 0x10e   : > { %v3993_v40 = vadd.f32 %v3992_v48, %v3991_v13  ;;  %v3994_v26 = vpop.f32.mrb[2].mxu1  ;;  %v3889_v41 = vpop.f32.mrb[7].mxu0  ;;  %v843_v13 = vpack.c.bf16 %v804_v53, %v803_v42 }
 0x10f   : > { %v3995_v29 = vpop.f32.mrb[3].mxu1  ;;  %v3890_v31 = vadd.f32 %v3889_v41, %v3888_v17  ;;  %v1605_v62 = vadd.f32 %v3887_v50, %v5645_v44  ;;  %v4841_v50 = vld [vmem:[#allocation2 + $0x8] sm:$0xff] }
 0x110   : > { %v5651_v32 = vadd.f32 %v3993_v40, %v1597_v12  ;;  %v3996_v20 = vadd.f32 %v3995_v29, %v3994_v26  ;;  %2013 = vmatmul.mubr.bf16.gmra.mrb[112].mxu0 %v5536_v49  ;;  %v977_v17 = vpack.c.bf16 %v4841_v50, %v4841_v50  ;;  %v769_v29 = vld [vmem:[#allocation2 + $0x227] sm:$0xff] }
 0x111   : > { %2166 = vmatmul.mubr.bf16.gmra.mrb[108].mxu1 %v5538_v15  ;;  %2020 = vmatprep.mubr.bf16.mxu0 %v5560_v1  ;;  %v1608_v22 = vadd.f32 %v3890_v31, %v5645_v44  ;;  %v805_v31 = vld [vmem:[#allocation2 + $0x69] sm:$0xff] }
 0x112   : > { %v5656_v56 = vadd.f32 %v3996_v20, %v1600_v18  ;;  %2173 = vmatprep.mubr.bf16.mxu1 %v5402_v27  ;;  %v806_v20 = vld [vmem:[#allocation2 + $0x71] sm:$0xff] }
 0x113   : > { %v3891_v61 = vpop.f32.mrb[8].mxu0 }
 0x114   : > { %v3997_v16 = vpop.f32.mrb[4].mxu1  ;;  %v3892_v19 = vpop.f32.mrb[9].mxu0 }
 0x115   : > { %v3998_v6 = vpop.f32.mrb[5].mxu1  ;;  %v3893_v23 = vadd.f32 %v3892_v19, %v3891_v61  ;;  %v3894_v30 = vpop.f32.mrb[10].mxu0  ;;  %v808_v19 = vld [vmem:[#allocation2 + $0x91] sm:$0xff] }
 0x116   : > { %v3999_v47 = vadd.f32 %v3998_v6, %v3997_v16  ;;  %v4000_v49 = vpop.f32.mrb[6].mxu1  ;;  %v3895_v24 = vpop.f32.mrb[11].mxu0  ;;  %v807_v16 = vld [vmem:[#allocation2 + $0x89] sm:$0xff] }
 0x117   : > { %v4001_v15 = vpop.f32.mrb[7].mxu1  ;;  %v3896_v28 = vadd.f32 %v3895_v24, %v3894_v30  ;;  %v1613_v37 = vadd.f32 %v3893_v23, %v5645_v44 }
 0x118   : > { %v5661_v34 = vadd.f32 %v3999_v47, %v1605_v62  ;;  %v4002_v58 = vadd.f32 %v4001_v15, %v4000_v49  ;;  %2021 = vmatmul.mubr.bf16.gmra.mrb[116].mxu0 %v5402_v27  ;;  %v770_v62 = vld [vmem:[#allocation2 + $0x22f] sm:$0xff]  ;;  %v852_v47 = vpack.c.bf16 %v806_v20, %v805_v31  ;;  %v861_v15 = vpack.c.bf16 %v808_v19, %v807_v16 }
 0x119   : > { %2174 = vmatmul.mubr.bf16.gmra.mrb[112].mxu1 %v5546_v38  ;;  %2028 = vmatprep.mubr.bf16.mxu0 %v5572_v21  ;;  %v1616_v27 = vadd.f32 %v3896_v28, %v5645_v44 }
 0x11a   : > { %v5666_v59 = vadd.f32 %v4002_v58, %v1608_v22  ;;  %2181 = vmatprep.mubr.bf16.mxu1 %v5430_v57 }
 0x11b   : > { %v3897_v51 = vpop.f32.mrb[12].mxu0 }
 0x11c   : > { %v4003_v60 = vpop.f32.mrb[8].mxu1  ;;  %v3898_v63 = vpop.f32.mrb[13].mxu0 }
 0x11d   : > { %v4004_v0 = vpop.f32.mrb[9].mxu1  ;;  %v3899_v1 = vadd.f32 %v3898_v63, %v3897_v51  ;;  %v3900_v10 = vpop.f32.mrb[14].mxu0 }
 0x11e   : > { %v4005_v38 = vadd.f32 %v4004_v0, %v4003_v60  ;;  %v4006_v21 = vpop.f32.mrb[10].mxu1  ;;  %v3901_v46 = vpop.f32.mrb[15].mxu0  ;;  %v809_v0 = vld [vmem:[#allocation2 + $0xa9] sm:$0xff] }
 0x11f   : > { %v4007_v52 = vpop.f32.mrb[11].mxu1  ;;  %v3902_v9 = vadd.f32 %v3901_v46, %v3900_v10  ;;  %v1621_v3 = vadd.f32 %v3899_v1, %v5645_v44  ;;  %v810_v1 = vld [vmem:[#allocation2 + $0xb1] sm:$0xff] }
 0x120   : > { %v5673_v54 = vadd.f32 %v4005_v38, %v1613_v37  ;;  %v4008_v2 = vadd.f32 %v4007_v52, %v4006_v21  ;;  %2029 = vmatmul.mubr.bf16.gmra.mrb[120].mxu0 %v5430_v57  ;;  %v812_v38 = vld [vmem:[#allocation2 + $0xd1] sm:$0xff] }
 0x121   : > { %2182 = vmatmul.mubr.bf16.gmra.mrb[116].mxu1 %v5554_v33  ;;  %2036 = vmatprep.mubr.bf16.mxu0 %v5670_v14  ;;  %v1624_v57 = vadd.f32 %v3902_v9, %v5645_v44 }
 0x122   : > { %v5678_v25 = vadd.f32 %v4008_v2, %v1616_v27  ;;  %2189 = vmatprep.mubr.bf16.mxu1 %v5566_v8  ;;  %v811_v27 = vld [vmem:[#allocation2 + $0xc9] sm:$0xff]  ;;  %v870_v2 = vpack.c.bf16 %v810_v1, %v809_v0 }
 0x123   : > { %v3903_v55 = vpop.f32.mrb[16].mxu0 }
 0x124   : > { %v4009_v7 = vpop.f32.mrb[12].mxu1  ;;  %v3904_v35 = vpop.f32.mrb[17].mxu0 }
 0x125   : > { %v4010_v36 = vpop.f32.mrb[13].mxu1  ;;  %v3905_v11 = vadd.f32 %v3904_v35, %v3903_v55  ;;  %v3906_v12 = vpop.f32.mrb[18].mxu0 }
 0x126   : > { %v4011_v33 = vadd.f32 %v4010_v36, %v4009_v7  ;;  %v4012_v45 = vpop.f32.mrb[14].mxu1  ;;  %v3907_v48 = vpop.f32.mrb[19].mxu0 }
 0x127   : > { %v4013_v18 = vpop.f32.mrb[15].mxu1  ;;  %v3908_v40 = vadd.f32 %v3907_v48, %v3906_v12  ;;  %v1629_v23 = vadd.f32 %v3905_v11, %v5645_v44  ;;  %v814_v48 = vld [vmem:[#allocation2 + $0xf1] sm:$0xff] }
 0x128   : > { %v5683_v26 = vadd.f32 %v4011_v33, %v1621_v3  ;;  %v4014_v41 = vadd.f32 %v4013_v18, %v4012_v45  ;;  %2037 = vmatmul.mubr.bf16.gmra.mrb[124].mxu0 %v5566_v8  ;;  %v976_v8 = vpack.c.bf16 %v770_v62, %v769_v29  ;;  %v879_v3 = vpack.c.bf16 %v812_v38, %v811_v27  ;;  %v813_v45 = vld [vmem:[#allocation2 + $0xe9] sm:$0xff]  ;;  %v816_v18 = vld [vmem:[#allocation2 + $0x111] sm:$0xff] }
 0x129   : > { %2190 = vmatmul.mubr.bf16.gmra.mrb[120].mxu1 %v5562_v4  ;;  %4540 = vmatprep.mubr.bf16.mxu0 %v843_v13  ;;  %v1632_v28 = vadd.f32 %v3908_v40, %v5645_v44  ;;  %v888_v20 = vpack.c.bf16 %v814_v48, %v813_v45  ;;  %v824_v45 = vld [vmem:[#allocation2 + $0x191] sm:$0xff] }
 0x12a   : > { %v5687_v61 = vadd.f32 %v4014_v41, %v1624_v57  ;;  %2197 = vmatprep.mubr.bf16.mxu1 %v977_v17  ;;  %v815_v17 = vld [vmem:[#allocation2 + $0x109] sm:$0xff] }
 0x12b   : > { %v3909_v6 = vpop.f32.mrb[20].mxu0 }
 0x12c   : > { %v4015_v30 = vpop.f32.mrb[16].mxu1  ;;  %v3910_v22 = vpop.f32.mrb[21].mxu0 }
 0x12d   : > { %v4016_v49 = vpop.f32.mrb[17].mxu1  ;;  %v3911_v24 = vadd.f32 %v3910_v22, %v3909_v6  ;;  %v3912_v4 = vpop.f32.mrb[22].mxu0  ;;  %v897_v6 = vpack.c.bf16 %v816_v18, %v815_v17 }
 0x12e   : > { %v4017_v58 = vadd.f32 %v4016_v49, %v4015_v30  ;;  %v4018_v39 = vpop.f32.mrb[18].mxu1  ;;  %v3913_v43 = vpop.f32.mrb[23].mxu0 }
 0x12f   : > { %v4019_v51 = vpop.f32.mrb[19].mxu1  ;;  %v3914_v37 = vadd.f32 %v3913_v43, %v3912_v4  ;;  %v1637_v46 = vadd.f32 %v3911_v24, %v5645_v44 }
 0x130   : > { %v5691_v60 = vadd.f32 %v4017_v58, %v1629_v23  ;;  %v4020_v63 = vadd.f32 %v4019_v51, %v4018_v39  ;;  %4541 = vmatmul.mubr.bf16.vlgmr.msra.gmra.mrb[128].mxu0 %v852_v47  ;;  %v817_v58 = vld [vmem:[#allocation2 + $0x129] sm:$0xff]  ;;  %v818_v39 = vld [vmem:[#allocation2 + $0x131] sm:$0xff] }
 0x131   : > { %2198 = vmatmul.mubr.bf16.gmra.mrb[124].mxu1 %v976_v8  ;;  %4544 = vmatprep.mubr.bf16.mxu0 %v861_v15  ;;  %v1640_v7 = vadd.f32 %v3914_v37, %v5645_v44  ;;  %v4769_v15 = vld [vmem:[%s6325_s5 + $0x40] sm:$0xff]   ;;  %v819_v51 = vld [vmem:[#allocation2 + $0x149] sm:$0xff]  ;;  %v820_v37 = vld [vmem:[#allocation2 + $0x151] sm:$0xff]  ;;  %v906_v38 = vpack.c.bf16 %v818_v39, %v817_v58 }
 0x132   : > { %v5693_v10 = vadd.f32 %v4020_v63, %v1632_v28  ;;  %v4770_v28 = vld [vmem:[%s6325_s5] sm:$0xff]   ;;  %4335 = vmatprep.subr.bf16.mxu1 %v4769_v15  ;;  %v825_v15 = vld [vmem:[#allocation2 + $0x1a9] sm:$0xff] }
 0x133   : > { %v3915_v21 = vpop.f32.mrb[24].mxu0  ;;  %4336 = vmatpush3.bf16.msra.mxu1 %v4770_v28  ;;  %v826_v28 = vld [vmem:[#allocation2 + $0x1b1] sm:$0xff]  ;;  %v827_v39 = vld [vmem:[#allocation2 + $0x1c9] sm:$0xff] }
 0x134   : > { %v4021_v52 = vpop.f32.mrb[20].mxu1  ;;  %v3916_v9 = vpop.f32.mrb[25].mxu0 }
 0x135   : > { %v4022_v42 = vpop.f32.mrb[21].mxu1  ;;  %v3917_v53 = vadd.f32 %v3916_v9, %v3915_v21  ;;  %v3918_v55 = vpop.f32.mrb[26].mxu0  ;;  %v915_v9 = vpack.c.bf16 %v820_v37, %v819_v51  ;;  %v828_v51 = vld [vmem:[#allocation2 + $0x1d1] sm:$0xff] }
 0x136   : > { %v4023_v35 = vadd.f32 %v4022_v42, %v4021_v52  ;;  %v4024_v36 = vpop.f32.mrb[22].mxu1  ;;  %v3919_v11 = vpop.f32.mrb[27].mxu0 }
 0x137   : > { %v4025_v12 = vpop.f32.mrb[23].mxu1  ;;  %v3920_v13 = vadd.f32 %v3919_v11, %v3918_v55  ;;  %v1645_v41 = vadd.f32 %v3917_v53, %v5645_v44  ;;  %v821_v11 = vld [vmem:[#allocation2 + $0x169] sm:$0xff] }
 0x138   : > { %v5697_v57 = vadd.f32 %v4023_v35, %v1637_v46  ;;  %v4026_v33 = vadd.f32 %v4025_v12, %v4024_v36  ;;  %4545 = vmatmul.mubr.bf16.gmra.mrb[132].mxu0 %v870_v2  ;;  %v822_v12 = vld [vmem:[#allocation2 + $0x171] sm:$0xff] }
 0x139   : > { %4548 = vmatprep.mubr.bf16.mxu0 %v879_v3  ;;  %v1648_v23 = vadd.f32 %v3920_v13, %v5645_v44 }
 0x13a   : > { %v5699_v50 = vadd.f32 %v4026_v33, %v1640_v7  ;;  %v823_v33 = vld [vmem:[#allocation2 + $0x189] sm:$0xff] }
 0x13b   : > { %v3921_v40 = vpop.f32.mrb[28].mxu0 }
 0x13c   : > { %v4027_v29 = vpop.f32.mrb[24].mxu1  ;;  %v3922_v31 = vpop.f32.mrb[29].mxu0 }
 0x13d   : > { %v4028_v62 = vpop.f32.mrb[25].mxu1  ;;  %v3923_v16 = vadd.f32 %v3922_v31, %v3921_v40  ;;  %v3924_v19 = vpop.f32.mrb[30].mxu0 }
 0x13e   : > { %v4029_v30 = vadd.f32 %v4028_v62, %v4027_v29  ;;  %v4030_v22 = vpop.f32.mrb[26].mxu1  ;;  %v3925_v47 = vpop.f32.mrb[31].mxu0  ;;  %v933_v62 = vpack.c.bf16 %v824_v45, %v823_v33 }
 0x13f   : > { %v4031_v49 = vpop.f32.mrb[27].mxu1  ;;  %v3926_v8 = vadd.f32 %v3925_v47, %v3924_v19  ;;  %v1653_v0 = vadd.f32 %v3923_v16, %v5645_v44 }
 0x140   : > { %v5703_v24 = vadd.f32 %v4029_v30, %v1645_v41  ;;  %v4032_v4 = vadd.f32 %v4031_v49, %v4030_v22  ;;  %4549 = vmatmul.mubr.bf16.gmra.mrb[136].mxu0 %v888_v20  ;;  %v924_v41 = vpack.c.bf16 %v822_v12, %v821_v11  ;;  %v829_v11 = vld [vmem:[#allocation2 + $0x1e9] sm:$0xff]  ;;  %v830_v12 = vld [vmem:[#allocation2 + $0x1f1] sm:$0xff] }
 0x141   : > { %4552 = vmatprep.mubr.bf16.mxu0 %v897_v6  ;;  %v1656_v2 = vadd.f32 %v3926_v8, %v5645_v44  ;;  %v4771_v8 = vld [vmem:[%s6325_s5 + $0x48] sm:$0xff]  }
 0x142   : > { %v5711_v43 = vadd.f32 %v4032_v4, %v1648_v23  ;;  %v4772_v4 = vld [vmem:[%s6325_s5 + $0x8] sm:$0xff]   ;;  %4337 = vmatprep.subr.bf16.mxu1 %v4771_v8  ;;  %v4774_v8 = vld [vmem:[%s6325_s5 + $0x10] sm:$0xff]  }
 0x143   : > { %v3927_v63 = vpop.f32.mrb[32].mxu0  ;;  %4338 = vmatpush3.bf16.msra.mxu1 %v4772_v4  ;;  %v833_v4 = vld [vmem:[#allocation2 + $0x229] sm:$0xff] }
 0x144   : > { %v4033_v1 = vpop.f32.mrb[28].mxu1  ;;  %v3928_v27 = vpop.f32.mrb[33].mxu0 }
 0x145   : > { %v4034_v21 = vpop.f32.mrb[29].mxu1  ;;  %v3929_v46 = vadd.f32 %v3928_v27, %v3927_v63  ;;  %v3930_v52 = vpop.f32.mrb[34].mxu0  ;;  %v942_v27 = vpack.c.bf16 %v826_v28, %v825_v15  ;;  %v834_v15 = vld [vmem:[#allocation2 + $0x231] sm:$0xff] }
 0x146   : > { %v4035_v42 = vadd.f32 %v4034_v21, %v4033_v1  ;;  %v4036_v53 = vpop.f32.mrb[30].mxu1  ;;  %v3931_v55 = vpop.f32.mrb[35].mxu0 }
 0x147   : > { %v4037_v3 = vpop.f32.mrb[31].mxu1  ;;  %v3932_v7 = vadd.f32 %v3931_v55, %v3930_v52  ;;  %v1661_v17 = vadd.f32 %v3929_v46, %v5645_v44  ;;  %v951_v52 = vpack.c.bf16 %v828_v51, %v827_v39 }
 0x148   : > { %v5715_v35 = vadd.f32 %v4035_v42, %v1653_v0  ;;  %v4038_v36 = vadd.f32 %v4037_v3, %v4036_v53  ;;  %4553 = vmatmul.mubr.bf16.gmra.mrb[140].mxu0 %v906_v38 }
 0x149   : > { %4556 = vmatprep.mubr.bf16.mxu0 %v915_v9  ;;  %v1664_v16 = vadd.f32 %v3932_v7, %v5645_v44 }
 0x14a   : > { %v5717_v13 = vadd.f32 %v4038_v36, %v1656_v2 }
 0x14b   : > { %v3933_v48 = vpop.f32.mrb[36].mxu0 }
 0x14c   : > { %v4039_v18 = vpop.f32.mrb[32].mxu1  ;;  %v3934_v40 = vpop.f32.mrb[37].mxu0 }
 0x14d   : > { %v4040_v29 = vpop.f32.mrb[33].mxu1  ;;  %v3935_v31 = vadd.f32 %v3934_v40, %v3933_v48  ;;  %v3936_v20 = vpop.f32.mrb[38].mxu0  ;;  %v960_v40 = vpack.c.bf16 %v830_v12, %v829_v11 }
 0x14e   : > { %v4041_v19 = vadd.f32 %v4040_v29, %v4039_v18  ;;  %v4042_v6 = vpop.f32.mrb[34].mxu1  ;;  %v3937_v23 = vpop.f32.mrb[39].mxu0 }
 0x14f   : > { %v4043_v30 = vpop.f32.mrb[35].mxu1  ;;  %v3938_v22 = vadd.f32 %v3937_v23, %v3936_v20  ;;  %v1669_v63 = vadd.f32 %v3935_v31, %v5645_v44 }
 0x150   : > { %v5721_v47 = vadd.f32 %v4041_v19, %v1661_v17  ;;  %v4044_v49 = vadd.f32 %v4043_v30, %v4042_v6  ;;  %4557 = vmatmul.mubr.bf16.gmra.mrb[144].mxu0 %v924_v41 }
 0x151   : > { %4560 = vmatprep.mubr.bf16.mxu0 %v933_v62  ;;  %v1672_v9 = vadd.f32 %v3938_v22, %v5645_v44 }
 0x152   : > { %v5729_v58 = vadd.f32 %v4044_v49, %v1664_v16  ;;  %v4773_v49 = vld [vmem:[%s6325_s5 + $0x50] sm:$0xff]  }
 0x153   : > { %v3939_v37 = vpop.f32.mrb[40].mxu0  ;;  %4339 = vmatprep.subr.bf16.mxu1 %v4773_v49 }
 0x154   : > { %v4045_v0 = vpop.f32.mrb[36].mxu1  ;;  %v3940_v1 = vpop.f32.mrb[41].mxu0  ;;  %4340 = vmatpush3.bf16.msra.mxu1 %v4774_v8 }
 0x155   : > { %v4046_v38 = vpop.f32.mrb[37].mxu1  ;;  %v3941_v21 = vadd.f32 %v3940_v1, %v3939_v37  ;;  %v3942_v46 = vpop.f32.mrb[42].mxu0 }
 0x156   : > { %v4047_v2 = vadd.f32 %v4046_v38, %v4045_v0  ;;  %v4048_v42 = vpop.f32.mrb[38].mxu1  ;;  %v3943_v53 = vpop.f32.mrb[43].mxu0  ;;  %v978_v0 = vpack.c.bf16 %v834_v15, %v833_v4 }
 0x157   : > { %v4049_v55 = vpop.f32.mrb[39].mxu1  ;;  %v3944_v3 = vadd.f32 %v3943_v53, %v3942_v46  ;;  %v1677_v48 = vadd.f32 %v3941_v21, %v5645_v44 }
 0x158   : > { %v5733_v7 = vadd.f32 %v4047_v2, %v1669_v63  ;;  %v4050_v36 = vadd.f32 %v4049_v55, %v4048_v42  ;;  %4561 = vmatmul.mubr.bf16.gmra.mrb[148].mxu0 %v942_v27 }
 0x159   : > { %4564 = vmatprep.mubr.bf16.mxu0 %v951_v52  ;;  %v1680_v20 = vadd.f32 %v3944_v3, %v5645_v44 }
 0x15a   : > { %v5735_v33 = vadd.f32 %v4050_v36, %v1672_v9 }
 0x15b   : > { %v3945_v45 = vpop.f32.mrb[44].mxu0 }
 0x15c   : > { %v4051_v17 = vpop.f32.mrb[40].mxu1  ;;  %v3946_v18 = vpop.f32.mrb[45].mxu0 }
 0x15d   : > { %v4052_v41 = vpop.f32.mrb[41].mxu1  ;;  %v3947_v29 = vadd.f32 %v3946_v18, %v3945_v45  ;;  %v3948_v31 = vpop.f32.mrb[46].mxu0 }
 0x15e   : > { %v4053_v62 = vadd.f32 %v4052_v41, %v4051_v17  ;;  %v4054_v16 = vpop.f32.mrb[42].mxu1  ;;  %v3949_v19 = vpop.f32.mrb[47].mxu0 }
 0x15f   : > { %v4055_v6 = vpop.f32.mrb[43].mxu1  ;;  %v3950_v23 = vadd.f32 %v3949_v19, %v3948_v31  ;;  %v1685_v51 = vadd.f32 %v3947_v29, %v5645_v44  ;;  %v4775_v19 = vld [vmem:[%s6325_s5 + $0x58] sm:$0xff]  }
 0x160   : > { %v5739_v30 = vadd.f32 %v4053_v62, %v1677_v48  ;;  %v4056_v22 = vadd.f32 %v4055_v6, %v4054_v16  ;;  %4565 = vmatmul.mubr.bf16.gmra.mrb[152].mxu0 %v960_v40  ;;  %v4776_v6 = vld [vmem:[%s6325_s5 + $0x18] sm:$0xff]   ;;  %4341 = vmatprep.subr.bf16.mxu1 %v4775_v19 }
 0x161   : > { %4568 = vmatprep.mubr.bf16.mxu0 %v5670_v14  ;;  %v1688_v21 = vadd.f32 %v3950_v23, %v5645_v44  ;;  %4342 = vmatpush3.bf16.msra.mxu1 %v4776_v6 }
 0x162   : > { %v5748_v28 = vadd.f32 %v4056_v22, %v1680_v20 }
 0x163   : > { %v3951_v39 = vpop.f32.mrb[48].mxu0 }
 0x164   : > { %v4057_v37 = vpop.f32.mrb[44].mxu1  ;;  %v3952_v63 = vpop.f32.mrb[49].mxu0 }
 0x165   : > { %v4058_v1 = vpop.f32.mrb[45].mxu1  ;;  %v3953_v27 = vadd.f32 %v3952_v63, %v3951_v39  ;;  %v3954_v38 = vpop.f32.mrb[50].mxu0 }
 0x166   : > { %v4059_v46 = vadd.f32 %v4058_v1, %v4057_v37  ;;  %v4060_v52 = vpop.f32.mrb[46].mxu1  ;;  %v3955_v14 = vpop.f32.mrb[51].mxu0 }
 0x167   : > { %v4061_v9 = vpop.f32.mrb[47].mxu1  ;;  %v3956_v2 = vadd.f32 %v3955_v14, %v3954_v38  ;;  %v1693_v36 = vadd.f32 %v3953_v27, %v5645_v44 }
 0x168   : > { %v5752_v42 = vadd.f32 %v4059_v46, %v1685_v51  ;;  %v4062_v53 = vadd.f32 %v4061_v9, %v4060_v52  ;;  %4569 = vmatmul.mubr.bf16.gmra.mrb[156].mxu0 %v978_v0 }
 0x169   : > { %v1696_v18 = vadd.f32 %v3956_v2, %v5645_v44 }
 0x16a   : > { %v5754_v55 = vadd.f32 %v4062_v53, %v1688_v21 }
 0x16b   : > { %v3957_v3 = vpop.f32.mrb[52].mxu0 }
 0x16c   : > { %v4063_v11 = vpop.f32.mrb[48].mxu1  ;;  %v3958_v12 = vpop.f32.mrb[53].mxu0 }
 0x16d   : > { %v4064_v45 = vpop.f32.mrb[49].mxu1  ;;  %v3959_v48 = vadd.f32 %v3958_v12, %v3957_v3  ;;  %v3960_v17 = vpop.f32.mrb[54].mxu0 }
 0x16e   : > { %v4065_v40 = vadd.f32 %v4064_v45, %v4063_v11  ;;  %v4066_v41 = vpop.f32.mrb[50].mxu1  ;;  %v3961_v29 = vpop.f32.mrb[55].mxu0 }
 0x16f   : > { %v4067_v31 = vpop.f32.mrb[51].mxu1  ;;  %v3962_v20 = vadd.f32 %v3961_v29, %v3960_v17  ;;  %v1701_v49 = vadd.f32 %v3959_v48, %v5645_v44 }
 0x170   : > { %v5758_v62 = vadd.f32 %v4065_v40, %v1693_v36  ;;  %v4068_v16 = vadd.f32 %v4067_v31, %v4066_v41  ;;  %v4777_v31 = vld [vmem:[%s6325_s5 + $0x60] sm:$0xff]  }
 0x171   : > { %v1704_v37 = vadd.f32 %v3962_v20, %v5645_v44  ;;  %v4778_v20 = vld [vmem:[%s6325_s5 + $0x20] sm:$0xff]   ;;  %4343 = vmatprep.subr.bf16.mxu1 %v4777_v31 }
 0x172   : > { %v5766_v23 = vadd.f32 %v4068_v16, %v1696_v18  ;;  %4344 = vmatpush3.bf16.msra.mxu1 %v4778_v20  ;;  %v4782_v31 = vld [vmem:[%s6325_s5 + $0x100] sm:$0xff]  }
 0x173   : > { %v3963_v22 = vpop.f32.mrb[56].mxu0 }
 0x174   : > { %v4069_v8 = vpop.f32.mrb[52].mxu1  ;;  %v3964_v4 = vpop.f32.mrb[57].mxu0 }
 0x175   : > { %v4070_v15 = vpop.f32.mrb[53].mxu1  ;;  %v3965_v39 = vadd.f32 %v3964_v4, %v3963_v22  ;;  %v3966_v51 = vpop.f32.mrb[58].mxu0 }
 0x176   : > { %v4071_v63 = vadd.f32 %v4070_v15, %v4069_v8  ;;  %v4072_v0 = vpop.f32.mrb[54].mxu1  ;;  %v3967_v1 = vpop.f32.mrb[59].mxu0 }
 0x177   : > { %v4073_v27 = vpop.f32.mrb[55].mxu1  ;;  %v3968_v38 = vadd.f32 %v3967_v1, %v3966_v51  ;;  %v1709_v9 = vadd.f32 %v3965_v39, %v5645_v44 }
 0x178   : > { %v5770_v21 = vadd.f32 %v4071_v63, %v1701_v49  ;;  %v4074_v46 = vadd.f32 %v4073_v27, %v4072_v0 }
 0x179   : > { %v1712_v12 = vadd.f32 %v3968_v38, %v5645_v44 }
 0x17a   : > { %v5772_v52 = vadd.f32 %v4074_v46, %v1704_v37 }
 0x17b   : > { %v3969_v14 = vpop.f32.mrb[60].mxu0 }
 0x17c   : > { %v4075_v2 = vpop.f32.mrb[56].mxu1  ;;  %v3970_v53 = vpop.f32.mrb[61].mxu0 }
 0x17d   : > { %v4076_v3 = vpop.f32.mrb[57].mxu1  ;;  %v3971_v36 = vadd.f32 %v3970_v53, %v3969_v14  ;;  %v3972_v11 = vpop.f32.mrb[62].mxu0 }
 0x17e   : > { %v4077_v45 = vadd.f32 %v4076_v3, %v4075_v2  ;;  %v4078_v48 = vpop.f32.mrb[58].mxu1  ;;  %v3973_v17 = vpop.f32.mrb[63].mxu0 }
 0x17f   : > { %v4079_v18 = vpop.f32.mrb[59].mxu1  ;;  %v3974_v40 = vadd.f32 %v3973_v17, %v3972_v11  ;;  %v1717_v6 = vadd.f32 %v3971_v36, %v5645_v44 }
 0x180   : > { %v5776_v41 = vadd.f32 %v4077_v45, %v1709_v9  ;;  %v4080_v29 = vadd.f32 %v4079_v18, %v4078_v48 }
 0x181   : > { %v1720_v39 = vadd.f32 %v3974_v40, %v5645_v44  ;;  %v4780_v40 = vld [vmem:[%s6325_s5 + $0x140] sm:$0xff]  }
 0x182   : > { %v5784_v16 = vadd.f32 %v4080_v29, %v1712_v12  ;;  %4415 = vmatprep.subr.bf16.mxu0 %v4780_v40 }
 0x183   : > { %v4103_v19 = vpop.f32.mrb[64].mxu0  ;;  %4416 = vmatpush3.bf16.msra.mxu0 %v4782_v31  ;;  %v4789_v31 = vld [vmem:[%s6325_s5 + $0x70] sm:$0xff]  }
 0x184   : > { %v4081_v22 = vpop.f32.mrb[60].mxu1  ;;  %v4104_v49 = vpop.f32.mrb[65].mxu0 }
 0x185   : > { %v4082_v8 = vpop.f32.mrb[61].mxu1  ;;  %v4105_v4 = vadd.f32 %v4104_v49, %v4103_v19  ;;  %v4106_v15 = vpop.f32.mrb[66].mxu0 }
 0x186   : > { %v4083_v51 = vadd.f32 %v4082_v8, %v4081_v22  ;;  %v4084_v37 = vpop.f32.mrb[62].mxu1  ;;  %v4107_v63 = vpop.f32.mrb[67].mxu0  ;;  %v4784_v8 = vld [vmem:[%s6325_s5 + $0x108] sm:$0xff]  }
 0x187   : > { %v4085_v0 = vpop.f32.mrb[63].mxu1  ;;  %v1919_v1 = vadd.f32 %v4105_v4, %v5651_v32  ;;  %v4108_v27 = vadd.f32 %v4107_v63, %v4106_v15 }
 0x188   : > { %v5789_v38 = vadd.f32 %v4083_v51, %v1717_v6  ;;  %v4086_v46 = vadd.f32 %v4085_v0, %v4084_v37 }
 0x189   : > { %v1922_v14 = vadd.f32 %v4108_v27, %v5656_v56  ;;  %v4779_v27 = vld [vmem:[%s6325_s5 + $0x68] sm:$0xff]  }
 0x18a   : > { %v5792_v9 = vadd.f32 %v4086_v46, %v1720_v39  ;;  %v4781_v46 = vld [vmem:[%s6325_s5 + $0x28] sm:$0xff]   ;;  %4345 = vmatprep.subr.bf16.mxu1 %v4779_v27 }
 0x18b   : > { %v4109_v2 = vpop.f32.mrb[68].mxu0  ;;  %4346 = vmatpush3.bf16.msra.mxu1 %v4781_v46 }
 0x18c   : > { %v4215_v53 = vpop.f32.mrb[64].mxu1  ;;  %v4110_v3 = vpop.f32.mrb[69].mxu0  ;;  %4347 = vmatprep.subr.bf16.mxu1 %v4789_v31 }
 0x18d   : > { %v4216_v36 = vpop.f32.mrb[65].mxu1  ;;  %v4111_v11 = vadd.f32 %v4110_v3, %v4109_v2  ;;  %v4112_v44 = vpop.f32.mrb[70].mxu0 }
 0x18e   : > { %v4217_v12 = vadd.f32 %v4216_v36, %v4215_v53  ;;  %v4218_v45 = vpop.f32.mrb[66].mxu1  ;;  %v4113_v48 = vpop.f32.mrb[71].mxu0 }
 0x18f   : > { %v4219_v17 = vpop.f32.mrb[67].mxu1  ;;  %v1927_v32 = vadd.f32 %v4111_v11, %v5661_v34  ;;  %v4114_v18 = vadd.f32 %v4113_v48, %v4112_v44  ;;  %v4783_v34 = vld [vmem:[%s6325_s5 + $0x148] sm:$0xff]   ;;  %v4787_v44 = vld [vmem:[%s6325_s5 + $0x158] sm:$0xff]  }
 0x190   : > { %v4220_v56 = vadd.f32 %v4219_v17, %v4218_v45  ;;  %v5798_v29 = vadd.f32 %v4217_v12, %v1919_v1  ;;  %4417 = vmatprep.subr.bf16.mxu0 %v4783_v34  ;;  %v4788_v48 = vld [vmem:[%s6325_s5 + $0x118] sm:$0xff]  }
 0x191   : > { %v1930_v20 = vadd.f32 %v4114_v18, %v5666_v59  ;;  %4418 = vmatpush3.bf16.msra.mxu0 %v4784_v8 }
 0x192   : > { %v5804_v19 = vadd.f32 %v4220_v56, %v1922_v14  ;;  %v4785_v14 = vld [vmem:[%s6325_s5 + $0x150] sm:$0xff]  }
 0x193   : > { %v4115_v6 = vpop.f32.mrb[72].mxu0  ;;  %4419 = vmatprep.subr.bf16.mxu0 %v4785_v14 }
 0x194   : > { %v4221_v22 = vpop.f32.mrb[68].mxu1  ;;  %v4116_v49 = vpop.f32.mrb[73].mxu0 }
 0x195   : > { %v4222_v4 = vpop.f32.mrb[69].mxu1  ;;  %v4117_v15 = vadd.f32 %v4116_v49, %v4115_v6  ;;  %v4118_v39 = vpop.f32.mrb[74].mxu0  ;;  %v4791_v49 = vld [vmem:[%s6325_s5 + $0x30] sm:$0xff]  }
 0x196   : > { %v4223_v59 = vadd.f32 %v4222_v4, %v4221_v22  ;;  %v4224_v51 = vpop.f32.mrb[70].mxu1  ;;  %v4119_v37 = vpop.f32.mrb[75].mxu0  ;;  %v4790_v22 = vld [vmem:[%s6325_s5 + $0x160] sm:$0xff]   ;;  %4348 = vmatpush3.bf16.msra.mxu1 %v4791_v49 }
 0x197   : > { %v4225_v63 = vpop.f32.mrb[71].mxu1  ;;  %v1935_v0 = vadd.f32 %v4117_v15, %v5673_v54  ;;  %v4120_v1 = vadd.f32 %v4119_v37, %v4118_v39  ;;  %v4786_v54 = vld [vmem:[%s6325_s5 + $0x110] sm:$0xff]   ;;  %v4792_v15 = vld [vmem:[%s6325_s5 + $0x120] sm:$0xff]   ;;  %v4794_v37 = vld [vmem:[%s6325_s5 + $0x168] sm:$0xff]  }
 0x198   : > { %v4226_v2 = vadd.f32 %v4225_v63, %v4224_v51  ;;  %v5822_v53 = vadd.f32 %v4223_v59, %v1927_v32  ;;  %4420 = vmatpush3.bf16.msra.mxu0 %v4786_v54  ;;  %v4793_v59 = vld [vmem:[%s6325_s5 + $0x78] sm:$0xff]  }
 0x199   : > { %v1938_v3 = vadd.f32 %v4120_v1, %v5678_v25  ;;  %4421 = vmatprep.subr.bf16.mxu0 %v4787_v44  ;;  %v4795_v63 = vld [vmem:[%s6325_s5 + $0x38] sm:$0xff]   ;;  %4349 = vmatprep.subr.bf16.mxu1 %v4793_v59  ;;  %v4796_v1 = vld [vmem:[%s6325_s5 + $0x128] sm:$0xff]  }
 0x19a   : > { %v5828_v36 = vadd.f32 %v4226_v2, %v1930_v20  ;;  %4350 = vmatpush3.bf16.msra.mxu1 %v4795_v63 }
 0x19b   : > { %v4121_v11 = vpop.f32.mrb[76].mxu0 }
 0x19c   : > { %v4227_v12 = vpop.f32.mrb[72].mxu1  ;;  %v4122_v45 = vpop.f32.mrb[77].mxu0  ;;  %4422 = vmatpush3.bf16.msra.mxu0 %v4788_v48 }
 0x19d   : > { %v4228_v17 = vpop.f32.mrb[73].mxu1  ;;  %v4123_v32 = vadd.f32 %v4122_v45, %v4121_v11  ;;  %v4124_v25 = vpop.f32.mrb[78].mxu0  ;;  %4423 = vmatprep.subr.bf16.mxu0 %v4790_v22  ;;  %v4797_v45 = vld [vmem:[%s6325_s5 + $0x170] sm:$0xff]  }
 0x19e   : > { %v4229_v18 = vadd.f32 %v4228_v17, %v4227_v12  ;;  %v4230_v40 = vpop.f32.mrb[74].mxu1  ;;  %v4125_v56 = vpop.f32.mrb[79].mxu0 }
 0x19f   : > { %v4231_v20 = vpop.f32.mrb[75].mxu1  ;;  %v1943_v6 = vadd.f32 %v4123_v32, %v5683_v26  ;;  %v4126_v34 = vadd.f32 %v4125_v56, %v4124_v25  ;;  %v4798_v32 = vld [vmem:[%s6325_s5 + $0x130] sm:$0xff]  }
 0x1a0   : > { %v4232_v8 = vadd.f32 %v4231_v20, %v4230_v40  ;;  %v5846_v4 = vadd.f32 %v4229_v18, %v1935_v0  ;;  %4424 = vmatpush3.bf16.msra.mxu0 %v4792_v15  ;;  %v4800_v20 = vld [vmem:[%s6325_s5 + $0x138] sm:$0xff]  }
 0x1a1   : > { %v1946_v39 = vadd.f32 %v4126_v34, %v5687_v61  ;;  %4425 = vmatprep.subr.bf16.mxu0 %v4794_v37 }
 0x1a2   : > { %v5852_v26 = vadd.f32 %v4232_v8, %v1938_v3 }
 0x1a3   : > { %v4127_v51 = vpop.f32.mrb[80].mxu0 }
 0x1a4   : > { %v4233_v0 = vpop.f32.mrb[76].mxu1  ;;  %v4128_v61 = vpop.f32.mrb[81].mxu0  ;;  %4426 = vmatpush3.bf16.msra.mxu0 %v4796_v1 }
 0x1a5   : > { %v4234_v27 = vpop.f32.mrb[77].mxu1  ;;  %v4129_v46 = vadd.f32 %v4128_v61, %v4127_v51  ;;  %v4130_v14 = vpop.f32.mrb[82].mxu0  ;;  %4427 = vmatprep.subr.bf16.mxu0 %v4797_v45 }
 0x1a6   : > { %v4235_v2 = vadd.f32 %v4234_v27, %v4233_v0  ;;  %v4236_v54 = vpop.f32.mrb[78].mxu1  ;;  %v4131_v3 = vpop.f32.mrb[83].mxu0 }
 0x1a7   : > { %v4237_v11 = vpop.f32.mrb[79].mxu1  ;;  %v1951_v44 = vadd.f32 %v4129_v46, %v5691_v60  ;;  %v4132_v12 = vadd.f32 %v4131_v3, %v4130_v14  ;;  %v4799_v60 = vld [vmem:[%s6325_s5 + $0x178] sm:$0xff]  }
 0x1a8   : > { %v4238_v48 = vadd.f32 %v4237_v11, %v4236_v54  ;;  %v5870_v17 = vadd.f32 %v4235_v2, %v1943_v6  ;;  %4428 = vmatpush3.bf16.msra.mxu0 %v4798_v32 }
 0x1a9   : > { %v1954_v25 = vadd.f32 %v4132_v12, %v5693_v10  ;;  %4429 = vmatprep.subr.bf16.mxu0 %v4799_v60 }
 0x1aa   : > { %v5876_v18 = vadd.f32 %v4238_v48, %v1946_v39 }
 0x1ab   : > { %v4133_v40 = vpop.f32.mrb[84].mxu0 }
 0x1ac   : > { %v4239_v56 = vpop.f32.mrb[80].mxu1  ;;  %v4134_v31 = vpop.f32.mrb[85].mxu0  ;;  %4430 = vmatpush3.bf16.msra.mxu0 %v4800_v20 }
 0x1ad   : > { %v4240_v6 = vpop.f32.mrb[81].mxu1  ;;  %v4135_v34 = vadd.f32 %v4134_v31, %v4133_v40  ;;  %v4136_v22 = vpop.f32.mrb[86].mxu0 }
 0x1ae   : > { %v4241_v10 = vadd.f32 %v4240_v6, %v4239_v56  ;;  %v4242_v49 = vpop.f32.mrb[82].mxu1  ;;  %v4137_v8 = vpop.f32.mrb[87].mxu0 }
 0x1af   : > { %v4243_v15 = vpop.f32.mrb[83].mxu1  ;;  %v1959_v39 = vadd.f32 %v4135_v34, %v5697_v57  ;;  %v4138_v59 = vadd.f32 %v4137_v8, %v4136_v22 }
 0x1b0   : > { %v4244_v51 = vadd.f32 %v4243_v15, %v4242_v49  ;;  %v5885_v37 = vadd.f32 %v4241_v10, %v1951_v44 }
 0x1b1   : > { %v1962_v63 = vadd.f32 %v4138_v59, %v5699_v50 }
 0x1b2   : > { %v5888_v0 = vadd.f32 %v4244_v51, %v1954_v25 }
 0x1b3   : > { %v4139_v61 = vpop.f32.mrb[88].mxu0 }
 0x1b4   : > { %v4245_v1 = vpop.f32.mrb[84].mxu1  ;;  %v4140_v27 = vpop.f32.mrb[89].mxu0 }
 0x1b5   : > { %v4246_v46 = vpop.f32.mrb[85].mxu1  ;;  %v4141_v14 = vadd.f32 %v4140_v27, %v4139_v61  ;;  %v4142_v2 = vpop.f32.mrb[90].mxu0 }
 0x1b6   : > { %v4247_v54 = vadd.f32 %v4246_v46, %v4245_v1  ;;  %v4248_v3 = vpop.f32.mrb[86].mxu1  ;;  %v4143_v11 = vpop.f32.mrb[91].mxu0 }
 0x1b7   : > { %v4249_v12 = vpop.f32.mrb[87].mxu1  ;;  %v1967_v57 = vadd.f32 %v4141_v14, %v5703_v24  ;;  %v4144_v45 = vadd.f32 %v4143_v11, %v4142_v2  ;;  %v4801_v24 = vld [vmem:[%s6325_s5 + $0xc0] sm:$0xff]  }
 0x1b8   : > { %v4250_v48 = vadd.f32 %v4249_v12, %v4248_v3  ;;  %v5891_v44 = vadd.f32 %v4247_v54, %v1959_v39  ;;  %4375 = vmatprep.subr.bf16.mxu1 %v4801_v24  ;;  %v5909_v12 = vld [vmem:[%s6325_s5 + $0x200] sm:$0xff]  }
 0x1b9   : > { %v1970_v50 = vadd.f32 %v4144_v45, %v5711_v43  ;;  %4572 = vmatprep.subr.bf16.mxu0 %v5909_v12 }
 0x1ba   : > { %v5894_v32 = vadd.f32 %v4250_v48, %v1962_v63 }
 0x1bb   : > { %v4145_v25 = vpop.f32.mrb[92].mxu0 }
 0x1bc   : > { %v4251_v40 = vpop.f32.mrb[88].mxu1  ;;  %v4146_v60 = vpop.f32.mrb[93].mxu0 }
 0x1bd   : > { %v4252_v56 = vpop.f32.mrb[89].mxu1  ;;  %v4147_v31 = vadd.f32 %v4146_v60, %v4145_v25  ;;  %v4148_v20 = vpop.f32.mrb[94].mxu0 }
 0x1be   : > { %v4253_v6 = vadd.f32 %v4252_v56, %v4251_v40  ;;  %v4254_v34 = vpop.f32.mrb[90].mxu1  ;;  %v4149_v22 = vpop.f32.mrb[95].mxu0 }
 0x1bf   : > { %v4255_v10 = vpop.f32.mrb[91].mxu1  ;;  %v1975_v49 = vadd.f32 %v4147_v31, %v5715_v35  ;;  %v4150_v8 = vadd.f32 %v4149_v22, %v4148_v20 }
 0x1c0   : > { %v4256_v43 = vadd.f32 %v4255_v10, %v4254_v34  ;;  %v5900_v15 = vadd.f32 %v4253_v6, %v1967_v57 }
 0x1c1   : > { %v1978_v39 = vadd.f32 %v4150_v8, %v5717_v13 }
 0x1c2   : > { %v5903_v59 = vadd.f32 %v4256_v43, %v1970_v50 }
 0x1c3   : > { %v4151_v51 = vpop.f32.mrb[96].mxu0 }
 0x1c4   : > { %v4257_v63 = vpop.f32.mrb[92].mxu1  ;;  %v4152_v61 = vpop.f32.mrb[97].mxu0 }
 0x1c5   : > { %v4258_v1 = vpop.f32.mrb[93].mxu1  ;;  %v4153_v27 = vadd.f32 %v4152_v61, %v4151_v51  ;;  %v4154_v46 = vpop.f32.mrb[98].mxu0 }
 0x1c6   : > { %v4259_v14 = vadd.f32 %v4258_v1, %v4257_v63  ;;  %v4260_v2 = vpop.f32.mrb[94].mxu1  ;;  %v4155_v54 = vpop.f32.mrb[99].mxu0 }
 0x1c7   : > { %v4261_v3 = vpop.f32.mrb[95].mxu1  ;;  %v1983_v35 = vadd.f32 %v4153_v27, %v5721_v47  ;;  %v4156_v11 = vadd.f32 %v4155_v54, %v4154_v46 }
 0x1c8   : > { %v4262_v13 = vadd.f32 %v4261_v3, %v4260_v2  ;;  %v5911_v57 = vadd.f32 %v4259_v14, %v1975_v49 }
 0x1c9   : > { %v1986_v45 = vadd.f32 %v4156_v11, %v5729_v58 }
 0x1ca   : > { %v5915_v48 = vadd.f32 %v4262_v13, %v1978_v39 }
 0x1cb   : > { %v4157_v50 = vpop.f32.mrb[100].mxu0 }
 0x1cc   : > { %v4263_v25 = vpop.f32.mrb[96].mxu1  ;;  %v4158_v40 = vpop.f32.mrb[101].mxu0 }
 0x1cd   : > { %v4264_v60 = vpop.f32.mrb[97].mxu1  ;;  %v4159_v47 = vadd.f32 %v4158_v40, %v4157_v50  ;;  %v4160_v56 = vpop.f32.mrb[102].mxu0 }
 0x1ce   : > { %v4265_v31 = vadd.f32 %v4264_v60, %v4263_v25  ;;  %v4266_v20 = vpop.f32.mrb[98].mxu1  ;;  %v4161_v6 = vpop.f32.mrb[103].mxu0 }
 0x1cf   : > { %v4267_v34 = vpop.f32.mrb[99].mxu1  ;;  %v1991_v22 = vadd.f32 %v4159_v47, %v5733_v7  ;;  %v4162_v24 = vadd.f32 %v4161_v6, %v4160_v56 }
 0x1d0   : > { %v4268_v10 = vadd.f32 %v4267_v34, %v4266_v20  ;;  %v5918_v49 = vadd.f32 %v4265_v31, %v1983_v35 }
 0x1d1   : > { %v1994_v58 = vadd.f32 %v4162_v24, %v5735_v33 }
 0x1d2   : > { %v5921_v8 = vadd.f32 %v4268_v10, %v1986_v45 }
 0x1d3   : > { %v4163_v43 = vpop.f32.mrb[104].mxu0 }
 0x1d4   : > { %v4269_v39 = vpop.f32.mrb[100].mxu1  ;;  %v4164_v51 = vpop.f32.mrb[105].mxu0 }
 0x1d5   : > { %v4270_v63 = vpop.f32.mrb[101].mxu1  ;;  %v4165_v61 = vadd.f32 %v4164_v51, %v4163_v43  ;;  %v4166_v1 = vpop.f32.mrb[106].mxu0 }
 0x1d6   : > { %v4271_v27 = vadd.f32 %v4270_v63, %v4269_v39  ;;  %v4272_v46 = vpop.f32.mrb[102].mxu1  ;;  %v4167_v14 = vpop.f32.mrb[107].mxu0 }
 0x1d7   : > { %v4273_v2 = vpop.f32.mrb[103].mxu1  ;;  %v1999_v7 = vadd.f32 %v4165_v61, %v5739_v30  ;;  %v4168_v54 = vadd.f32 %v4167_v14, %v4166_v1 }
 0x1d8   : > { %v4274_v3 = vadd.f32 %v4273_v2, %v4272_v46  ;;  %v5924_v35 = vadd.f32 %v4271_v27, %v1991_v22 }
 0x1d9   : > { %v2002_v33 = vadd.f32 %v4168_v54, %v5748_v28 }
 0x1da   : > { %v5927_v11 = vadd.f32 %v4274_v3, %v1994_v58 }
 0x1db   : > { %v4169_v13 = vpop.f32.mrb[108].mxu0 }
 0x1dc   : > { %v4275_v45 = vpop.f32.mrb[104].mxu1  ;;  %v4170_v50 = vpop.f32.mrb[109].mxu0 }
 0x1dd   : > { %v4276_v25 = vpop.f32.mrb[105].mxu1  ;;  %v4171_v40 = vadd.f32 %v4170_v50, %v4169_v13  ;;  %v4172_v60 = vpop.f32.mrb[110].mxu0 }
 0x1de   : > { %v4277_v47 = vadd.f32 %v4276_v25, %v4275_v45  ;;  %v4278_v56 = vpop.f32.mrb[106].mxu1  ;;  %v4173_v31 = vpop.f32.mrb[111].mxu0 }
 0x1df   : > { %v4279_v20 = vpop.f32.mrb[107].mxu1  ;;  %v2007_v30 = vadd.f32 %v4171_v40, %v5752_v42  ;;  %v4174_v6 = vadd.f32 %v4173_v31, %v4172_v60 }
 0x1e0   : > { %v4280_v34 = vadd.f32 %v4279_v20, %v4278_v56  ;;  %v5930_v22 = vadd.f32 %v4277_v47, %v1999_v7 }
 0x1e1   : > { %v2010_v28 = vadd.f32 %v4174_v6, %v5754_v55 }
 0x1e2   : > { %v5933_v24 = vadd.f32 %v4280_v34, %v2002_v33 }
 0x1e3   : > { %v4175_v10 = vpop.f32.mrb[112].mxu0 }
 0x1e4   : > { %v4281_v58 = vpop.f32.mrb[108].mxu1  ;;  %v4176_v43 = vpop.f32.mrb[113].mxu0 }
 0x1e5   : > { %v4282_v39 = vpop.f32.mrb[109].mxu1  ;;  %v4177_v51 = vadd.f32 %v4176_v43, %v4175_v10  ;;  %v4178_v63 = vpop.f32.mrb[114].mxu0 }
 0x1e6   : > { %v4283_v61 = vadd.f32 %v4282_v39, %v4281_v58  ;;  %v4284_v1 = vpop.f32.mrb[110].mxu1  ;;  %v4179_v27 = vpop.f32.mrb[115].mxu0 }
 0x1e7   : > { %v4285_v46 = vpop.f32.mrb[111].mxu1  ;;  %v2015_v42 = vadd.f32 %v4177_v51, %v5758_v62  ;;  %v4180_v14 = vadd.f32 %v4179_v27, %v4178_v63 }
 0x1e8   : > { %v4286_v2 = vadd.f32 %v4285_v46, %v4284_v1  ;;  %v5936_v7 = vadd.f32 %v4283_v61, %v2007_v30 }
 0x1e9   : > { %v2018_v55 = vadd.f32 %v4180_v14, %v5766_v23 }
 0x1ea   : > { %v5939_v54 = vadd.f32 %v4286_v2, %v2010_v28 }
 0x1eb   : > { %v4181_v3 = vpop.f32.mrb[116].mxu0 }
 0x1ec   : > { %v4287_v33 = vpop.f32.mrb[112].mxu1  ;;  %v4182_v13 = vpop.f32.mrb[117].mxu0 }
 0x1ed   : > { %v4288_v45 = vpop.f32.mrb[113].mxu1  ;;  %v4183_v50 = vadd.f32 %v4182_v13, %v4181_v3  ;;  %v4184_v25 = vpop.f32.mrb[118].mxu0 }
 0x1ee   : > { %v4289_v40 = vadd.f32 %v4288_v45, %v4287_v33  ;;  %v4290_v60 = vpop.f32.mrb[114].mxu1  ;;  %v4185_v47 = vpop.f32.mrb[119].mxu0 }
 0x1ef   : > { %v4291_v56 = vpop.f32.mrb[115].mxu1  ;;  %v2023_v62 = vadd.f32 %v4183_v50, %v5770_v21  ;;  %v4186_v31 = vadd.f32 %v4185_v47, %v4184_v25 }
 0x1f0   : > { %v4292_v20 = vadd.f32 %v4291_v56, %v4290_v60  ;;  %v5942_v30 = vadd.f32 %v4289_v40, %v2015_v42 }
 0x1f1   : > { %v2026_v23 = vadd.f32 %v4186_v31, %v5772_v52 }
 0x1f2   : > { %v5945_v6 = vadd.f32 %v4292_v20, %v2018_v55 }
 0x1f3   : > { %v4187_v34 = vpop.f32.mrb[120].mxu0 }
 0x1f4   : > { %v4293_v28 = vpop.f32.mrb[116].mxu1  ;;  %v4188_v10 = vpop.f32.mrb[121].mxu0 }
 0x1f5   : > { %v4294_v58 = vpop.f32.mrb[117].mxu1  ;;  %v4189_v43 = vadd.f32 %v4188_v10, %v4187_v34  ;;  %v4190_v39 = vpop.f32.mrb[122].mxu0 }
 0x1f6   : > { %v4295_v51 = vadd.f32 %v4294_v58, %v4293_v28  ;;  %v4296_v63 = vpop.f32.mrb[118].mxu1  ;;  %v4191_v61 = vpop.f32.mrb[123].mxu0 }
 0x1f7   : > { %v4297_v1 = vpop.f32.mrb[119].mxu1  ;;  %v2031_v21 = vadd.f32 %v4189_v43, %v5776_v41  ;;  %v4192_v27 = vadd.f32 %v4191_v61, %v4190_v39 }
 0x1f8   : > { %v4298_v46 = vadd.f32 %v4297_v1, %v4296_v63  ;;  %v5948_v42 = vadd.f32 %v4295_v51, %v2023_v62 }
 0x1f9   : > { %v2034_v52 = vadd.f32 %v4192_v27, %v5784_v16 }
 0x1fa   : > { %v5951_v14 = vadd.f32 %v4298_v46, %v2026_v23 }
 0x1fb   : > { %v4193_v2 = vpop.f32.mrb[124].mxu0 }
 0x1fc   : > { %v4299_v55 = vpop.f32.mrb[120].mxu1  ;;  %v4194_v3 = vpop.f32.mrb[125].mxu0 }
 0x1fd   : > { %v4300_v33 = vpop.f32.mrb[121].mxu1  ;;  %v4195_v13 = vadd.f32 %v4194_v3, %v4193_v2  ;;  %v4196_v45 = vpop.f32.mrb[126].mxu0 }
 0x1fe   : > { %v4301_v50 = vadd.f32 %v4300_v33, %v4299_v55  ;;  %v4302_v25 = vpop.f32.mrb[122].mxu1  ;;  %v4197_v40 = vpop.f32.mrb[127].mxu0 }
 0x1ff   : > { %v4303_v60 = vpop.f32.mrb[123].mxu1  ;;  %v2039_v41 = vadd.f32 %v4195_v13, %v5789_v38  ;;  %v4198_v47 = vadd.f32 %v4197_v40, %v4196_v45 }
 0x200   : > { %v4304_v56 = vadd.f32 %v4303_v60, %v4302_v25  ;;  %v5954_v62 = vadd.f32 %v4301_v50, %v2031_v21 }
 0x201   : > { %v2042_v16 = vadd.f32 %v4198_v47, %v5792_v9 }
 0x202   : > { %v5957_v31 = vadd.f32 %v4304_v56, %v2034_v52 }
 0x203   : > { %v4542_v20 = vpop.f32.mrb[128].mxu0 }
 0x204   : > { %v4305_v23 = vpop.f32.mrb[124].mxu1  ;;  %v2249_v34 = vadd.f32 %v4542_v20, %v5822_v53  ;;  %v2240_v28 = vpop.f32.mrb[129].mxu0 }
 0x205   : > { %v4306_v10 = vpop.f32.mrb[125].mxu1  ;;  %v2241_v58 = vadd.f32 %v2240_v28, %v5798_v29  ;;  %v4543_v43 = vpop.f32.mrb[130].mxu0 }
 0x206   : > { %v4307_v39 = vadd.f32 %v4306_v10, %v4305_v23  ;;  %v4308_v51 = vpop.f32.mrb[126].mxu1  ;;  %v2369_v38 = vmax.f32 %v2249_v34, 0.0  ;;  %v2252_v63 = vadd.f32 %v4543_v43, %v5828_v36  ;;  %v2243_v61 = vpop.f32.mrb[131].mxu0 }
 0x207   : > { %v4309_v1 = vpop.f32.mrb[127].mxu1  ;;  %v2367_v21 = vmax.f32 %v2241_v58, 0.0  ;;  %v2244_v9 = vadd.f32 %v2243_v61, %v5804_v19 }
 0x208   : > { %v4310_v27 = vadd.f32 %v4309_v1, %v4308_v51  ;;  %v2370_v46 = vmax.f32 %v2252_v63, 0.0  ;;  %v5963_v52 = vadd.f32 %v4307_v39, %v2039_v41 }
 0x209   : > { %v2399_v53 = vmax.f32 %v2367_v21, %v2369_v38  ;;  %v2368_v2 = vmax.f32 %v2244_v9, 0.0  ;;  %v5978_v38 = vld [vmem:[#allocation2 + $0x8] sm:$0xff] }
 0x20a   : > { %v5965_v55 = vadd.f32 %v4310_v27, %v2042_v16 }
 0x20b   : > { %2415 = vst [vmem:[#allocation4] sm:$0xff] %v2399_v53  ;;  %v2400_v29 = vmax.f32 %v2368_v2, %v2370_v46  ;;  %v4546_v3 = vpop.f32.mrb[132].mxu0  ;;  %v2509_v53 = vld [vmem:[#allocation3 + $0x7] sm:$0xff] }
 0x20c   : > { %v2265_v33 = vadd.f32 %v4546_v3, %v5870_v17  ;;  %v2256_v13 = vpop.f32.mrb[133].mxu0 }
 0x20d   : > { %2416 = vst [vmem:[#allocation4 + $0x8] sm:$0xff] %v2400_v29  ;;  %v2257_v36 = vadd.f32 %v2256_v13, %v5846_v4  ;;  %v4547_v45 = vpop.f32.mrb[134].mxu0 }
 0x20e   : > { %v2373_v50 = vmax.f32 %v2265_v33, 0.0  ;;  %v2268_v19 = vadd.f32 %v4547_v45, %v5876_v18  ;;  %v2259_v25 = vpop.f32.mrb[135].mxu0  ;;  %v4802_v45 = vld [vmem:[%s6325_s5 + $0x80] sm:$0xff]  }
 0x20f   : > { %v2371_v40 = vmax.f32 %v2257_v36, 0.0  ;;  %v2260_v60 = vadd.f32 %v2259_v25, %v5852_v26 }
 0x210   : > { %v2374_v41 = vmax.f32 %v2268_v19, 0.0 }
 0x211   : > { %v2401_v47 = vmax.f32 %v2371_v40, %v2373_v50  ;;  %v2372_v56 = vmax.f32 %v2260_v60, 0.0  ;;  %v4804_v60 = vld [vmem:[%s6325_s5 + $0x88] sm:$0xff]  }
 0x213   : > { %2417 = vst [vmem:[#allocation4 + $0x10] sm:$0xff] %v2401_v47  ;;  %v2402_v16 = vmax.f32 %v2372_v56, %v2374_v41  ;;  %v4550_v20 = vpop.f32.mrb[136].mxu0 }
 0x214   : > { %v2431_v23 = vld [vmem:[#allocation4] ss:$2 sm:$0xff]  ;;  %v2447_v17 = vld [vmem:[#allocation4 + $0x1] ss:$2 sm:$0xff]  ;;  %v2281_v34 = vadd.f32 %v4550_v20, %v5891_v44  ;;  %v2272_v28 = vpop.f32.mrb[137].mxu0 }
 0x215   : > { %v5972_v4 = vmax.f32 %v2431_v23, %v2447_v17  ;;  %2418 = vst [vmem:[#allocation4 + $0x18] sm:$0xff] %v2402_v16  ;;  %v2273_v18 = vadd.f32 %v2272_v28, %v5885_v37  ;;  %v4551_v10 = vpop.f32.mrb[138].mxu0 }
 0x216   : > { %v2377_v58 = vmax.f32 %v2281_v34, 0.0  ;;  %v2284_v26 = vadd.f32 %v4551_v10, %v5894_v32  ;;  %v2275_v43 = vpop.f32.mrb[139].mxu0 }
 0x217   : > { %2501 = vst [vmem:[#allocation3 + $0x20] sm:$0xff] %v5972_v4  ;;  %v2375_v39 = vmax.f32 %v2273_v18, 0.0  ;;  %v2276_v51 = vadd.f32 %v2275_v43, %v5888_v0  ;;  %v2583_v44 = vpack.c.bf16 %v5972_v4, %v5978_v38 }
 0x218   : > { %v2378_v63 = vmax.f32 %v2284_v26, 0.0 }
 0x219   : > { %v2403_v61 = vmax.f32 %v2375_v39, %v2377_v58  ;;  %v2376_v1 = vmax.f32 %v2276_v51, 0.0  ;;  %3233 = vmatprep.mubr.bf16.mxu1 %v2583_v44  ;;  %v4808_v44 = vld [vmem:[%s6325_s5 + $0xd8] sm:$0xff]  }
 0x21b   : > { %2419 = vst [vmem:[#allocation4 + $0x20] sm:$0xff] %v2403_v61  ;;  %v2404_v37 = vmax.f32 %v2376_v1, %v2378_v63  ;;  %v4554_v21 = vpop.f32.mrb[140].mxu0  ;;  %v4809_v1 = vld [vmem:[%s6325_s5 + $0x208] sm:$0xff]  }
 0x21c   : > { %v2433_v9 = vld [vmem:[#allocation4 + $0x10] ss:$2 sm:$0xff]  ;;  %v2449_v32 = vld [vmem:[#allocation4 + $0x11] ss:$2 sm:$0xff]  ;;  %v2297_v27 = vadd.f32 %v4554_v21, %v5911_v57  ;;  %v2288_v46 = vpop.f32.mrb[141].mxu0  ;;  %v4810_v21 = vld [vmem:[%s6325_s5 + $0x98] sm:$0xff]  }
 0x21d   : > { %v2463_v2 = vmax.f32 %v2433_v9, %v2449_v32  ;;  %2420 = vst [vmem:[#allocation4 + $0x28] sm:$0xff] %v2404_v37  ;;  %v2289_v0 = vadd.f32 %v2288_v46, %v5900_v15  ;;  %v4555_v29 = vpop.f32.mrb[142].mxu0  ;;  %v4803_v15 = vld [vmem:[%s6325_s5 + $0xc8] sm:$0xff]  }
 0x21e   : > { %v2381_v3 = vmax.f32 %v2297_v27, 0.0  ;;  %v2300_v33 = vadd.f32 %v4555_v29, %v5915_v48  ;;  %v2291_v13 = vpop.f32.mrb[143].mxu0  ;;  %v5985_v36 = vld [vmem:[#allocation3 + $0x1f] sm:$0xff] }
 0x21f   : > { %2502 = vst [vmem:[#allocation3 + $0x38] sm:$0xff] %v2463_v2  ;;  %v2379_v50 = vmax.f32 %v2289_v0, 0.0  ;;  %v2292_v57 = vadd.f32 %v2291_v13, %v5903_v59  ;;  %v2582_v19 = vpack.c.bf16 %v5985_v36, %v2509_v53  ;;  %v4805_v59 = vld [vmem:[%s6325_s5 + $0xd0] sm:$0xff]   ;;  %v6006_v26 = vld [vmem:[#allocation3 + $0x21] sm:$0xff]  ;;  %v2586_v61 = vpack.c.bf16 %v2463_v2, %v5972_v4 }
 0x220   : > { %v2382_v25 = vmax.f32 %v2300_v33, 0.0  ;;  %v4811_v4 = vld [vmem:[%s6325_s5 + $0xe0] sm:$0xff]   ;;  %v4812_v0 = vld [vmem:[%s6325_s5 + $0x210] sm:$0xff]  }
 0x221   : > { %v2405_v40 = vmax.f32 %v2379_v50, %v2381_v3  ;;  %v2380_v48 = vmax.f32 %v2292_v57, 0.0  ;;  %3234 = vmatmul.mubr.bf16.vlgmr.msra.gmra.mrb[128].mxu1 %v2582_v19 }
 0x222   : > { %4376 = vmatpush3.bf16.msra.mxu1 %v4802_v45 }
 0x223   : > { %2421 = vst [vmem:[#allocation4 + $0x30] sm:$0xff] %v2405_v40  ;;  %v2406_v41 = vmax.f32 %v2380_v48, %v2382_v25  ;;  %v4558_v47 = vpop.f32.mrb[144].mxu0  ;;  %4377 = vmatprep.subr.bf16.mxu1 %v4803_v15  ;;  %v4815_v40 = vld [vmem:[%s6325_s5 + $0x218] sm:$0xff]  }
 0x224   : > { %v2435_v56 = vld [vmem:[#allocation4 + $0x20] ss:$2 sm:$0xff]  ;;  %v2451_v16 = vld [vmem:[#allocation4 + $0x21] ss:$2 sm:$0xff]  ;;  %v2313_v20 = vadd.f32 %v4558_v47, %v5924_v35  ;;  %v2304_v23 = vpop.f32.mrb[145].mxu0 }
 0x225   : > { %v6002_v17 = vmax.f32 %v2435_v56, %v2451_v16  ;;  %2422 = vst [vmem:[#allocation4 + $0x38] sm:$0xff] %v2406_v41  ;;  %v2305_v34 = vadd.f32 %v2304_v23, %v5918_v49  ;;  %v4559_v28 = vpop.f32.mrb[146].mxu0  ;;  %v4807_v35 = vld [vmem:[%s6325_s5 + $0x90] sm:$0xff]  }
 0x226   : > { %v2385_v18 = vmax.f32 %v2313_v20, 0.0  ;;  %v2316_v10 = vadd.f32 %v4559_v28, %v5927_v11  ;;  %v2307_v58 = vpop.f32.mrb[147].mxu0  ;;  %v6008_v43 = vld [vmem:[#allocation3 + $0x39] sm:$0xff]  ;;  %4378 = vmatpush3.bf16.msra.mxu1 %v4804_v60 }
 0x227   : > { %2503 = vst [vmem:[#allocation3 + $0x50] sm:$0xff] %v6002_v17  ;;  %v2383_v39 = vmax.f32 %v2305_v34, 0.0  ;;  %v2308_v51 = vadd.f32 %v2307_v58, %v5921_v8  ;;  %v2587_v49 = vpack.c.bf16 %v6008_v43, %v6006_v26  ;;  %v6018_v11 = vpack.c.bf16 %v6002_v17, %v2463_v2  ;;  %4379 = vmatprep.subr.bf16.mxu1 %v4805_v59  ;;  %v6043_v50 = vld [vmem:[#allocation3 + $0x37] sm:$0xff]  ;;  %v4818_v34 = vld [vmem:[%s6325_s5 + $0x220] sm:$0xff]  }
 0x228   : > { %v2386_v63 = vmax.f32 %v2316_v10, 0.0  ;;  %v4817_v59 = vld [vmem:[%s6325_s5 + $0xf0] sm:$0xff]  }
 0x229   : > { %v2407_v37 = vmax.f32 %v2383_v39, %v2385_v18  ;;  %v2384_v8 = vmax.f32 %v2308_v51, 0.0  ;;  %3363 = vmatprep.mubr.bf16.mxu0 %v2587_v49  ;;  %3241 = vmatprep.mubr.bf16.mxu1 %v6018_v11 }
 0x22a   : > { %3364 = vmatmul.mubr.bf16.vlgmr.msra.gmra.mrb[160].mxu0 %v2586_v61  ;;  %4380 = vmatpush3.bf16.msra.mxu1 %v4807_v35  ;;  %v4820_v61 = vld [vmem:[%s6325_s5 + $0xf8] sm:$0xff]  }
 0x22b   : > { %2423 = vst [vmem:[#allocation4 + $0x40] sm:$0xff] %v2407_v37  ;;  %v2408_v9 = vmax.f32 %v2384_v8, %v2386_v63  ;;  %v4562_v32 = vpop.f32.mrb[148].mxu0  ;;  %4573 = vmatpush3.bf16.msra.mxu0 %v5909_v12  ;;  %4381 = vmatprep.subr.bf16.mxu1 %v4808_v44 }
 0x22c   : > { %v2437_v27 = vld [vmem:[#allocation4 + $0x30] ss:$2 sm:$0xff]  ;;  %v2453_v46 = vld [vmem:[#allocation4 + $0x31] ss:$2 sm:$0xff]  ;;  %v2329_v53 = vadd.f32 %v4562_v32, %v5936_v7  ;;  %v2320_v2 = vpop.f32.mrb[149].mxu0  ;;  %4574 = vmatprep.subr.bf16.mxu0 %v4809_v1 }
 0x22d   : > { %v6039_v29 = vmax.f32 %v2437_v27, %v2453_v46  ;;  %2424 = vst [vmem:[#allocation4 + $0x48] sm:$0xff] %v2408_v9  ;;  %v2321_v12 = vadd.f32 %v2320_v2, %v5930_v22  ;;  %v4563_v3 = vpop.f32.mrb[150].mxu0  ;;  %v4813_v7 = vld [vmem:[%s6325_s5 + $0xa0] sm:$0xff]   ;;  %v4822_v9 = vld [vmem:[%s6325_s5 + $0xb8] sm:$0xff]  }
 0x22e   : > { %v2389_v33 = vmax.f32 %v2329_v53, 0.0  ;;  %v2332_v13 = vadd.f32 %v4563_v3, %v5939_v54  ;;  %v2323_v45 = vpop.f32.mrb[151].mxu0  ;;  %v6045_v57 = vld [vmem:[#allocation3 + $0x4f] sm:$0xff]  ;;  %4382 = vmatpush3.bf16.msra.mxu1 %v4810_v21 }
 0x22f   : > { %2504 = vst [vmem:[#allocation3 + $0x68] sm:$0xff] %v6039_v29  ;;  %v2387_v19 = vmax.f32 %v2321_v12, 0.0  ;;  %v2324_v15 = vadd.f32 %v2323_v45, %v5933_v24  ;;  %v6054_v22 = vpack.c.bf16 %v6045_v57, %v6043_v50  ;;  %4575 = vmatpush3.bf16.msra.mxu0 %v4809_v1  ;;  %4383 = vmatprep.subr.bf16.mxu1 %v4811_v4  ;;  %v4814_v54 = vld [vmem:[%s6325_s5 + $0xe8] sm:$0xff]   ;;  %v6077_v51 = vld [vmem:[#allocation3 + $0x51] sm:$0xff] }
 0x230   : > { %v2390_v25 = vmax.f32 %v2332_v13, 0.0  ;;  %4576 = vmatprep.subr.bf16.mxu0 %v4812_v0  ;;  %v4816_v24 = vld [vmem:[%s6325_s5 + $0xa8] sm:$0xff]   ;;  %v2595_v37 = vpack.c.bf16 %v6039_v29, %v6002_v17  ;;  %v4823_v17 = vld [vmem:[%s6325_s5 + $0x1c0] sm:$0xff]  }
 0x231   : > { %v2409_v48 = vmax.f32 %v2387_v19, %v2389_v33  ;;  %v2388_v60 = vmax.f32 %v2324_v15, 0.0  ;;  %3242 = vmatmul.mubr.bf16.gmra.mrb[132].mxu1 %v6054_v22 }
 0x232   : > { %4384 = vmatpush3.bf16.msra.mxu1 %v4813_v7 }
 0x233   : > { %2425 = vst [vmem:[#allocation4 + $0x50] sm:$0xff] %v2409_v48  ;;  %v2410_v41 = vmax.f32 %v2388_v60, %v2390_v25  ;;  %v4566_v47 = vpop.f32.mrb[152].mxu0  ;;  %4577 = vmatpush3.bf16.msra.mxu0 %v4812_v0  ;;  %4385 = vmatprep.subr.bf16.mxu1 %v4814_v54  ;;  %v4824_v0 = vld [vmem:[%s6325_s5 + $0x230] sm:$0xff]  }
 0x234   : > { %v2439_v56 = vld [vmem:[#allocation4 + $0x40] ss:$2 sm:$0xff]  ;;  %v2455_v16 = vld [vmem:[#allocation4 + $0x41] ss:$2 sm:$0xff]  ;;  %v2345_v20 = vadd.f32 %v4566_v47, %v5948_v42  ;;  %v2336_v23 = vpop.f32.mrb[153].mxu0  ;;  %4578 = vmatprep.subr.bf16.mxu0 %v4815_v40 }
 0x235   : > { %v6073_v28 = vmax.f32 %v2439_v56, %v2455_v16  ;;  %2426 = vst [vmem:[#allocation4 + $0x58] sm:$0xff] %v2410_v41  ;;  %v2337_v18 = vadd.f32 %v2336_v23, %v5942_v30  ;;  %v4567_v10 = vpop.f32.mrb[154].mxu0  ;;  %v4819_v42 = vld [vmem:[%s6325_s5 + $0xb0] sm:$0xff]  }
 0x236   : > { %v2393_v58 = vmax.f32 %v2345_v20, 0.0  ;;  %v2348_v35 = vadd.f32 %v4567_v10, %v5951_v14  ;;  %v2339_v39 = vpop.f32.mrb[155].mxu0  ;;  %v6079_v49 = vld [vmem:[#allocation3 + $0x69] sm:$0xff]  ;;  %4386 = vmatpush3.bf16.msra.mxu1 %v4816_v24 }
 0x237   : > { %2505 = vst [vmem:[#allocation3 + $0x80] sm:$0xff] %v6073_v28  ;;  %v2391_v44 = vmax.f32 %v2337_v18, 0.0  ;;  %v2340_v63 = vadd.f32 %v2339_v39, %v5945_v6  ;;  %v2596_v30 = vpack.c.bf16 %v6079_v49, %v6077_v51  ;;  %v6090_v14 = vpack.c.bf16 %v6073_v28, %v6039_v29  ;;  %4579 = vmatpush3.bf16.msra.mxu0 %v4815_v40  ;;  %v4821_v6 = vld [vmem:[%s6325_s5 + $0x228] sm:$0xff]  }
 0x238   : > { %4387 = vmatprep.subr.bf16.mxu1 %v4817_v59  ;;  %v2394_v1 = vmax.f32 %v2348_v35, 0.0  ;;  %4580 = vmatprep.subr.bf16.mxu0 %v4818_v34  ;;  %v2513_v7 = vld [vmem:[#allocation3 + $0x67] sm:$0xff]  ;;  %v2585_v35 = vpack.c.bf16 %v6043_v50, %v5985_v36  ;;  %v2590_v50 = vpack.c.bf16 %v6077_v51, %v6008_v43 }
 0x239   : > { %v2411_v8 = vmax.f32 %v2391_v44, %v2393_v58  ;;  %v2392_v21 = vmax.f32 %v2340_v63, 0.0  ;;  %3371 = vmatprep.mubr.bf16.mxu0 %v2596_v30  ;;  %3249 = vmatprep.mubr.bf16.mxu1 %v6090_v14  ;;  %v4825_v30 = vld [vmem:[%s6325_s5 + $0x180] sm:$0xff]   ;;  %v4826_v36 = vld [vmem:[%s6325_s5 + $0x1c8] sm:$0xff]  }
 0x23a   : > { %3372 = vmatmul.mubr.bf16.gmra.mrb[164].mxu0 %v2595_v37  ;;  %4388 = vmatpush3.bf16.msra.mxu1 %v4819_v42  ;;  %v4830_v37 = vld [vmem:[%s6325_s5 + $0x190] sm:$0xff]  }
 0x23b   : > { %2427 = vst [vmem:[#allocation4 + $0x60] sm:$0xff] %v2411_v8  ;;  %v2412_v32 = vmax.f32 %v2392_v21, %v2394_v1  ;;  %v4570_v4 = vpop.f32.mrb[156].mxu0  ;;  %4581 = vmatpush3.bf16.msra.mxu0 %v4818_v34  ;;  %4389 = vmatprep.subr.bf16.mxu1 %v4820_v61  ;;  %v2594_v1 = vpack.c.bf16 %v2513_v7, %v6045_v57  ;;  %v4829_v57 = vld [vmem:[%s6325_s5 + $0x1d0] sm:$0xff]   ;;  %v4832_v21 = vld [vmem:[%s6325_s5 + $0x198] sm:$0xff]  }
 0x23c   : > { %v2441_v27 = vld [vmem:[#allocation4 + $0x50] ss:$2 sm:$0xff]  ;;  %v2457_v46 = vld [vmem:[#allocation4 + $0x51] ss:$2 sm:$0xff]  ;;  %v2361_v53 = vadd.f32 %v4570_v4, %v5963_v52  ;;  %v2352_v2 = vpop.f32.mrb[157].mxu0  ;;  %4582 = vmatprep.subr.bf16.mxu0 %v4821_v6 }
 0x23d   : > { %v2467_v29 = vmax.f32 %v2441_v27, %v2457_v46  ;;  %2428 = vst [vmem:[#allocation4 + $0x68] sm:$0xff] %v2412_v32  ;;  %v2353_v12 = vadd.f32 %v2352_v2, %v5954_v62  ;;  %v4571_v3 = vpop.f32.mrb[158].mxu0  ;;  %v4827_v62 = vld [vmem:[%s6325_s5 + $0x238] sm:$0xff]   ;;  %v4834_v4 = vld [vmem:[%s6325_s5 + $0x1a0] sm:$0xff]   ;;  %v4835_v46 = vld [vmem:[%s6325_s5 + $0x1e8] sm:$0xff]  }
 0x23e   : > { %v2397_v33 = vmax.f32 %v2361_v53, 0.0  ;;  %v2364_v13 = vadd.f32 %v4571_v3, %v5965_v55  ;;  %v2355_v45 = vpop.f32.mrb[159].mxu0  ;;  %v6113_v19 = vld [vmem:[#allocation3 + $0x7f] sm:$0xff]  ;;  %4390 = vmatpush3.bf16.msra.mxu1 %v4822_v9  ;;  %v4836_v53 = vld [vmem:[%s6325_s5 + $0x1a8] sm:$0xff]   ;;  %v4837_v2 = vld [vmem:[%s6325_s5 + $0x1f0] sm:$0xff]  }
 0x23f   : > { %2506 = vst [vmem:[#allocation3 + $0x98] sm:$0xff] %v2467_v29  ;;  %v2395_v52 = vmax.f32 %v2353_v12, 0.0  ;;  %v2356_v15 = vadd.f32 %v2355_v45, %v5957_v31  ;;  %v6117_v54 = vpack.c.bf16 %v6113_v19, %v2513_v7  ;;  %4583 = vmatpush3.bf16.msra.mxu0 %v4821_v6  ;;  %4455 = vmatprep.subr.bf16.mxu1 %v4823_v17  ;;  %v2553_v41 = vld [vmem:[#allocation3 + $0x81] sm:$0xff]  ;;  %v4831_v6 = vld [vmem:[%s6325_s5 + $0x1d8] sm:$0xff]   ;;  %v3550_v45 = vld [vmem:[%s6327_s7 + $0x10] sm:$0xff] }
 0x240   : > { %v2398_v25 = vmax.f32 %v2364_v13, 0.0  ;;  %4584 = vmatprep.subr.bf16.mxu0 %v4824_v0  ;;  %v2604_v16 = vpack.c.bf16 %v2467_v29, %v6073_v28  ;;  %v2525_v28 = vld [vmem:[#allocation3 + $0x9] sm:$0xff]  ;;  %v2599_v43 = vpack.c.bf16 %v2553_v41, %v6079_v49  ;;  %v4833_v49 = vld [vmem:[%s6325_s5 + $0x1e0] sm:$0xff]   ;;  %v4840_v12 = vld [vmem:[%s6325_s5 + $0x1b8] sm:$0xff]  }
 0x241   : > { %v2413_v55 = vmax.f32 %v2395_v52, %v2397_v33  ;;  %v2396_v40 = vmax.f32 %v2356_v15, 0.0  ;;  %3250 = vmatmul.mubr.bf16.gmra.mrb[136].mxu1 %v6117_v54  ;;  %v2584_v63 = vpack.c.bf16 %v6006_v26, %v2525_v28  ;;  %v4828_v26 = vld [vmem:[%s6325_s5 + $0x188] sm:$0xff]   ;;  %v3548_v13 = vld [vmem:[%s6327_s7] sm:$0xff]  ;;  %v3551_v7 = vld [vmem:[%s6327_s7 + $0x18] sm:$0xff] }
 0x242   : > { %v2581_v9 = vld [vmem:[#allocation3 + $0xe1] sm:$0xff]  ;;  %v3563_v28 = vld [vmem:[%s6327_s7 + $0x78] sm:$0xff] }
 0x243   : > { %2429 = vst [vmem:[#allocation4 + $0x70] sm:$0xff] %v2413_v55  ;;  %v2414_v48 = vmax.f32 %v2396_v40, %v2398_v25  ;;  %4585 = vmatpush3.bf16.msra.mxu0 %v4824_v0  ;;  %v4838_v0 = vld [vmem:[%s6325_s5 + $0x1b0] sm:$0xff]   ;;  %v3552_v52 = vld [vmem:[%s6327_s7 + $0x20] sm:$0xff]  ;;  %v3553_v15 = vld [vmem:[%s6327_s7 + $0x28] sm:$0xff] }
 0x244   : > { %v2443_v60 = vld [vmem:[#allocation4 + $0x60] ss:$2 sm:$0xff]  ;;  %v2459_v31 = vld [vmem:[#allocation4 + $0x61] ss:$2 sm:$0xff]  ;;  %4586 = vmatprep.subr.bf16.mxu0 %v4827_v62 }
 0x245   : > { %v2468_v24 = vmax.f32 %v2443_v60, %v2459_v31  ;;  %2430 = vst [vmem:[#allocation4 + $0x78] sm:$0xff] %v2414_v48  ;;  %v3554_v25 = vld [vmem:[%s6327_s7 + $0x30] sm:$0xff]  ;;  %v3556_v60 = vld [vmem:[%s6327_s7 + $0x40] sm:$0xff]  ;;  %v3557_v31 = vld [vmem:[%s6327_s7 + $0x48] sm:$0xff] }
 0x246   : > { %v2554_v47 = vld [vmem:[#allocation3 + $0x99] sm:$0xff] }
 0x247   : > { %2507 = vst [vmem:[#allocation3 + $0xb0] sm:$0xff] %v2468_v24  ;;  %v2605_v59 = vpack.c.bf16 %v2554_v47, %v2553_v41  ;;  %v6123_v56 = vpack.c.bf16 %v2468_v24, %v2467_v29  ;;  %4587 = vmatpush3.bf16.msra.mxu0 %v4827_v62  ;;  %v2515_v18 = vld [vmem:[#allocation3 + $0x97] sm:$0xff] }
 0x248   : > { %v2603_v51 = vpack.c.bf16 %v2515_v18, %v6113_v19  ;;  %v4839_v29 = vld [vmem:[%s6325_s5 + $0x1f8] sm:$0xff]   ;;  %v4635_v19 = vpack.c.bf16 %v3551_v7, %v3550_v45 }
 0x249   : > { %3379 = vmatprep.mubr.bf16.mxu0 %v2605_v59  ;;  %3257 = vmatprep.mubr.bf16.mxu1 %v6123_v56  ;;  %v3555_v62 = vld [vmem:[%s6327_s7 + $0x38] sm:$0xff] }
 0x24a   : > { %3380 = vmatmul.mubr.bf16.gmra.mrb[168].mxu0 %v2604_v16  ;;  %v4641_v55 = vpack.c.bf16 %v3555_v62, %v3554_v25  ;;  %v3558_v16 = vld [vmem:[%s6327_s7 + $0x50] sm:$0xff] }
 0x24c   : > { %v2445_v20 = vld [vmem:[#allocation4 + $0x70] ss:$2 sm:$0xff]  ;;  %v2461_v23 = vld [vmem:[#allocation4 + $0x71] ss:$2 sm:$0xff] }
 0x24d   : > { %v6127_v34 = vmax.f32 %v2445_v20, %v2461_v23  ;;  %v3559_v20 = vld [vmem:[%s6327_s7 + $0x58] sm:$0xff] }
 0x24e   : > { %v2516_v10 = vld [vmem:[#allocation3 + $0xaf] sm:$0xff]  ;;  %v4647_v23 = vpack.c.bf16 %v3559_v20, %v3558_v16 }
 0x24f   : > { %2508 = vst [vmem:[#allocation3 + $0xc8] sm:$0xff] %v6127_v34  ;;  %v6130_v58 = vpack.c.bf16 %v2516_v10, %v2515_v18  ;;  %v2555_v39 = vld [vmem:[#allocation3 + $0xb1] sm:$0xff]  ;;  %v2613_v61 = vpack.c.bf16 %v6127_v34, %v2468_v24  ;;  %v2616_v3 = vpack.c.bf16 %v5978_v38, %v6127_v34  ;;  %v3560_v34 = vld [vmem:[%s6327_s7 + $0x60] sm:$0xff]  ;;  %v3561_v18 = vld [vmem:[%s6327_s7 + $0x68] sm:$0xff] }
 0x250   : > { %v2608_v8 = vpack.c.bf16 %v2555_v39, %v2554_v47  ;;  %v4644_v47 = vpack.c.bf16 %v3557_v31, %v3556_v60 }
 0x251   : > { %3258 = vmatmul.mubr.bf16.gmra.mrb[140].mxu1 %v6130_v58 }
 0x252   : > { %3298 = vmatprep.mubr.bf16.mxu1 %v2585_v35  ;;  %v3562_v35 = vld [vmem:[%s6327_s7 + $0x70] sm:$0xff] }
 0x256   : > { %v2556_v42 = vld [vmem:[#allocation3 + $0xc9] sm:$0xff] }
 0x257   : > { %v2614_v44 = vpack.c.bf16 %v2556_v42, %v2555_v39  ;;  %v2540_v32 = vld [vmem:[#allocation3 + $0xc7] sm:$0xff]  ;;  %v2617_v17 = vpack.c.bf16 %v2581_v9, %v2556_v42 }
 0x258   : > { %v2612_v27 = vpack.c.bf16 %v2540_v32, %v2516_v10  ;;  %v4650_v10 = vpack.c.bf16 %v3561_v18, %v3560_v34 }
 0x259   : > { %3387 = vmatprep.mubr.bf16.mxu0 %v2614_v44  ;;  %3299 = vmatmul.mubr.bf16.vlgmr.msra.gmra.mrb[144].mxu1 %v2584_v63 }
 0x25a   : > { %3388 = vmatmul.mubr.bf16.gmra.mrb[172].mxu0 %v2613_v61  ;;  %3306 = vmatprep.mubr.bf16.mxu1 %v2594_v1 }
 0x25b   : > { %4456 = vmatpush3.bf16.msra.mxu1 %v4825_v30  ;;  %4588 = vmatprep.mubr.bf16.mxu0 %v2590_v50  ;;  %v4653_v30 = vpack.c.bf16 %v3563_v28, %v3562_v35 }
 0x25c   : > { %4457 = vmatprep.subr.bf16.mxu1 %v4826_v36 }
 0x25f   : > { %4458 = vmatpush3.bf16.msra.mxu1 %v4828_v26 }
 0x260   : > { %4459 = vmatprep.subr.bf16.mxu1 %v4829_v57 }
 0x261   : > { %3307 = vmatmul.mubr.bf16.gmra.mrb[148].mxu1 %v2590_v50 }
 0x262   : > { %4589 = vmatmul.mubr.bf16.vlgmr.msra.gmra.mrb[176].mxu0 %v2599_v43  ;;  %3314 = vmatprep.mubr.bf16.mxu1 %v2603_v51 }
 0x263   : > { %4460 = vmatpush3.bf16.msra.mxu1 %v4830_v37  ;;  %4592 = vmatprep.mubr.bf16.mxu0 %v2608_v8 }
 0x264   : > { %4461 = vmatprep.subr.bf16.mxu1 %v4831_v6 }
 0x267   : > { %4462 = vmatpush3.bf16.msra.mxu1 %v4832_v21 }
 0x268   : > { %4463 = vmatprep.subr.bf16.mxu1 %v4833_v49 }
 0x269   : > { %3315 = vmatmul.mubr.bf16.gmra.mrb[152].mxu1 %v2599_v43 }
 0x26a   : > { %4593 = vmatmul.mubr.bf16.gmra.mrb[180].mxu0 %v2617_v17  ;;  %3322 = vmatprep.mubr.bf16.mxu1 %v2612_v27 }
 0x26b   : > { %4464 = vmatpush3.bf16.msra.mxu1 %v4834_v4 }
 0x26c   : > { %4465 = vmatprep.subr.bf16.mxu1 %v4835_v46 }
 0x26f   : > { %4466 = vmatpush3.bf16.msra.mxu1 %v4836_v53 }
 0x270   : > { %4467 = vmatprep.subr.bf16.mxu1 %v4837_v2 }
 0x271   : > { %3323 = vmatmul.mubr.bf16.gmra.mrb[156].mxu1 %v2608_v8 }
 0x272   : > { %3428 = vmatprep.mubr.bf16.mxu1 %v6018_v11  ;;  %v2565_v11 = vld [vmem:[#allocation3 + $0xdf] sm:$0xff] }
 0x273   : > { %4468 = vmatpush3.bf16.msra.mxu1 %v4838_v0  ;;  %v2615_v33 = vpack.c.bf16 %v2565_v11, %v2540_v32 }
 0x274   : > { %4469 = vmatprep.subr.bf16.mxu1 %v4839_v29 }
 0x277   : > { %4470 = vmatpush3.bf16.msra.mxu1 %v4840_v12 }
 0x278   : > { %4631 = vmatprep.subr.bf16.mxu1 %v4908_v5 }
 0x27a   : > { %3429 = vmatmul.mubr.bf16.vlgmr.msra.gmra.mrb[160].mxu1 %v6054_v22  ;;  %v3549_v22 = vld [vmem:[%s6327_s7 + $0x8] sm:$0xff] }
 0x27b   : > { %3436 = vmatprep.mubr.bf16.mxu1 %v6090_v14  ;;  %v4632_v14 = vpack.c.bf16 %v3549_v22, %v3548_v13 }
 0x27d   : > { %4633 = vmatpush3.bf16.msra.mxu1 %v4632_v14  ;;  %v3786_v14 = vld [vmem:[%s6326_s6] ss:$0 sm:$0xff] }
 0x27e   : > { %4634 = vmatprep.subr.bf16.mxu1 %v4908_v5 }
 0x281   : > { %4636 = vmatpush3.bf16.msra.mxu1 %v4635_v19 }
 0x282   : > { %3437 = vmatmul.mubr.bf16.gmra.mrb[164].mxu1 %v6117_v54  ;;  %4637 = vmatprep.subr.bf16.mxu1 %v4908_v5  ;;  %v4638_v54 = vpack.c.bf16 %v3553_v15, %v3552_v52 }
 0x283   : > { %3444 = vmatprep.mubr.bf16.mxu1 %v6123_v56 }
 0x285   : > { %4639 = vmatpush3.bf16.msra.mxu1 %v4638_v54 }
 0x286   : > { %4640 = vmatprep.subr.bf16.mxu1 %v4908_v5 }
 0x289   : > { %4642 = vmatpush3.bf16.msra.mxu1 %v4641_v55 }
 0x28a   : > { %3445 = vmatmul.mubr.bf16.gmra.mrb[168].mxu1 %v6130_v58  ;;  %4643 = vmatprep.subr.bf16.mxu1 %v4908_v5 }
 0x28b   : > { %3452 = vmatprep.mubr.bf16.mxu1 %v2616_v3 }
 0x28d   : > { %4645 = vmatpush3.bf16.msra.mxu1 %v4644_v47 }
 0x28e   : > { %4646 = vmatprep.subr.bf16.mxu1 %v4908_v5 }
 0x291   : > { %4648 = vmatpush3.bf16.msra.mxu1 %v4647_v23 }
 0x292   : > { %3453 = vmatmul.mubr.bf16.gmra.mrb[172].mxu1 %v2615_v33  ;;  %4649 = vmatprep.subr.bf16.mxu1 %v4908_v5 }
 0x293   : > { %4628 = vmatprep.mubr.msk.f32.mxu1 %vm4909_vm0, %v5978_v38 }
 0x295   : > { %4651 = vmatpush3.bf16.msra.mxu1 %v4650_v10 }
 0x296   : > { %4652 = vmatprep.subr.bf16.mxu1 %v4908_v5 }
 0x299   : > { %4654 = vmatpush3.bf16.msra.mxu1 %v4653_v30 }
 0x2f4   : > { %v4351_v40 = vpop.f32.mrb[128].mxu1 }
 0x2f5   : > { %v4352_v48 = vpop.f32.mrb[129].mxu1 }
 0x2f6   : > { %v6230_v24 = vadd.f32 %v4352_v48, %v4351_v40  ;;  %v4354_v41 = vpop.f32.mrb[130].mxu1 }
 0x2f7   : > { %v4355_v59 = vpop.f32.mrb[131].mxu1 }
 0x2f8   : > { %v6232_v56 = vadd.f32 %v4355_v59, %v4354_v41  ;;  %v3236_v52 = vadd.f32 %v6230_v24, %v3786_v14 }
 0x2fa   : > { %v3239_v48 = vadd.f32 %v6232_v56, %v3786_v14 }
 0x2fd   : > { %v4431_v58 = vpop.f32.mrb[160].mxu0 }
 0x2fe   : > { %v4432_v39 = vpop.f32.mrb[161].mxu0 }
 0x2ff   : > { %v4433_v42 = vadd.f32 %v4432_v39, %v4431_v58  ;;  %v4434_v44 = vpop.f32.mrb[162].mxu0 }
 0x300   : > { %v4435_v63 = vpop.f32.mrb[163].mxu0 }
 0x301   : > { %v4436_v61 = vadd.f32 %v4435_v63, %v4434_v44 }
 0x304   : > { %v4357_v38 = vpop.f32.mrb[132].mxu1 }
 0x305   : > { %v4358_v1 = vpop.f32.mrb[133].mxu1 }
 0x306   : > { %v4359_v36 = vadd.f32 %v4358_v1, %v4357_v38  ;;  %v4360_v50 = vpop.f32.mrb[134].mxu1 }
 0x307   : > { %v4361_v26 = vpop.f32.mrb[135].mxu1 }
 0x308   : > { %v4362_v57 = vadd.f32 %v4361_v26, %v4360_v50  ;;  %v3244_v24 = vadd.f32 %v4359_v36, %v3786_v14 }
 0x30a   : > { %v3247_v44 = vadd.f32 %v4362_v57, %v3786_v14 }
 0x30d   : > { %v4437_v37 = vpop.f32.mrb[164].mxu0 }
 0x30e   : > { %v4438_v43 = vpop.f32.mrb[165].mxu0 }
 0x30f   : > { %v4439_v51 = vadd.f32 %v4438_v43, %v4437_v37  ;;  %v4440_v6 = vpop.f32.mrb[166].mxu0 }
 0x310   : > { %v4441_v8 = vpop.f32.mrb[167].mxu0 }
 0x311   : > { %v4442_v21 = vadd.f32 %v4441_v8, %v4440_v6 }
 0x314   : > { %v4363_v49 = vpop.f32.mrb[136].mxu1 }
 0x315   : > { %v4364_v9 = vpop.f32.mrb[137].mxu1 }
 0x316   : > { %v4365_v32 = vadd.f32 %v4364_v9, %v4363_v49  ;;  %v4366_v4 = vpop.f32.mrb[138].mxu1 }
 0x317   : > { %v4367_v17 = vpop.f32.mrb[139].mxu1 }
 0x318   : > { %v4368_v27 = vadd.f32 %v4367_v17, %v4366_v4  ;;  %v3252_v37 = vadd.f32 %v4365_v32, %v3786_v14 }
 0x31a   : > { %v3255_v9 = vadd.f32 %v4368_v27, %v3786_v14 }
 0x31d   : > { %v4443_v5 = vpop.f32.mrb[168].mxu0 }
 0x31e   : > { %v4444_v46 = vpop.f32.mrb[169].mxu0 }
 0x31f   : > { %v4445_v53 = vadd.f32 %v4444_v46, %v4443_v5  ;;  %v4446_v2 = vpop.f32.mrb[170].mxu0 }
 0x320   : > { %v4447_v0 = vpop.f32.mrb[171].mxu0 }
 0x321   : > { %v4448_v29 = vadd.f32 %v4447_v0, %v4446_v2 }
 0x324   : > { %v4369_v12 = vpop.f32.mrb[140].mxu1 }
 0x325   : > { %v4370_v3 = vpop.f32.mrb[141].mxu1 }
 0x326   : > { %v4371_v11 = vadd.f32 %v4370_v3, %v4369_v12  ;;  %v4372_v33 = vpop.f32.mrb[142].mxu1 }
 0x327   : > { %v4373_v13 = vpop.f32.mrb[143].mxu1 }
 0x328   : > { %v4374_v22 = vadd.f32 %v4373_v13, %v4372_v33 }
 0x32a   : > { %v3263_v32 = vadd.f32 %v4374_v22, %v3786_v14 }
 0x32c   : > { %v4391_v45 = vpop.f32.mrb[144].mxu1 }
 0x32d   : > { %v4449_v7 = vpop.f32.mrb[172].mxu0  ;;  %v4392_v19 = vpop.f32.mrb[145].mxu1 }
 0x32e   : > { %v4393_v15 = vadd.f32 %v4392_v19, %v4391_v45  ;;  %v4450_v54 = vpop.f32.mrb[173].mxu0  ;;  %v4394_v25 = vpop.f32.mrb[146].mxu1 }
 0x32f   : > { %v4451_v62 = vadd.f32 %v4450_v54, %v4449_v7  ;;  %v4452_v55 = vpop.f32.mrb[174].mxu0  ;;  %v4395_v40 = vpop.f32.mrb[147].mxu1 }
 0x330   : > { %v3301_v60 = vadd.f32 %v4393_v15, %v3236_v52  ;;  %v4396_v31 = vadd.f32 %v4395_v40, %v4394_v25  ;;  %v4453_v41 = vpop.f32.mrb[175].mxu0 }
 0x331   : > { %v4454_v47 = vadd.f32 %v4453_v41, %v4452_v55 }
 0x332   : > { %v3304_v59 = vadd.f32 %v4396_v31, %v3239_v48  ;;  %v3366_v16 = vadd.f32 %v4433_v42, %v3301_v60 }
 0x334   : > { %v4397_v20 = vpop.f32.mrb[148].mxu1  ;;  %v3369_v23 = vadd.f32 %v4436_v61, %v3304_v59 }
 0x335   : > { %v6261_v34 = vpop.f32.mrb[176].mxu0  ;;  %v4398_v18 = vpop.f32.mrb[149].mxu1 }
 0x336   : > { %v4399_v10 = vadd.f32 %v4398_v18, %v4397_v20  ;;  %v3495_v58 = vpop.f32.mrb[177].mxu0  ;;  %v4400_v35 = vpop.f32.mrb[150].mxu1 }
 0x337   : > { %v4591_v28 = vpop.f32.mrb[178].mxu0  ;;  %v4401_v39 = vpop.f32.mrb[151].mxu1 }
 0x338   : > { %v3309_v63 = vadd.f32 %v4399_v10, %v3244_v24  ;;  %v4402_v56 = vadd.f32 %v4401_v39, %v4400_v35  ;;  %v3498_v30 = vpop.f32.mrb[179].mxu0 }
 0x33a   : > { %v3312_v38 = vadd.f32 %v4402_v56, %v3247_v44  ;;  %v3374_v1 = vadd.f32 %v4439_v51, %v3309_v63 }
 0x33c   : > { %v4403_v50 = vpop.f32.mrb[152].mxu1  ;;  %v3377_v26 = vadd.f32 %v4442_v21, %v3312_v38  ;;  %v3260_v21 = vadd.f32 %v4371_v11, %v3786_v14 }
 0x33d   : > { %v6263_v42 = vpop.f32.mrb[180].mxu0  ;;  %v4404_v61 = vpop.f32.mrb[153].mxu1 }
 0x33e   : > { %v4405_v43 = vadd.f32 %v4404_v61, %v4403_v50  ;;  %v3511_v6 = vpop.f32.mrb[181].mxu0  ;;  %v4406_v36 = vpop.f32.mrb[154].mxu1 }
 0x33f   : > { %v6265_v8 = vpop.f32.mrb[182].mxu0  ;;  %v4407_v49 = vpop.f32.mrb[155].mxu1 }
 0x340   : > { %v3317_v4 = vadd.f32 %v4405_v43, %v3252_v37  ;;  %v4408_v57 = vadd.f32 %v4407_v49, %v4406_v36  ;;  %v3514_v17 = vpop.f32.mrb[183].mxu0 }
 0x342   : > { %v3320_v5 = vadd.f32 %v4408_v57, %v3255_v9  ;;  %v3382_v46 = vadd.f32 %v4445_v53, %v3317_v4 }
 0x344   : > { %v4409_v2 = vpop.f32.mrb[156].mxu1  ;;  %v3385_v51 = vadd.f32 %v4448_v29, %v3320_v5 }
 0x345   : > { %v4410_v0 = vpop.f32.mrb[157].mxu1 }
 0x346   : > { %v4411_v12 = vadd.f32 %v4410_v0, %v4409_v2  ;;  %v4412_v3 = vpop.f32.mrb[158].mxu1 }
 0x347   : > { %v4413_v33 = vpop.f32.mrb[159].mxu1 }
 0x348   : > { %v3325_v13 = vadd.f32 %v4411_v12, %v3260_v21  ;;  %v4414_v45 = vadd.f32 %v4413_v33, %v4412_v3 }
 0x34a   : > { %v3328_v7 = vadd.f32 %v4414_v45, %v3263_v32  ;;  %v3390_v19 = vadd.f32 %v4451_v62, %v3325_v13 }
 0x34c   : > { %v3393_v52 = vadd.f32 %v4454_v47, %v3328_v7 }
 0x34d   : > { %v4471_v15 = vpop.f32.mrb[160].mxu1 }
 0x34e   : > { %v4472_v27 = vpop.f32.mrb[161].mxu1 }
 0x34f   : > { %v4473_v54 = vadd.f32 %v4472_v27, %v4471_v15  ;;  %v4474_v25 = vpop.f32.mrb[162].mxu1 }
 0x350   : > { %v4475_v55 = vpop.f32.mrb[163].mxu1 }
 0x351   : > { %v3431_v40 = vadd.f32 %v4473_v54, %v3366_v16  ;;  %v4476_v53 = vadd.f32 %v4475_v55, %v4474_v25 }
 0x353   : > { %v3496_v48 = vadd.f32 %v3495_v58, %v3431_v40  ;;  %v3434_v29 = vadd.f32 %v4476_v53, %v3369_v23 }
 0x355   : > { %v3499_v60 = vadd.f32 %v3498_v30, %v3434_v29  ;;  %v4477_v11 = vpop.f32.mrb[164].mxu1  ;;  %v3526_v41 = vmax.f32 %v3496_v48, 0.0 }
 0x356   : > { %v4478_v31 = vpop.f32.mrb[165].mxu1 }
 0x357   : > { %v3527_v59 = vmax.f32 %v3499_v60, 0.0  ;;  %v4479_v22 = vadd.f32 %v4478_v31, %v4477_v11  ;;  %v4480_v14 = vpop.f32.mrb[166].mxu1 }
 0x358   : > { %v4481_v20 = vpop.f32.mrb[167].mxu1 }
 0x359   : > { %v3534_v18 = vadd.f32 %v3527_v59, %v3526_v41  ;;  %v3439_v62 = vadd.f32 %v4479_v22, %v3374_v1  ;;  %v4482_v47 = vadd.f32 %v4481_v20, %v4480_v14 }
 0x35b   : > { %v3504_v24 = vadd.f32 %v6261_v34, %v3439_v62  ;;  %v3442_v10 = vadd.f32 %v4482_v47, %v3377_v26 }
 0x35d   : > { %v3528_v35 = vmax.f32 %v3504_v24, 0.0  ;;  %v3507_v39 = vadd.f32 %v4591_v28, %v3442_v10  ;;  %v4483_v16 = vpop.f32.mrb[168].mxu1 }
 0x35e   : > { %v4484_v44 = vpop.f32.mrb[169].mxu1 }
 0x35f   : > { %v3535_v58 = vadd.f32 %v3534_v18, %v3528_v35  ;;  %v3529_v23 = vmax.f32 %v3507_v39, 0.0  ;;  %v4485_v63 = vadd.f32 %v4484_v44, %v4483_v16  ;;  %v4486_v56 = vpop.f32.mrb[170].mxu1 }
 0x360   : > { %v4487_v30 = vpop.f32.mrb[171].mxu1 }
 0x361   : > { %v3536_v38 = vadd.f32 %v3535_v58, %v3529_v23  ;;  %v3447_v50 = vadd.f32 %v4485_v63, %v3382_v46  ;;  %v4488_v61 = vadd.f32 %v4487_v30, %v4486_v56 }
 0x363   : > { %v3512_v37 = vadd.f32 %v3511_v6, %v3447_v50  ;;  %v3450_v43 = vadd.f32 %v4488_v61, %v3385_v51 }
 0x365   : > { %v3530_v36 = vmax.f32 %v3512_v37, 0.0  ;;  %v3515_v1 = vadd.f32 %v3514_v17, %v3450_v43  ;;  %v4489_v49 = vpop.f32.mrb[172].mxu1 }
 0x366   : > { %v4490_v9 = vpop.f32.mrb[173].mxu1 }
 0x367   : > { %v3537_v34 = vadd.f32 %v3536_v38, %v3530_v36  ;;  %v3531_v26 = vmax.f32 %v3515_v1, 0.0  ;;  %v4491_v4 = vadd.f32 %v4490_v9, %v4489_v49  ;;  %v4492_v28 = vpop.f32.mrb[174].mxu1 }
 0x368   : > { %v4493_v57 = vpop.f32.mrb[175].mxu1 }
 0x369   : > { %v3538_v5 = vadd.f32 %v3537_v34, %v3531_v26  ;;  %v3455_v2 = vadd.f32 %v4491_v4, %v3390_v19  ;;  %v4494_v0 = vadd.f32 %v4493_v57, %v4492_v28 }
 0x36b   : > { %v3520_v21 = vadd.f32 %v6263_v42, %v3455_v2  ;;  %v3458_v12 = vadd.f32 %v4494_v0, %v3393_v52  ;;  %v3564_v42 = vld [vmem:[%s6328_s8] sm:$0x1] }
 0x36d   : > { %v3532_v46 = vmax.f32 %v3520_v21, 0.0  ;;  %v3523_v6 = vadd.f32 %v6265_v8, %v3458_v12 }
 0x36f   : > { %v3539_v51 = vadd.f32 %v3538_v5, %v3532_v46  ;;  %v3533_v17 = vmax.f32 %v3523_v6, 0.0 }
 0x371   : > { %v3540_v3 = vadd.f32 %v3539_v51, %v3533_v17 }
 0x373   : > { %v3541_v33 = vrot.slane %v3540_v3, 4 }
 0x375   : > { %v3542_v32 = vadd.f32 %v3541_v33, %v3540_v3 }
 0x377   : > { %v3543_v13 = vrot.slane %v3542_v32, 2 }
 0x379   : > { %v3544_v45 = vadd.f32 %v3543_v13, %v3542_v32 }
 0x37b   : > { %v3545_v7 = vrot.slane %v3544_v45, 1 }
 0x37d   : > { %v3546_v15 = vadd.f32 %v3545_v7, %v3544_v45 }
 0x37f   : > { %v3547_v27 = vmul.f32 0.015625, %v3546_v15 }
 0x381   : > { %4629 = vmatmul.mubr.f32.vlgmr.msra.gmra.mrb[176].mxu1 %v3547_v27 }
 0x454   : > { %v3631_v8 = vpop.f32.mrb[176].mxu1 }
 0x455   : > { %v3632_v19 = vadd.f32 %v3631_v8, %v3564_v42  ;;  %v4630_v52 = vpop.f32.mrb[177].mxu1 }
 0x457   : > { %3636 = vst.msk [vmem:[%s324_s28] sm:$0x1] %vm3635_vm1, %v3632_v19 }
 0x458   : > { %4856 = shalt.err (!%p4853_p3)
}
 0x459   : > { %s4857_s24 = scalar_lea.hbm %s6278_s17, 16  ;;  %s4861_s28 = scalar_lea.hbm %s6329_s9, 32 }
 0x45a   : > { %p4858_p4 = scmp.ne.s32.totalorder %s6278_s17, %s4857_s24  ;;  %p4862_p9 = scmp.lt.u32.totalorder %s6278_s17, %s6329_s9 }
 0x45b   : > { %p4863_p10 = scmp.lt.u32.totalorder %s4861_s28, %s4857_s24  ;;  %p4865_p12 = scmp.lt.u32.totalorder %s4857_s24, %s6278_s17 }
 0x45c   : > { %p4859_p7 = pnand %p4858_p4, %p4999_p5 }
 0x45d   : > { %p4864_p11 = por %p4863_p10, %p4862_p9 }
 0x45e   : > { %p4860_p8 = pneg %p4859_p7 }
 0x45f   : > { %p4866_p13 = por %p4865_p12, %p4864_p11 }
 0x461   : > { %p4867_p0 = pnand %p4866_p13, %p4860_p8 }
 0x463   : > { %4870 = shalt.err (!%p4867_p0)
}
 0x464   : > { %4655 = dma.vmem_to_hbm [thread:$0]  (%p4999_p5), %s6280_s21, 16, %s6278_s17, %s3638_s14  }
 0x465 PF: > { %p4661_p1 = scmp.ge.s32.totalorder %s4905_s12, 2  ;;  %s3662_s22 = sand.u32 1, %s4893_s30  }
 0x466   : > { %s3663_s13 = scalar_lea.sflag [#allocation6], %s3662_s22 }
 0x467   : > { %p4658_p2 = pnand %p4661_p1, %p5003_p6 }
 0x469   : > { %4888 = dma.done.wait (!%p4658_p2), %s3663_s13, 16  }
 0x46a   : > { %4890 = vsyncadd (!%p4658_p2), %s3663_s13, 4294967280  ;;  %p19_p3 = scmp.ge.s32.totalorder %s4986_s15, 4   ;;  %s6332_s30 = smov %s4897_s10 }
 0x46b   : > { %s6333_s10 = smov %s4901_s11  ;;  %s6334_s11 = smov %s4997_s18 }
 0x46c   : > { %s6335_s12 = smov %s4986_s15  ;;  %21 = sbr.rel (!%p19_p3) target bundleno = 3 (0x3), region = 110 }
 0x473   :  { %3667 = vsyncpa [#allocation6], 1 }
 0x474   :  { %3669 = vsyncpa [#allocation6 + $0x1], 1 }

</bundles_post_ra>
